<compile_context>
chip_gen: v7x
topology: tpu7x:2x2x1
jax: 0.10.0
libtpu: 0.0.40
codegen_flags: <defaults>
</compile_context>

<pallas_src>
import functools

import jax
import jax.numpy as jnp
from jax.experimental import pallas as pl
from jax.experimental.pallas import tpu as pltpu


HLAYERS = 2      # as in the reference script
HWIDTH = 32      # as in the reference script


def _round_up(x, m):
    return ((x + m - 1) // m) * m


# ----------------------------------------------------------------------------
# Fused Pallas kernel: full RK4 integration of dy/dt = MLP(y) * t
# ----------------------------------------------------------------------------
def _ode_rk4_kernel(ts_ref, y0_ref, slab_ref, out_ref, *, nin, hw):
    # Static, 8-row-aligned offsets into the packed parameter slab.
    off_b1 = hw
    off_w2 = hw + 8
    off_b2 = 2 * hw + 8
    off_w3 = 2 * hw + 16
    off_b3 = 3 * hw + 16

    # Load all weights into values ONCE; reused by every RK stage of every step.
    w1 = slab_ref[0:hw, :]                 # (hw, hw); rows >= nin are zero
    b1 = slab_ref[off_b1:off_b1 + 1, :]    # (1, hw)
    w2 = slab_ref[off_w2:off_w2 + hw, :]   # (hw, hw)
    b2 = slab_ref[off_b2:off_b2 + 1, :]    # (1, hw)
    w3 = slab_ref[off_w3:off_w3 + hw, :]   # (hw, hw); cols >= nin are zero
    b3 = slab_ref[off_b3:off_b3 + 1, :]    # (1, hw);  cols >= nin are zero

    def mlp_times_t(t, y):
        # veloc_func: network(y) * t.  SiLU via EUP exp + EUP approx reciprocal.
        h = jnp.dot(y, w1, preferred_element_type=jnp.float32) + b1
        h = h * pl.reciprocal(1.0 + jnp.exp(-h), approx=True)
        h = jnp.dot(h, w2, preferred_element_type=jnp.float32) + b2
        h = h * pl.reciprocal(1.0 + jnp.exp(-h), approx=True)
        o = jnp.dot(h, w3, preferred_element_type=jnp.float32) + b3
        return o * t                       # padded columns stay exactly zero

    y = y0_ref[...]                        # (bb, hw), stays on-chip
    traj = [y]
    n_steps = out_ref.shape[0] - 1         # static trip count, fully unrolled
    for i in range(n_steps):
        t0 = ts_ref[i]                     # SMEM scalar reads
        t1 = ts_ref[i + 1]
        dt = t1 - t0
        k1 = mlp_times_t(t0, y)
        k2 = mlp_times_t(t0 + 0.5 * dt, y + 0.5 * dt * k1)
        k3 = mlp_times_t(t0 + 0.5 * dt, y + 0.5 * dt * k2)
        k4 = mlp_times_t(t1, y + dt * k3)
        y = y + (dt / 6.0) * (k1 + 2.0 * k2 + 2.0 * k3 + k4)
        traj.append(y)

    # ONE store of the whole trajectory block (drop the lane padding).
    out_ref[...] = jnp.stack(traj, axis=0)[:, :, :nin]


# ----------------------------------------------------------------------------
# Pack W1/b1/W2/b2/W3/b3 into one 8-row-aligned (3*hw + 24, hw) f32 slab.
# ----------------------------------------------------------------------------
def pack_params(params, nin, hw):
    w1, b1, w2, b2, w3, b3 = [jnp.asarray(p, jnp.float32) for p in params]
    assert nin <= hw and hw % 8 == 0

    def pad2(x, rows, cols):
        return jnp.pad(x, ((0, rows - x.shape[0]), (0, cols - x.shape[1])))

    slab = jnp.concatenate([
        pad2(w1, hw, hw),                   # rows [0, hw)
        pad2(b1.reshape(1, -1), 8, hw),     # rows [hw, hw+8)
        pad2(w2, hw, hw),                   # rows [hw+8, 2hw+8)
        pad2(b2.reshape(1, -1), 8, hw),     # rows [2hw+8, 2hw+16)
        pad2(w3, hw, hw),                   # rows [2hw+16, 3hw+16)
        pad2(b3.reshape(1, -1), 8, hw),     # rows [3hw+16, 3hw+24)
    ], axis=0)
    return slab                             # (3*hw + 24, hw)


# ----------------------------------------------------------------------------
# ODEFunc forward: xhat = odeint(veloc_func, y0, tsteps) — single pallas_call.
# Accepts y0 of shape (nin,) (module semantics) or (B, nin) (batched).
# ----------------------------------------------------------------------------
def ode_func_forward(y0, tsteps, params):
    nin, hw = params[0].shape
    assert tsteps.ndim == 1
    n_t = tsteps.shape[0]

    squeeze = (y0.ndim == 1)
    y0_b = (y0.reshape(1, nin) if squeeze else y0).astype(jnp.float32)
    B = y0_b.shape[0]

    # Pad batch to a sublane multiple and the state width to hw lanes.
    B_pad = _round_up(max(B, 1), 8)
    y0_p = jnp.pad(y0_b, ((0, B_pad - B), (0, hw - nin)))

    slab = pack_params(params, nin, hw)
    rows = slab.shape[0]
    ts = tsteps.astype(jnp.float32)         # (n_t,) -> SMEM scalar path

    # Batch-block size: fill the MXU M dim; >1 block => the "parallel" grid axis
    # can shard across v7x's two TensorCores (no effect on 1-TC v5e/v6e).
    bb = 128 if B_pad % 128 == 0 else B_pad
    grid = (B_pad // bb,)

    out = pl.pallas_call(
        functools.partial(_ode_rk4_kernel, nin=nin, hw=hw),
        out_shape=jax.ShapeDtypeStruct((n_t, B_pad, nin), jnp.float32),
        grid=grid,
        in_specs=[
            pl.BlockSpec(memory_space=pltpu.MemorySpace.SMEM),  # tsteps (scalars)
            pl.BlockSpec((bb, hw), lambda i: (i, 0)),           # y0 batch block
            pl.BlockSpec((rows, hw), lambda i: (0, 0)),         # packed params (resident)
        ],
        out_specs=pl.BlockSpec((n_t, bb, nin), lambda i: (0, i, 0)),
        compiler_params=pltpu.CompilerParams(
            dimension_semantics=("parallel",)),
    )(ts, y0_p, slab)

    res = out[:, :B, :]
    if squeeze:
        res = res[:, 0, :]                  # (n_t, nin), matches odeint output
    return res


# ----------------------------------------------------------------------------
# Deterministic parameter init (PyTorch nn.Linear-style uniform bounds)
# Weights stored (in_features, out_features) so each layer is h = h @ W + b.
# ----------------------------------------------------------------------------
def init_params(key, nin, hw):
    def linear(key, fan_in, fan_out):
        kw, kb = jax.random.split(key)
        bound = 1.0 / jnp.sqrt(jnp.float32(fan_in))
        w = jax.random.uniform(kw, (fan_in, fan_out), jnp.float32, -bound, bound)
        b = jax.random.uniform(kb, (1, fan_out), jnp.float32, -bound, bound)
        return w, b

    k1, k2, k3 = jax.random.split(key, 3)
    w1, b1 = linear(k1, nin, hw)
    w2, b2 = linear(k2, hw, hw)
    w3, b3 = linear(k3, hw, nin)
    return (w1, b1, w2, b2, w3, b3)


# Pure-JAX reference (same fixed-step RK4, exact sigmoid) for a correctness check.
def _reference_forward(y0, tsteps, params):
    w1, b1, w2, b2, w3, b3 = params

    def veloc(t, y):
        h = y @ w1 + b1[0]
        h = h * jax.nn.sigmoid(h)
        h = h @ w2 + b2[0]
        h = h * jax.nn.sigmoid(h)
        return (h @ w3 + b3[0]) * t

    ys = [y0]
    y = y0
    for i in range(tsteps.shape[0] - 1):
        t0, t1 = tsteps[i], tsteps[i + 1]
        dt = t1 - t0
        k1 = veloc(t0, y)
        k2 = veloc(t0 + 0.5 * dt, y + 0.5 * dt * k1)
        k3 = veloc(t0 + 0.5 * dt, y + 0.5 * dt * k2)
        k4 = veloc(t1, y + dt * k3)
        y = y + (dt / 6.0) * (k1 + 2.0 * k2 + 2.0 * k3 + k4)
        ys.append(y)
    return jnp.stack(ys, axis=0)


if __name__ == "__main__":
    nin = 8          # number of state features (num_inputs = data.shape[1] - 1)
    n_t = 8          # number of output time points (len(t_test))

    key = jax.random.PRNGKey(0)
    k_params, k_y0, k_batch = jax.random.split(key, 3)

    params = init_params(k_params, nin, HWIDTH)
    y0 = jax.random.normal(k_y0, (nin,), jnp.float32)          # x_test[0, :]
    tsteps = jnp.linspace(0.0, 1.0, n_t, dtype=jnp.float32)    # t_test

    fwd = jax.jit(ode_func_forward)

    # Single-trajectory forward (module semantics: model(x_test[0, :], t_test)).
    xhat = fwd(y0, tsteps, params)
    jax.block_until_ready(xhat)
    assert xhat.shape == (n_t, nin), xhat.shape
    assert bool(jnp.all(jnp.isfinite(xhat)))

    ref = _reference_forward(y0, tsteps, params)
    assert bool(jnp.allclose(xhat, ref, atol=1e-2, rtol=1e-2)), \
        float(jnp.max(jnp.abs(xhat - ref)))

    # Batched trajectories: fills the MXU M dimension (and, for large batches,
    # the parallel grid axis shards blocks across v7x's two TensorCores).
    y0_batch = jax.random.normal(k_batch, (16, nin), jnp.float32)
    xb = fwd(y0_batch, tsteps, params)
    jax.block_until_ready(xb)
    assert xb.shape == (n_t, 16, nin), xb.shape
    assert bool(jnp.all(jnp.isfinite(xb)))

    print("KERNEL_OK")
</pallas_src>

<mosaic_0001>
module attributes {stable_mosaic.version = 11 : i64} {
  func.func @_ode_rk4_kernel(%arg0: i32, %arg1: memref<8xf32, #tpu.memory_space<smem>>, %arg2: memref<8x32xf32, #tpu.memory_space<vmem>>, %arg3: memref<120x32xf32, #tpu.memory_space<vmem>>, %arg4: memref<8x8x8xf32, #tpu.memory_space<vmem>>) attributes {dimension_semantics = [#tpu.dimension_semantics<parallel>], iteration_bounds = array<i64: 1>, scalar_prefetch = 0 : i64, scratch_operands = 0 : i64, tpu.core_type = #tpu.core_type<tc>, window_params = [{transform_indices = @transform_0, window_bounds = array<i64: 8>}, {transform_indices = @transform_1, window_bounds = array<i64: 8, 32>}, {pipeline_mode = #tpu.pipeline_mode<synchronous>, transform_indices = @transform_2, window_bounds = array<i64: 120, 32>}, {transform_indices = @transform_3, window_bounds = array<i64: 8, 8, 8>}]} {
    %c0 = arith.constant 0 : index
    %c0_0 = arith.constant 0 : index
    %0 = vector.load %arg3[%c0, %c0_0] : memref<120x32xf32, #tpu.memory_space<vmem>>, vector<32x32xf32>
    %c32 = arith.constant 32 : index
    %c0_1 = arith.constant 0 : index
    %1 = vector.load %arg3[%c32, %c0_1] : memref<120x32xf32, #tpu.memory_space<vmem>>, vector<1x32xf32>
    %c40 = arith.constant 40 : index
    %c0_2 = arith.constant 0 : index
    %2 = vector.load %arg3[%c40, %c0_2] : memref<120x32xf32, #tpu.memory_space<vmem>>, vector<32x32xf32>
    %c72 = arith.constant 72 : index
    %c0_3 = arith.constant 0 : index
    %3 = vector.load %arg3[%c72, %c0_3] : memref<120x32xf32, #tpu.memory_space<vmem>>, vector<1x32xf32>
    %c80 = arith.constant 80 : index
    %c0_4 = arith.constant 0 : index
    %4 = vector.load %arg3[%c80, %c0_4] : memref<120x32xf32, #tpu.memory_space<vmem>>, vector<32x32xf32>
    %c112 = arith.constant 112 : index
    %c0_5 = arith.constant 0 : index
    %5 = vector.load %arg3[%c112, %c0_5] : memref<120x32xf32, #tpu.memory_space<vmem>>, vector<1x32xf32>
    %c0_6 = arith.constant 0 : index
    %c0_7 = arith.constant 0 : index
    %6 = vector.load %arg2[%c0_6, %c0_7] : memref<8x32xf32, #tpu.memory_space<vmem>>, vector<8x32xf32>
    %c0_8 = arith.constant 0 : index
    %7 = memref.load %arg1[%c0_8] : memref<8xf32, #tpu.memory_space<smem>>
    %c1 = arith.constant 1 : index
    %8 = memref.load %arg1[%c1] : memref<8xf32, #tpu.memory_space<smem>>
    %9 = arith.subf %8, %7 : f32
    %cst = arith.constant dense<0.000000e+00> : vector<8x32xf32>
    %10 = tpu.matmul %6, %0, %cst {dimension_numbers = #tpu.dot_dimension_numbers<[1], [0], [0], [1], [0, 0, 1, 1], [], []>} : vector<8x32xf32>, vector<32x32xf32>, vector<8x32xf32> -> vector<8x32xf32>
    %11 = vector.broadcast %1 : vector<1x32xf32> to vector<8x32xf32>
    %12 = arith.addf %10, %11 : vector<8x32xf32>
    %cst_9 = arith.constant 0.000000e+00 : f32
    %13 = vector.broadcast %cst_9 : f32 to vector<8x32xf32>
    %14 = arith.subf %13, %12 : vector<8x32xf32>
    %15 = math.exp %14 : vector<8x32xf32>
    %cst_10 = arith.constant 1.000000e+00 : f32
    %16 = vector.broadcast %cst_10 : f32 to vector<8x32xf32>
    %17 = arith.addf %16, %15 : vector<8x32xf32>
    %18 = tpu.reciprocal %17 {approx = true} : vector<8x32xf32> -> vector<8x32xf32>
    %19 = arith.mulf %12, %18 : vector<8x32xf32>
    %cst_11 = arith.constant dense<0.000000e+00> : vector<8x32xf32>
    %20 = tpu.matmul %19, %2, %cst_11 {dimension_numbers = #tpu.dot_dimension_numbers<[1], [0], [0], [1], [0, 0, 1, 1], [], []>} : vector<8x32xf32>, vector<32x32xf32>, vector<8x32xf32> -> vector<8x32xf32>
    %21 = vector.broadcast %3 : vector<1x32xf32> to vector<8x32xf32>
    %22 = arith.addf %20, %21 : vector<8x32xf32>
    %cst_12 = arith.constant 0.000000e+00 : f32
    %23 = vector.broadcast %cst_12 : f32 to vector<8x32xf32>
    %24 = arith.subf %23, %22 : vector<8x32xf32>
    %25 = math.exp %24 : vector<8x32xf32>
    %cst_13 = arith.constant 1.000000e+00 : f32
    %26 = vector.broadcast %cst_13 : f32 to vector<8x32xf32>
    %27 = arith.addf %26, %25 : vector<8x32xf32>
    %28 = tpu.reciprocal %27 {approx = true} : vector<8x32xf32> -> vector<8x32xf32>
    %29 = arith.mulf %22, %28 : vector<8x32xf32>
    %cst_14 = arith.constant dense<0.000000e+00> : vector<8x32xf32>
    %30 = tpu.matmul %29, %4, %cst_14 {dimension_numbers = #tpu.dot_dimension_numbers<[1], [0], [0], [1], [0, 0, 1, 1], [], []>} : vector<8x32xf32>, vector<32x32xf32>, vector<8x32xf32> -> vector<8x32xf32>
    %31 = vector.broadcast %5 : vector<1x32xf32> to vector<8x32xf32>
    %32 = arith.addf %30, %31 : vector<8x32xf32>
    %33 = vector.broadcast %7 : f32 to vector<8x32xf32>
    %34 = arith.mulf %32, %33 : vector<8x32xf32>
    %cst_15 = arith.constant 5.000000e-01 : f32
    %35 = arith.mulf %cst_15, %9 : f32
    %36 = arith.addf %7, %35 : f32
    %cst_16 = arith.constant 5.000000e-01 : f32
    %37 = arith.mulf %cst_16, %9 : f32
    %38 = vector.broadcast %37 : f32 to vector<8x32xf32>
    %39 = arith.mulf %38, %34 : vector<8x32xf32>
    %40 = arith.addf %6, %39 : vector<8x32xf32>
    %cst_17 = arith.constant dense<0.000000e+00> : vector<8x32xf32>
    %41 = tpu.matmul %40, %0, %cst_17 {dimension_numbers = #tpu.dot_dimension_numbers<[1], [0], [0], [1], [0, 0, 1, 1], [], []>} : vector<8x32xf32>, vector<32x32xf32>, vector<8x32xf32> -> vector<8x32xf32>
    %42 = vector.broadcast %1 : vector<1x32xf32> to vector<8x32xf32>
    %43 = arith.addf %41, %42 : vector<8x32xf32>
    %cst_18 = arith.constant 0.000000e+00 : f32
    %44 = vector.broadcast %cst_18 : f32 to vector<8x32xf32>
    %45 = arith.subf %44, %43 : vector<8x32xf32>
    %46 = math.exp %45 : vector<8x32xf32>
    %cst_19 = arith.constant 1.000000e+00 : f32
    %47 = vector.broadcast %cst_19 : f32 to vector<8x32xf32>
    %48 = arith.addf %47, %46 : vector<8x32xf32>
    %49 = tpu.reciprocal %48 {approx = true} : vector<8x32xf32> -> vector<8x32xf32>
    %50 = arith.mulf %43, %49 : vector<8x32xf32>
    %cst_20 = arith.constant dense<0.000000e+00> : vector<8x32xf32>
    %51 = tpu.matmul %50, %2, %cst_20 {dimension_numbers = #tpu.dot_dimension_numbers<[1], [0], [0], [1], [0, 0, 1, 1], [], []>} : vector<8x32xf32>, vector<32x32xf32>, vector<8x32xf32> -> vector<8x32xf32>
    %52 = vector.broadcast %3 : vector<1x32xf32> to vector<8x32xf32>
    %53 = arith.addf %51, %52 : vector<8x32xf32>
    %cst_21 = arith.constant 0.000000e+00 : f32
    %54 = vector.broadcast %cst_21 : f32 to vector<8x32xf32>
    %55 = arith.subf %54, %53 : vector<8x32xf32>
    %56 = math.exp %55 : vector<8x32xf32>
    %cst_22 = arith.constant 1.000000e+00 : f32
    %57 = vector.broadcast %cst_22 : f32 to vector<8x32xf32>
    %58 = arith.addf %57, %56 : vector<8x32xf32>
    %59 = tpu.reciprocal %58 {approx = true} : vector<8x32xf32> -> vector<8x32xf32>
    %60 = arith.mulf %53, %59 : vector<8x32xf32>
    %cst_23 = arith.constant dense<0.000000e+00> : vector<8x32xf32>
    %61 = tpu.matmul %60, %4, %cst_23 {dimension_numbers = #tpu.dot_dimension_numbers<[1], [0], [0], [1], [0, 0, 1, 1], [], []>} : vector<8x32xf32>, vector<32x32xf32>, vector<8x32xf32> -> vector<8x32xf32>
    %62 = vector.broadcast %5 : vector<1x32xf32> to vector<8x32xf32>
    %63 = arith.addf %61, %62 : vector<8x32xf32>
    %64 = vector.broadcast %36 : f32 to vector<8x32xf32>
    %65 = arith.mulf %63, %64 : vector<8x32xf32>
    %cst_24 = arith.constant 5.000000e-01 : f32
    %66 = arith.mulf %cst_24, %9 : f32
    %67 = arith.addf %7, %66 : f32
    %cst_25 = arith.constant 5.000000e-01 : f32
    %68 = arith.mulf %cst_25, %9 : f32
    %69 = vector.broadcast %68 : f32 to vector<8x32xf32>
    %70 = arith.mulf %69, %65 : vector<8x32xf32>
    %71 = arith.addf %6, %70 : vector<8x32xf32>
    %cst_26 = arith.constant dense<0.000000e+00> : vector<8x32xf32>
    %72 = tpu.matmul %71, %0, %cst_26 {dimension_numbers = #tpu.dot_dimension_numbers<[1], [0], [0], [1], [0, 0, 1, 1], [], []>} : vector<8x32xf32>, vector<32x32xf32>, vector<8x32xf32> -> vector<8x32xf32>
    %73 = vector.broadcast %1 : vector<1x32xf32> to vector<8x32xf32>
    %74 = arith.addf %72, %73 : vector<8x32xf32>
    %cst_27 = arith.constant 0.000000e+00 : f32
    %75 = vector.broadcast %cst_27 : f32 to vector<8x32xf32>
    %76 = arith.subf %75, %74 : vector<8x32xf32>
    %77 = math.exp %76 : vector<8x32xf32>
    %cst_28 = arith.constant 1.000000e+00 : f32
    %78 = vector.broadcast %cst_28 : f32 to vector<8x32xf32>
    %79 = arith.addf %78, %77 : vector<8x32xf32>
    %80 = tpu.reciprocal %79 {approx = true} : vector<8x32xf32> -> vector<8x32xf32>
    %81 = arith.mulf %74, %80 : vector<8x32xf32>
    %cst_29 = arith.constant dense<0.000000e+00> : vector<8x32xf32>
    %82 = tpu.matmul %81, %2, %cst_29 {dimension_numbers = #tpu.dot_dimension_numbers<[1], [0], [0], [1], [0, 0, 1, 1], [], []>} : vector<8x32xf32>, vector<32x32xf32>, vector<8x32xf32> -> vector<8x32xf32>
    %83 = vector.broadcast %3 : vector<1x32xf32> to vector<8x32xf32>
    %84 = arith.addf %82, %83 : vector<8x32xf32>
    %cst_30 = arith.constant 0.000000e+00 : f32
    %85 = vector.broadcast %cst_30 : f32 to vector<8x32xf32>
    %86 = arith.subf %85, %84 : vector<8x32xf32>
    %87 = math.exp %86 : vector<8x32xf32>
    %cst_31 = arith.constant 1.000000e+00 : f32
    %88 = vector.broadcast %cst_31 : f32 to vector<8x32xf32>
    %89 = arith.addf %88, %87 : vector<8x32xf32>
    %90 = tpu.reciprocal %89 {approx = true} : vector<8x32xf32> -> vector<8x32xf32>
    %91 = arith.mulf %84, %90 : vector<8x32xf32>
    %cst_32 = arith.constant dense<0.000000e+00> : vector<8x32xf32>
    %92 = tpu.matmul %91, %4, %cst_32 {dimension_numbers = #tpu.dot_dimension_numbers<[1], [0], [0], [1], [0, 0, 1, 1], [], []>} : vector<8x32xf32>, vector<32x32xf32>, vector<8x32xf32> -> vector<8x32xf32>
    %93 = vector.broadcast %5 : vector<1x32xf32> to vector<8x32xf32>
    %94 = arith.addf %92, %93 : vector<8x32xf32>
    %95 = vector.broadcast %67 : f32 to vector<8x32xf32>
    %96 = arith.mulf %94, %95 : vector<8x32xf32>
    %97 = vector.broadcast %9 : f32 to vector<8x32xf32>
    %98 = arith.mulf %97, %96 : vector<8x32xf32>
    %99 = arith.addf %6, %98 : vector<8x32xf32>
    %cst_33 = arith.constant dense<0.000000e+00> : vector<8x32xf32>
    %100 = tpu.matmul %99, %0, %cst_33 {dimension_numbers = #tpu.dot_dimension_numbers<[1], [0], [0], [1], [0, 0, 1, 1], [], []>} : vector<8x32xf32>, vector<32x32xf32>, vector<8x32xf32> -> vector<8x32xf32>
    %101 = vector.broadcast %1 : vector<1x32xf32> to vector<8x32xf32>
    %102 = arith.addf %100, %101 : vector<8x32xf32>
    %cst_34 = arith.constant 0.000000e+00 : f32
    %103 = vector.broadcast %cst_34 : f32 to vector<8x32xf32>
    %104 = arith.subf %103, %102 : vector<8x32xf32>
    %105 = math.exp %104 : vector<8x32xf32>
    %cst_35 = arith.constant 1.000000e+00 : f32
    %106 = vector.broadcast %cst_35 : f32 to vector<8x32xf32>
    %107 = arith.addf %106, %105 : vector<8x32xf32>
    %108 = tpu.reciprocal %107 {approx = true} : vector<8x32xf32> -> vector<8x32xf32>
    %109 = arith.mulf %102, %108 : vector<8x32xf32>
    %cst_36 = arith.constant dense<0.000000e+00> : vector<8x32xf32>
    %110 = tpu.matmul %109, %2, %cst_36 {dimension_numbers = #tpu.dot_dimension_numbers<[1], [0], [0], [1], [0, 0, 1, 1], [], []>} : vector<8x32xf32>, vector<32x32xf32>, vector<8x32xf32> -> vector<8x32xf32>
    %111 = vector.broadcast %3 : vector<1x32xf32> to vector<8x32xf32>
    %112 = arith.addf %110, %111 : vector<8x32xf32>
    %cst_37 = arith.constant 0.000000e+00 : f32
    %113 = vector.broadcast %cst_37 : f32 to vector<8x32xf32>
    %114 = arith.subf %113, %112 : vector<8x32xf32>
    %115 = math.exp %114 : vector<8x32xf32>
    %cst_38 = arith.constant 1.000000e+00 : f32
    %116 = vector.broadcast %cst_38 : f32 to vector<8x32xf32>
    %117 = arith.addf %116, %115 : vector<8x32xf32>
    %118 = tpu.reciprocal %117 {approx = true} : vector<8x32xf32> -> vector<8x32xf32>
    %119 = arith.mulf %112, %118 : vector<8x32xf32>
    %cst_39 = arith.constant dense<0.000000e+00> : vector<8x32xf32>
    %120 = tpu.matmul %119, %4, %cst_39 {dimension_numbers = #tpu.dot_dimension_numbers<[1], [0], [0], [1], [0, 0, 1, 1], [], []>} : vector<8x32xf32>, vector<32x32xf32>, vector<8x32xf32> -> vector<8x32xf32>
    %121 = vector.broadcast %5 : vector<1x32xf32> to vector<8x32xf32>
    %122 = arith.addf %120, %121 : vector<8x32xf32>
    %123 = vector.broadcast %8 : f32 to vector<8x32xf32>
    %124 = arith.mulf %122, %123 : vector<8x32xf32>
    %cst_40 = arith.constant 6.000000e+00 : f32
    %125 = arith.divf %9, %cst_40 : f32
    %cst_41 = arith.constant 2.000000e+00 : f32
    %126 = vector.broadcast %cst_41 : f32 to vector<8x32xf32>
    %127 = arith.mulf %126, %65 : vector<8x32xf32>
    %128 = arith.addf %34, %127 : vector<8x32xf32>
    %cst_42 = arith.constant 2.000000e+00 : f32
    %129 = vector.broadcast %cst_42 : f32 to vector<8x32xf32>
    %130 = arith.mulf %129, %96 : vector<8x32xf32>
    %131 = arith.addf %128, %130 : vector<8x32xf32>
    %132 = arith.addf %131, %124 : vector<8x32xf32>
    %133 = vector.broadcast %125 : f32 to vector<8x32xf32>
    %134 = arith.mulf %133, %132 : vector<8x32xf32>
    %135 = arith.addf %6, %134 : vector<8x32xf32>
    %c1_43 = arith.constant 1 : index
    %136 = memref.load %arg1[%c1_43] : memref<8xf32, #tpu.memory_space<smem>>
    %c2 = arith.constant 2 : index
    %137 = memref.load %arg1[%c2] : memref<8xf32, #tpu.memory_space<smem>>
    %138 = arith.subf %137, %136 : f32
    %cst_44 = arith.constant dense<0.000000e+00> : vector<8x32xf32>
    %139 = tpu.matmul %135, %0, %cst_44 {dimension_numbers = #tpu.dot_dimension_numbers<[1], [0], [0], [1], [0, 0, 1, 1], [], []>} : vector<8x32xf32>, vector<32x32xf32>, vector<8x32xf32> -> vector<8x32xf32>
    %140 = vector.broadcast %1 : vector<1x32xf32> to vector<8x32xf32>
    %141 = arith.addf %139, %140 : vector<8x32xf32>
    %cst_45 = arith.constant 0.000000e+00 : f32
    %142 = vector.broadcast %cst_45 : f32 to vector<8x32xf32>
    %143 = arith.subf %142, %141 : vector<8x32xf32>
    %144 = math.exp %143 : vector<8x32xf32>
    %cst_46 = arith.constant 1.000000e+00 : f32
    %145 = vector.broadcast %cst_46 : f32 to vector<8x32xf32>
    %146 = arith.addf %145, %144 : vector<8x32xf32>
    %147 = tpu.reciprocal %146 {approx = true} : vector<8x32xf32> -> vector<8x32xf32>
    %148 = arith.mulf %141, %147 : vector<8x32xf32>
    %cst_47 = arith.constant dense<0.000000e+00> : vector<8x32xf32>
    %149 = tpu.matmul %148, %2, %cst_47 {dimension_numbers = #tpu.dot_dimension_numbers<[1], [0], [0], [1], [0, 0, 1, 1], [], []>} : vector<8x32xf32>, vector<32x32xf32>, vector<8x32xf32> -> vector<8x32xf32>
    %150 = vector.broadcast %3 : vector<1x32xf32> to vector<8x32xf32>
    %151 = arith.addf %149, %150 : vector<8x32xf32>
    %cst_48 = arith.constant 0.000000e+00 : f32
    %152 = vector.broadcast %cst_48 : f32 to vector<8x32xf32>
    %153 = arith.subf %152, %151 : vector<8x32xf32>
    %154 = math.exp %153 : vector<8x32xf32>
    %cst_49 = arith.constant 1.000000e+00 : f32
    %155 = vector.broadcast %cst_49 : f32 to vector<8x32xf32>
    %156 = arith.addf %155, %154 : vector<8x32xf32>
    %157 = tpu.reciprocal %156 {approx = true} : vector<8x32xf32> -> vector<8x32xf32>
    %158 = arith.mulf %151, %157 : vector<8x32xf32>
    %cst_50 = arith.constant dense<0.000000e+00> : vector<8x32xf32>
    %159 = tpu.matmul %158, %4, %cst_50 {dimension_numbers = #tpu.dot_dimension_numbers<[1], [0], [0], [1], [0, 0, 1, 1], [], []>} : vector<8x32xf32>, vector<32x32xf32>, vector<8x32xf32> -> vector<8x32xf32>
    %160 = vector.broadcast %5 : vector<1x32xf32> to vector<8x32xf32>
    %161 = arith.addf %159, %160 : vector<8x32xf32>
    %162 = vector.broadcast %136 : f32 to vector<8x32xf32>
    %163 = arith.mulf %161, %162 : vector<8x32xf32>
    %cst_51 = arith.constant 5.000000e-01 : f32
    %164 = arith.mulf %cst_51, %138 : f32
    %165 = arith.addf %136, %164 : f32
    %cst_52 = arith.constant 5.000000e-01 : f32
    %166 = arith.mulf %cst_52, %138 : f32
    %167 = vector.broadcast %166 : f32 to vector<8x32xf32>
    %168 = arith.mulf %167, %163 : vector<8x32xf32>
    %169 = arith.addf %135, %168 : vector<8x32xf32>
    %cst_53 = arith.constant dense<0.000000e+00> : vector<8x32xf32>
    %170 = tpu.matmul %169, %0, %cst_53 {dimension_numbers = #tpu.dot_dimension_numbers<[1], [0], [0], [1], [0, 0, 1, 1], [], []>} : vector<8x32xf32>, vector<32x32xf32>, vector<8x32xf32> -> vector<8x32xf32>
    %171 = vector.broadcast %1 : vector<1x32xf32> to vector<8x32xf32>
    %172 = arith.addf %170, %171 : vector<8x32xf32>
    %cst_54 = arith.constant 0.000000e+00 : f32
    %173 = vector.broadcast %cst_54 : f32 to vector<8x32xf32>
    %174 = arith.subf %173, %172 : vector<8x32xf32>
    %175 = math.exp %174 : vector<8x32xf32>
    %cst_55 = arith.constant 1.000000e+00 : f32
    %176 = vector.broadcast %cst_55 : f32 to vector<8x32xf32>
    %177 = arith.addf %176, %175 : vector<8x32xf32>
    %178 = tpu.reciprocal %177 {approx = true} : vector<8x32xf32> -> vector<8x32xf32>
    %179 = arith.mulf %172, %178 : vector<8x32xf32>
    %cst_56 = arith.constant dense<0.000000e+00> : vector<8x32xf32>
    %180 = tpu.matmul %179, %2, %cst_56 {dimension_numbers = #tpu.dot_dimension_numbers<[1], [0], [0], [1], [0, 0, 1, 1], [], []>} : vector<8x32xf32>, vector<32x32xf32>, vector<8x32xf32> -> vector<8x32xf32>
    %181 = vector.broadcast %3 : vector<1x32xf32> to vector<8x32xf32>
    %182 = arith.addf %180, %181 : vector<8x32xf32>
    %cst_57 = arith.constant 0.000000e+00 : f32
    %183 = vector.broadcast %cst_57 : f32 to vector<8x32xf32>
    %184 = arith.subf %183, %182 : vector<8x32xf32>
    %185 = math.exp %184 : vector<8x32xf32>
    %cst_58 = arith.constant 1.000000e+00 : f32
    %186 = vector.broadcast %cst_58 : f32 to vector<8x32xf32>
    %187 = arith.addf %186, %185 : vector<8x32xf32>
    %188 = tpu.reciprocal %187 {approx = true} : vector<8x32xf32> -> vector<8x32xf32>
    %189 = arith.mulf %182, %188 : vector<8x32xf32>
    %cst_59 = arith.constant dense<0.000000e+00> : vector<8x32xf32>
    %190 = tpu.matmul %189, %4, %cst_59 {dimension_numbers = #tpu.dot_dimension_numbers<[1], [0], [0], [1], [0, 0, 1, 1], [], []>} : vector<8x32xf32>, vector<32x32xf32>, vector<8x32xf32> -> vector<8x32xf32>
    %191 = vector.broadcast %5 : vector<1x32xf32> to vector<8x32xf32>
    %192 = arith.addf %190, %191 : vector<8x32xf32>
    %193 = vector.broadcast %165 : f32 to vector<8x32xf32>
    %194 = arith.mulf %192, %193 : vector<8x32xf32>
    %cst_60 = arith.constant 5.000000e-01 : f32
    %195 = arith.mulf %cst_60, %138 : f32
    %196 = arith.addf %136, %195 : f32
    %cst_61 = arith.constant 5.000000e-01 : f32
    %197 = arith.mulf %cst_61, %138 : f32
    %198 = vector.broadcast %197 : f32 to vector<8x32xf32>
    %199 = arith.mulf %198, %194 : vector<8x32xf32>
    %200 = arith.addf %135, %199 : vector<8x32xf32>
    %cst_62 = arith.constant dense<0.000000e+00> : vector<8x32xf32>
    %201 = tpu.matmul %200, %0, %cst_62 {dimension_numbers = #tpu.dot_dimension_numbers<[1], [0], [0], [1], [0, 0, 1, 1], [], []>} : vector<8x32xf32>, vector<32x32xf32>, vector<8x32xf32> -> vector<8x32xf32>
    %202 = vector.broadcast %1 : vector<1x32xf32> to vector<8x32xf32>
    %203 = arith.addf %201, %202 : vector<8x32xf32>
    %cst_63 = arith.constant 0.000000e+00 : f32
    %204 = vector.broadcast %cst_63 : f32 to vector<8x32xf32>
    %205 = arith.subf %204, %203 : vector<8x32xf32>
    %206 = math.exp %205 : vector<8x32xf32>
    %cst_64 = arith.constant 1.000000e+00 : f32
    %207 = vector.broadcast %cst_64 : f32 to vector<8x32xf32>
    %208 = arith.addf %207, %206 : vector<8x32xf32>
    %209 = tpu.reciprocal %208 {approx = true} : vector<8x32xf32> -> vector<8x32xf32>
    %210 = arith.mulf %203, %209 : vector<8x32xf32>
    %cst_65 = arith.constant dense<0.000000e+00> : vector<8x32xf32>
    %211 = tpu.matmul %210, %2, %cst_65 {dimension_numbers = #tpu.dot_dimension_numbers<[1], [0], [0], [1], [0, 0, 1, 1], [], []>} : vector<8x32xf32>, vector<32x32xf32>, vector<8x32xf32> -> vector<8x32xf32>
    %212 = vector.broadcast %3 : vector<1x32xf32> to vector<8x32xf32>
    %213 = arith.addf %211, %212 : vector<8x32xf32>
    %cst_66 = arith.constant 0.000000e+00 : f32
    %214 = vector.broadcast %cst_66 : f32 to vector<8x32xf32>
    %215 = arith.subf %214, %213 : vector<8x32xf32>
    %216 = math.exp %215 : vector<8x32xf32>
    %cst_67 = arith.constant 1.000000e+00 : f32
    %217 = vector.broadcast %cst_67 : f32 to vector<8x32xf32>
    %218 = arith.addf %217, %216 : vector<8x32xf32>
    %219 = tpu.reciprocal %218 {approx = true} : vector<8x32xf32> -> vector<8x32xf32>
    %220 = arith.mulf %213, %219 : vector<8x32xf32>
    %cst_68 = arith.constant dense<0.000000e+00> : vector<8x32xf32>
    %221 = tpu.matmul %220, %4, %cst_68 {dimension_numbers = #tpu.dot_dimension_numbers<[1], [0], [0], [1], [0, 0, 1, 1], [], []>} : vector<8x32xf32>, vector<32x32xf32>, vector<8x32xf32> -> vector<8x32xf32>
    %222 = vector.broadcast %5 : vector<1x32xf32> to vector<8x32xf32>
    %223 = arith.addf %221, %222 : vector<8x32xf32>
    %224 = vector.broadcast %196 : f32 to vector<8x32xf32>
    %225 = arith.mulf %223, %224 : vector<8x32xf32>
    %226 = vector.broadcast %138 : f32 to vector<8x32xf32>
    %227 = arith.mulf %226, %225 : vector<8x32xf32>
    %228 = arith.addf %135, %227 : vector<8x32xf32>
    %cst_69 = arith.constant dense<0.000000e+00> : vector<8x32xf32>
    %229 = tpu.matmul %228, %0, %cst_69 {dimension_numbers = #tpu.dot_dimension_numbers<[1], [0], [0], [1], [0, 0, 1, 1], [], []>} : vector<8x32xf32>, vector<32x32xf32>, vector<8x32xf32> -> vector<8x32xf32>
    %230 = vector.broadcast %1 : vector<1x32xf32> to vector<8x32xf32>
    %231 = arith.addf %229, %230 : vector<8x32xf32>
    %cst_70 = arith.constant 0.000000e+00 : f32
    %232 = vector.broadcast %cst_70 : f32 to vector<8x32xf32>
    %233 = arith.subf %232, %231 : vector<8x32xf32>
    %234 = math.exp %233 : vector<8x32xf32>
    %cst_71 = arith.constant 1.000000e+00 : f32
    %235 = vector.broadcast %cst_71 : f32 to vector<8x32xf32>
    %236 = arith.addf %235, %234 : vector<8x32xf32>
    %237 = tpu.reciprocal %236 {approx = true} : vector<8x32xf32> -> vector<8x32xf32>
    %238 = arith.mulf %231, %237 : vector<8x32xf32>
    %cst_72 = arith.constant dense<0.000000e+00> : vector<8x32xf32>
    %239 = tpu.matmul %238, %2, %cst_72 {dimension_numbers = #tpu.dot_dimension_numbers<[1], [0], [0], [1], [0, 0, 1, 1], [], []>} : vector<8x32xf32>, vector<32x32xf32>, vector<8x32xf32> -> vector<8x32xf32>
    %240 = vector.broadcast %3 : vector<1x32xf32> to vector<8x32xf32>
    %241 = arith.addf %239, %240 : vector<8x32xf32>
    %cst_73 = arith.constant 0.000000e+00 : f32
    %242 = vector.broadcast %cst_73 : f32 to vector<8x32xf32>
    %243 = arith.subf %242, %241 : vector<8x32xf32>
    %244 = math.exp %243 : vector<8x32xf32>
    %cst_74 = arith.constant 1.000000e+00 : f32
    %245 = vector.broadcast %cst_74 : f32 to vector<8x32xf32>
    %246 = arith.addf %245, %244 : vector<8x32xf32>
    %247 = tpu.reciprocal %246 {approx = true} : vector<8x32xf32> -> vector<8x32xf32>
    %248 = arith.mulf %241, %247 : vector<8x32xf32>
    %cst_75 = arith.constant dense<0.000000e+00> : vector<8x32xf32>
    %249 = tpu.matmul %248, %4, %cst_75 {dimension_numbers = #tpu.dot_dimension_numbers<[1], [0], [0], [1], [0, 0, 1, 1], [], []>} : vector<8x32xf32>, vector<32x32xf32>, vector<8x32xf32> -> vector<8x32xf32>
    %250 = vector.broadcast %5 : vector<1x32xf32> to vector<8x32xf32>
    %251 = arith.addf %249, %250 : vector<8x32xf32>
    %252 = vector.broadcast %137 : f32 to vector<8x32xf32>
    %253 = arith.mulf %251, %252 : vector<8x32xf32>
    %cst_76 = arith.constant 6.000000e+00 : f32
    %254 = arith.divf %138, %cst_76 : f32
    %cst_77 = arith.constant 2.000000e+00 : f32
    %255 = vector.broadcast %cst_77 : f32 to vector<8x32xf32>
    %256 = arith.mulf %255, %194 : vector<8x32xf32>
    %257 = arith.addf %163, %256 : vector<8x32xf32>
    %cst_78 = arith.constant 2.000000e+00 : f32
    %258 = vector.broadcast %cst_78 : f32 to vector<8x32xf32>
    %259 = arith.mulf %258, %225 : vector<8x32xf32>
    %260 = arith.addf %257, %259 : vector<8x32xf32>
    %261 = arith.addf %260, %253 : vector<8x32xf32>
    %262 = vector.broadcast %254 : f32 to vector<8x32xf32>
    %263 = arith.mulf %262, %261 : vector<8x32xf32>
    %264 = arith.addf %135, %263 : vector<8x32xf32>
    %c2_79 = arith.constant 2 : index
    %265 = memref.load %arg1[%c2_79] : memref<8xf32, #tpu.memory_space<smem>>
    %c3 = arith.constant 3 : index
    %266 = memref.load %arg1[%c3] : memref<8xf32, #tpu.memory_space<smem>>
    %267 = arith.subf %266, %265 : f32
    %cst_80 = arith.constant dense<0.000000e+00> : vector<8x32xf32>
    %268 = tpu.matmul %264, %0, %cst_80 {dimension_numbers = #tpu.dot_dimension_numbers<[1], [0], [0], [1], [0, 0, 1, 1], [], []>} : vector<8x32xf32>, vector<32x32xf32>, vector<8x32xf32> -> vector<8x32xf32>
    %269 = vector.broadcast %1 : vector<1x32xf32> to vector<8x32xf32>
    %270 = arith.addf %268, %269 : vector<8x32xf32>
    %cst_81 = arith.constant 0.000000e+00 : f32
    %271 = vector.broadcast %cst_81 : f32 to vector<8x32xf32>
    %272 = arith.subf %271, %270 : vector<8x32xf32>
    %273 = math.exp %272 : vector<8x32xf32>
    %cst_82 = arith.constant 1.000000e+00 : f32
    %274 = vector.broadcast %cst_82 : f32 to vector<8x32xf32>
    %275 = arith.addf %274, %273 : vector<8x32xf32>
    %276 = tpu.reciprocal %275 {approx = true} : vector<8x32xf32> -> vector<8x32xf32>
    %277 = arith.mulf %270, %276 : vector<8x32xf32>
    %cst_83 = arith.constant dense<0.000000e+00> : vector<8x32xf32>
    %278 = tpu.matmul %277, %2, %cst_83 {dimension_numbers = #tpu.dot_dimension_numbers<[1], [0], [0], [1], [0, 0, 1, 1], [], []>} : vector<8x32xf32>, vector<32x32xf32>, vector<8x32xf32> -> vector<8x32xf32>
    %279 = vector.broadcast %3 : vector<1x32xf32> to vector<8x32xf32>
    %280 = arith.addf %278, %279 : vector<8x32xf32>
    %cst_84 = arith.constant 0.000000e+00 : f32
    %281 = vector.broadcast %cst_84 : f32 to vector<8x32xf32>
    %282 = arith.subf %281, %280 : vector<8x32xf32>
    %283 = math.exp %282 : vector<8x32xf32>
    %cst_85 = arith.constant 1.000000e+00 : f32
    %284 = vector.broadcast %cst_85 : f32 to vector<8x32xf32>
    %285 = arith.addf %284, %283 : vector<8x32xf32>
    %286 = tpu.reciprocal %285 {approx = true} : vector<8x32xf32> -> vector<8x32xf32>
    %287 = arith.mulf %280, %286 : vector<8x32xf32>
    %cst_86 = arith.constant dense<0.000000e+00> : vector<8x32xf32>
    %288 = tpu.matmul %287, %4, %cst_86 {dimension_numbers = #tpu.dot_dimension_numbers<[1], [0], [0], [1], [0, 0, 1, 1], [], []>} : vector<8x32xf32>, vector<32x32xf32>, vector<8x32xf32> -> vector<8x32xf32>
    %289 = vector.broadcast %5 : vector<1x32xf32> to vector<8x32xf32>
    %290 = arith.addf %288, %289 : vector<8x32xf32>
    %291 = vector.broadcast %265 : f32 to vector<8x32xf32>
    %292 = arith.mulf %290, %291 : vector<8x32xf32>
    %cst_87 = arith.constant 5.000000e-01 : f32
    %293 = arith.mulf %cst_87, %267 : f32
    %294 = arith.addf %265, %293 : f32
    %cst_88 = arith.constant 5.000000e-01 : f32
    %295 = arith.mulf %cst_88, %267 : f32
    %296 = vector.broadcast %295 : f32 to vector<8x32xf32>
    %297 = arith.mulf %296, %292 : vector<8x32xf32>
    %298 = arith.addf %264, %297 : vector<8x32xf32>
    %cst_89 = arith.constant dense<0.000000e+00> : vector<8x32xf32>
    %299 = tpu.matmul %298, %0, %cst_89 {dimension_numbers = #tpu.dot_dimension_numbers<[1], [0], [0], [1], [0, 0, 1, 1], [], []>} : vector<8x32xf32>, vector<32x32xf32>, vector<8x32xf32> -> vector<8x32xf32>
    %300 = vector.broadcast %1 : vector<1x32xf32> to vector<8x32xf32>
    %301 = arith.addf %299, %300 : vector<8x32xf32>
    %cst_90 = arith.constant 0.000000e+00 : f32
    %302 = vector.broadcast %cst_90 : f32 to vector<8x32xf32>
    %303 = arith.subf %302, %301 : vector<8x32xf32>
    %304 = math.exp %303 : vector<8x32xf32>
    %cst_91 = arith.constant 1.000000e+00 : f32
    %305 = vector.broadcast %cst_91 : f32 to vector<8x32xf32>
    %306 = arith.addf %305, %304 : vector<8x32xf32>
    %307 = tpu.reciprocal %306 {approx = true} : vector<8x32xf32> -> vector<8x32xf32>
    %308 = arith.mulf %301, %307 : vector<8x32xf32>
    %cst_92 = arith.constant dense<0.000000e+00> : vector<8x32xf32>
    %309 = tpu.matmul %308, %2, %cst_92 {dimension_numbers = #tpu.dot_dimension_numbers<[1], [0], [0], [1], [0, 0, 1, 1], [], []>} : vector<8x32xf32>, vector<32x32xf32>, vector<8x32xf32> -> vector<8x32xf32>
    %310 = vector.broadcast %3 : vector<1x32xf32> to vector<8x32xf32>
    %311 = arith.addf %309, %310 : vector<8x32xf32>
    %cst_93 = arith.constant 0.000000e+00 : f32
    %312 = vector.broadcast %cst_93 : f32 to vector<8x32xf32>
    %313 = arith.subf %312, %311 : vector<8x32xf32>
    %314 = math.exp %313 : vector<8x32xf32>
    %cst_94 = arith.constant 1.000000e+00 : f32
    %315 = vector.broadcast %cst_94 : f32 to vector<8x32xf32>
    %316 = arith.addf %315, %314 : vector<8x32xf32>
    %317 = tpu.reciprocal %316 {approx = true} : vector<8x32xf32> -> vector<8x32xf32>
    %318 = arith.mulf %311, %317 : vector<8x32xf32>
    %cst_95 = arith.constant dense<0.000000e+00> : vector<8x32xf32>
    %319 = tpu.matmul %318, %4, %cst_95 {dimension_numbers = #tpu.dot_dimension_numbers<[1], [0], [0], [1], [0, 0, 1, 1], [], []>} : vector<8x32xf32>, vector<32x32xf32>, vector<8x32xf32> -> vector<8x32xf32>
    %320 = vector.broadcast %5 : vector<1x32xf32> to vector<8x32xf32>
    %321 = arith.addf %319, %320 : vector<8x32xf32>
    %322 = vector.broadcast %294 : f32 to vector<8x32xf32>
    %323 = arith.mulf %321, %322 : vector<8x32xf32>
    %cst_96 = arith.constant 5.000000e-01 : f32
    %324 = arith.mulf %cst_96, %267 : f32
    %325 = arith.addf %265, %324 : f32
    %cst_97 = arith.constant 5.000000e-01 : f32
    %326 = arith.mulf %cst_97, %267 : f32
    %327 = vector.broadcast %326 : f32 to vector<8x32xf32>
    %328 = arith.mulf %327, %323 : vector<8x32xf32>
    %329 = arith.addf %264, %328 : vector<8x32xf32>
    %cst_98 = arith.constant dense<0.000000e+00> : vector<8x32xf32>
    %330 = tpu.matmul %329, %0, %cst_98 {dimension_numbers = #tpu.dot_dimension_numbers<[1], [0], [0], [1], [0, 0, 1, 1], [], []>} : vector<8x32xf32>, vector<32x32xf32>, vector<8x32xf32> -> vector<8x32xf32>
    %331 = vector.broadcast %1 : vector<1x32xf32> to vector<8x32xf32>
    %332 = arith.addf %330, %331 : vector<8x32xf32>
    %cst_99 = arith.constant 0.000000e+00 : f32
    %333 = vector.broadcast %cst_99 : f32 to vector<8x32xf32>
    %334 = arith.subf %333, %332 : vector<8x32xf32>
    %335 = math.exp %334 : vector<8x32xf32>
    %cst_100 = arith.constant 1.000000e+00 : f32
    %336 = vector.broadcast %cst_100 : f32 to vector<8x32xf32>
    %337 = arith.addf %336, %335 : vector<8x32xf32>
    %338 = tpu.reciprocal %337 {approx = true} : vector<8x32xf32> -> vector<8x32xf32>
    %339 = arith.mulf %332, %338 : vector<8x32xf32>
    %cst_101 = arith.constant dense<0.000000e+00> : vector<8x32xf32>
    %340 = tpu.matmul %339, %2, %cst_101 {dimension_numbers = #tpu.dot_dimension_numbers<[1], [0], [0], [1], [0, 0, 1, 1], [], []>} : vector<8x32xf32>, vector<32x32xf32>, vector<8x32xf32> -> vector<8x32xf32>
    %341 = vector.broadcast %3 : vector<1x32xf32> to vector<8x32xf32>
    %342 = arith.addf %340, %341 : vector<8x32xf32>
    %cst_102 = arith.constant 0.000000e+00 : f32
    %343 = vector.broadcast %cst_102 : f32 to vector<8x32xf32>
    %344 = arith.subf %343, %342 : vector<8x32xf32>
    %345 = math.exp %344 : vector<8x32xf32>
    %cst_103 = arith.constant 1.000000e+00 : f32
    %346 = vector.broadcast %cst_103 : f32 to vector<8x32xf32>
    %347 = arith.addf %346, %345 : vector<8x32xf32>
    %348 = tpu.reciprocal %347 {approx = true} : vector<8x32xf32> -> vector<8x32xf32>
    %349 = arith.mulf %342, %348 : vector<8x32xf32>
    %cst_104 = arith.constant dense<0.000000e+00> : vector<8x32xf32>
    %350 = tpu.matmul %349, %4, %cst_104 {dimension_numbers = #tpu.dot_dimension_numbers<[1], [0], [0], [1], [0, 0, 1, 1], [], []>} : vector<8x32xf32>, vector<32x32xf32>, vector<8x32xf32> -> vector<8x32xf32>
    %351 = vector.broadcast %5 : vector<1x32xf32> to vector<8x32xf32>
    %352 = arith.addf %350, %351 : vector<8x32xf32>
    %353 = vector.broadcast %325 : f32 to vector<8x32xf32>
    %354 = arith.mulf %352, %353 : vector<8x32xf32>
    %355 = vector.broadcast %267 : f32 to vector<8x32xf32>
    %356 = arith.mulf %355, %354 : vector<8x32xf32>
    %357 = arith.addf %264, %356 : vector<8x32xf32>
    %cst_105 = arith.constant dense<0.000000e+00> : vector<8x32xf32>
    %358 = tpu.matmul %357, %0, %cst_105 {dimension_numbers = #tpu.dot_dimension_numbers<[1], [0], [0], [1], [0, 0, 1, 1], [], []>} : vector<8x32xf32>, vector<32x32xf32>, vector<8x32xf32> -> vector<8x32xf32>
    %359 = vector.broadcast %1 : vector<1x32xf32> to vector<8x32xf32>
    %360 = arith.addf %358, %359 : vector<8x32xf32>
    %cst_106 = arith.constant 0.000000e+00 : f32
    %361 = vector.broadcast %cst_106 : f32 to vector<8x32xf32>
    %362 = arith.subf %361, %360 : vector<8x32xf32>
    %363 = math.exp %362 : vector<8x32xf32>
    %cst_107 = arith.constant 1.000000e+00 : f32
    %364 = vector.broadcast %cst_107 : f32 to vector<8x32xf32>
    %365 = arith.addf %364, %363 : vector<8x32xf32>
    %366 = tpu.reciprocal %365 {approx = true} : vector<8x32xf32> -> vector<8x32xf32>
    %367 = arith.mulf %360, %366 : vector<8x32xf32>
    %cst_108 = arith.constant dense<0.000000e+00> : vector<8x32xf32>
    %368 = tpu.matmul %367, %2, %cst_108 {dimension_numbers = #tpu.dot_dimension_numbers<[1], [0], [0], [1], [0, 0, 1, 1], [], []>} : vector<8x32xf32>, vector<32x32xf32>, vector<8x32xf32> -> vector<8x32xf32>
    %369 = vector.broadcast %3 : vector<1x32xf32> to vector<8x32xf32>
    %370 = arith.addf %368, %369 : vector<8x32xf32>
    %cst_109 = arith.constant 0.000000e+00 : f32
    %371 = vector.broadcast %cst_109 : f32 to vector<8x32xf32>
    %372 = arith.subf %371, %370 : vector<8x32xf32>
    %373 = math.exp %372 : vector<8x32xf32>
    %cst_110 = arith.constant 1.000000e+00 : f32
    %374 = vector.broadcast %cst_110 : f32 to vector<8x32xf32>
    %375 = arith.addf %374, %373 : vector<8x32xf32>
    %376 = tpu.reciprocal %375 {approx = true} : vector<8x32xf32> -> vector<8x32xf32>
    %377 = arith.mulf %370, %376 : vector<8x32xf32>
    %cst_111 = arith.constant dense<0.000000e+00> : vector<8x32xf32>
    %378 = tpu.matmul %377, %4, %cst_111 {dimension_numbers = #tpu.dot_dimension_numbers<[1], [0], [0], [1], [0, 0, 1, 1], [], []>} : vector<8x32xf32>, vector<32x32xf32>, vector<8x32xf32> -> vector<8x32xf32>
    %379 = vector.broadcast %5 : vector<1x32xf32> to vector<8x32xf32>
    %380 = arith.addf %378, %379 : vector<8x32xf32>
    %381 = vector.broadcast %266 : f32 to vector<8x32xf32>
    %382 = arith.mulf %380, %381 : vector<8x32xf32>
    %cst_112 = arith.constant 6.000000e+00 : f32
    %383 = arith.divf %267, %cst_112 : f32
    %cst_113 = arith.constant 2.000000e+00 : f32
    %384 = vector.broadcast %cst_113 : f32 to vector<8x32xf32>
    %385 = arith.mulf %384, %323 : vector<8x32xf32>
    %386 = arith.addf %292, %385 : vector<8x32xf32>
    %cst_114 = arith.constant 2.000000e+00 : f32
    %387 = vector.broadcast %cst_114 : f32 to vector<8x32xf32>
    %388 = arith.mulf %387, %354 : vector<8x32xf32>
    %389 = arith.addf %386, %388 : vector<8x32xf32>
    %390 = arith.addf %389, %382 : vector<8x32xf32>
    %391 = vector.broadcast %383 : f32 to vector<8x32xf32>
    %392 = arith.mulf %391, %390 : vector<8x32xf32>
    %393 = arith.addf %264, %392 : vector<8x32xf32>
    %c3_115 = arith.constant 3 : index
    %394 = memref.load %arg1[%c3_115] : memref<8xf32, #tpu.memory_space<smem>>
    %c4 = arith.constant 4 : index
    %395 = memref.load %arg1[%c4] : memref<8xf32, #tpu.memory_space<smem>>
    %396 = arith.subf %395, %394 : f32
    %cst_116 = arith.constant dense<0.000000e+00> : vector<8x32xf32>
    %397 = tpu.matmul %393, %0, %cst_116 {dimension_numbers = #tpu.dot_dimension_numbers<[1], [0], [0], [1], [0, 0, 1, 1], [], []>} : vector<8x32xf32>, vector<32x32xf32>, vector<8x32xf32> -> vector<8x32xf32>
    %398 = vector.broadcast %1 : vector<1x32xf32> to vector<8x32xf32>
    %399 = arith.addf %397, %398 : vector<8x32xf32>
    %cst_117 = arith.constant 0.000000e+00 : f32
    %400 = vector.broadcast %cst_117 : f32 to vector<8x32xf32>
    %401 = arith.subf %400, %399 : vector<8x32xf32>
    %402 = math.exp %401 : vector<8x32xf32>
    %cst_118 = arith.constant 1.000000e+00 : f32
    %403 = vector.broadcast %cst_118 : f32 to vector<8x32xf32>
    %404 = arith.addf %403, %402 : vector<8x32xf32>
    %405 = tpu.reciprocal %404 {approx = true} : vector<8x32xf32> -> vector<8x32xf32>
    %406 = arith.mulf %399, %405 : vector<8x32xf32>
    %cst_119 = arith.constant dense<0.000000e+00> : vector<8x32xf32>
    %407 = tpu.matmul %406, %2, %cst_119 {dimension_numbers = #tpu.dot_dimension_numbers<[1], [0], [0], [1], [0, 0, 1, 1], [], []>} : vector<8x32xf32>, vector<32x32xf32>, vector<8x32xf32> -> vector<8x32xf32>
    %408 = vector.broadcast %3 : vector<1x32xf32> to vector<8x32xf32>
    %409 = arith.addf %407, %408 : vector<8x32xf32>
    %cst_120 = arith.constant 0.000000e+00 : f32
    %410 = vector.broadcast %cst_120 : f32 to vector<8x32xf32>
    %411 = arith.subf %410, %409 : vector<8x32xf32>
    %412 = math.exp %411 : vector<8x32xf32>
    %cst_121 = arith.constant 1.000000e+00 : f32
    %413 = vector.broadcast %cst_121 : f32 to vector<8x32xf32>
    %414 = arith.addf %413, %412 : vector<8x32xf32>
    %415 = tpu.reciprocal %414 {approx = true} : vector<8x32xf32> -> vector<8x32xf32>
    %416 = arith.mulf %409, %415 : vector<8x32xf32>
    %cst_122 = arith.constant dense<0.000000e+00> : vector<8x32xf32>
    %417 = tpu.matmul %416, %4, %cst_122 {dimension_numbers = #tpu.dot_dimension_numbers<[1], [0], [0], [1], [0, 0, 1, 1], [], []>} : vector<8x32xf32>, vector<32x32xf32>, vector<8x32xf32> -> vector<8x32xf32>
    %418 = vector.broadcast %5 : vector<1x32xf32> to vector<8x32xf32>
    %419 = arith.addf %417, %418 : vector<8x32xf32>
    %420 = vector.broadcast %394 : f32 to vector<8x32xf32>
    %421 = arith.mulf %419, %420 : vector<8x32xf32>
    %cst_123 = arith.constant 5.000000e-01 : f32
    %422 = arith.mulf %cst_123, %396 : f32
    %423 = arith.addf %394, %422 : f32
    %cst_124 = arith.constant 5.000000e-01 : f32
    %424 = arith.mulf %cst_124, %396 : f32
    %425 = vector.broadcast %424 : f32 to vector<8x32xf32>
    %426 = arith.mulf %425, %421 : vector<8x32xf32>
    %427 = arith.addf %393, %426 : vector<8x32xf32>
    %cst_125 = arith.constant dense<0.000000e+00> : vector<8x32xf32>
    %428 = tpu.matmul %427, %0, %cst_125 {dimension_numbers = #tpu.dot_dimension_numbers<[1], [0], [0], [1], [0, 0, 1, 1], [], []>} : vector<8x32xf32>, vector<32x32xf32>, vector<8x32xf32> -> vector<8x32xf32>
    %429 = vector.broadcast %1 : vector<1x32xf32> to vector<8x32xf32>
    %430 = arith.addf %428, %429 : vector<8x32xf32>
    %cst_126 = arith.constant 0.000000e+00 : f32
    %431 = vector.broadcast %cst_126 : f32 to vector<8x32xf32>
    %432 = arith.subf %431, %430 : vector<8x32xf32>
    %433 = math.exp %432 : vector<8x32xf32>
    %cst_127 = arith.constant 1.000000e+00 : f32
    %434 = vector.broadcast %cst_127 : f32 to vector<8x32xf32>
    %435 = arith.addf %434, %433 : vector<8x32xf32>
    %436 = tpu.reciprocal %435 {approx = true} : vector<8x32xf32> -> vector<8x32xf32>
    %437 = arith.mulf %430, %436 : vector<8x32xf32>
    %cst_128 = arith.constant dense<0.000000e+00> : vector<8x32xf32>
    %438 = tpu.matmul %437, %2, %cst_128 {dimension_numbers = #tpu.dot_dimension_numbers<[1], [0], [0], [1], [0, 0, 1, 1], [], []>} : vector<8x32xf32>, vector<32x32xf32>, vector<8x32xf32> -> vector<8x32xf32>
    %439 = vector.broadcast %3 : vector<1x32xf32> to vector<8x32xf32>
    %440 = arith.addf %438, %439 : vector<8x32xf32>
    %cst_129 = arith.constant 0.000000e+00 : f32
    %441 = vector.broadcast %cst_129 : f32 to vector<8x32xf32>
    %442 = arith.subf %441, %440 : vector<8x32xf32>
    %443 = math.exp %442 : vector<8x32xf32>
    %cst_130 = arith.constant 1.000000e+00 : f32
    %444 = vector.broadcast %cst_130 : f32 to vector<8x32xf32>
    %445 = arith.addf %444, %443 : vector<8x32xf32>
    %446 = tpu.reciprocal %445 {approx = true} : vector<8x32xf32> -> vector<8x32xf32>
    %447 = arith.mulf %440, %446 : vector<8x32xf32>
    %cst_131 = arith.constant dense<0.000000e+00> : vector<8x32xf32>
    %448 = tpu.matmul %447, %4, %cst_131 {dimension_numbers = #tpu.dot_dimension_numbers<[1], [0], [0], [1], [0, 0, 1, 1], [], []>} : vector<8x32xf32>, vector<32x32xf32>, vector<8x32xf32> -> vector<8x32xf32>
    %449 = vector.broadcast %5 : vector<1x32xf32> to vector<8x32xf32>
    %450 = arith.addf %448, %449 : vector<8x32xf32>
    %451 = vector.broadcast %423 : f32 to vector<8x32xf32>
    %452 = arith.mulf %450, %451 : vector<8x32xf32>
    %cst_132 = arith.constant 5.000000e-01 : f32
    %453 = arith.mulf %cst_132, %396 : f32
    %454 = arith.addf %394, %453 : f32
    %cst_133 = arith.constant 5.000000e-01 : f32
    %455 = arith.mulf %cst_133, %396 : f32
    %456 = vector.broadcast %455 : f32 to vector<8x32xf32>
    %457 = arith.mulf %456, %452 : vector<8x32xf32>
    %458 = arith.addf %393, %457 : vector<8x32xf32>
    %cst_134 = arith.constant dense<0.000000e+00> : vector<8x32xf32>
    %459 = tpu.matmul %458, %0, %cst_134 {dimension_numbers = #tpu.dot_dimension_numbers<[1], [0], [0], [1], [0, 0, 1, 1], [], []>} : vector<8x32xf32>, vector<32x32xf32>, vector<8x32xf32> -> vector<8x32xf32>
    %460 = vector.broadcast %1 : vector<1x32xf32> to vector<8x32xf32>
    %461 = arith.addf %459, %460 : vector<8x32xf32>
    %cst_135 = arith.constant 0.000000e+00 : f32
    %462 = vector.broadcast %cst_135 : f32 to vector<8x32xf32>
    %463 = arith.subf %462, %461 : vector<8x32xf32>
    %464 = math.exp %463 : vector<8x32xf32>
    %cst_136 = arith.constant 1.000000e+00 : f32
    %465 = vector.broadcast %cst_136 : f32 to vector<8x32xf32>
    %466 = arith.addf %465, %464 : vector<8x32xf32>
    %467 = tpu.reciprocal %466 {approx = true} : vector<8x32xf32> -> vector<8x32xf32>
    %468 = arith.mulf %461, %467 : vector<8x32xf32>
    %cst_137 = arith.constant dense<0.000000e+00> : vector<8x32xf32>
    %469 = tpu.matmul %468, %2, %cst_137 {dimension_numbers = #tpu.dot_dimension_numbers<[1], [0], [0], [1], [0, 0, 1, 1], [], []>} : vector<8x32xf32>, vector<32x32xf32>, vector<8x32xf32> -> vector<8x32xf32>
    %470 = vector.broadcast %3 : vector<1x32xf32> to vector<8x32xf32>
    %471 = arith.addf %469, %470 : vector<8x32xf32>
    %cst_138 = arith.constant 0.000000e+00 : f32
    %472 = vector.broadcast %cst_138 : f32 to vector<8x32xf32>
    %473 = arith.subf %472, %471 : vector<8x32xf32>
    %474 = math.exp %473 : vector<8x32xf32>
    %cst_139 = arith.constant 1.000000e+00 : f32
    %475 = vector.broadcast %cst_139 : f32 to vector<8x32xf32>
    %476 = arith.addf %475, %474 : vector<8x32xf32>
    %477 = tpu.reciprocal %476 {approx = true} : vector<8x32xf32> -> vector<8x32xf32>
    %478 = arith.mulf %471, %477 : vector<8x32xf32>
    %cst_140 = arith.constant dense<0.000000e+00> : vector<8x32xf32>
    %479 = tpu.matmul %478, %4, %cst_140 {dimension_numbers = #tpu.dot_dimension_numbers<[1], [0], [0], [1], [0, 0, 1, 1], [], []>} : vector<8x32xf32>, vector<32x32xf32>, vector<8x32xf32> -> vector<8x32xf32>
    %480 = vector.broadcast %5 : vector<1x32xf32> to vector<8x32xf32>
    %481 = arith.addf %479, %480 : vector<8x32xf32>
    %482 = vector.broadcast %454 : f32 to vector<8x32xf32>
    %483 = arith.mulf %481, %482 : vector<8x32xf32>
    %484 = vector.broadcast %396 : f32 to vector<8x32xf32>
    %485 = arith.mulf %484, %483 : vector<8x32xf32>
    %486 = arith.addf %393, %485 : vector<8x32xf32>
    %cst_141 = arith.constant dense<0.000000e+00> : vector<8x32xf32>
    %487 = tpu.matmul %486, %0, %cst_141 {dimension_numbers = #tpu.dot_dimension_numbers<[1], [0], [0], [1], [0, 0, 1, 1], [], []>} : vector<8x32xf32>, vector<32x32xf32>, vector<8x32xf32> -> vector<8x32xf32>
    %488 = vector.broadcast %1 : vector<1x32xf32> to vector<8x32xf32>
    %489 = arith.addf %487, %488 : vector<8x32xf32>
    %cst_142 = arith.constant 0.000000e+00 : f32
    %490 = vector.broadcast %cst_142 : f32 to vector<8x32xf32>
    %491 = arith.subf %490, %489 : vector<8x32xf32>
    %492 = math.exp %491 : vector<8x32xf32>
    %cst_143 = arith.constant 1.000000e+00 : f32
    %493 = vector.broadcast %cst_143 : f32 to vector<8x32xf32>
    %494 = arith.addf %493, %492 : vector<8x32xf32>
    %495 = tpu.reciprocal %494 {approx = true} : vector<8x32xf32> -> vector<8x32xf32>
    %496 = arith.mulf %489, %495 : vector<8x32xf32>
    %cst_144 = arith.constant dense<0.000000e+00> : vector<8x32xf32>
    %497 = tpu.matmul %496, %2, %cst_144 {dimension_numbers = #tpu.dot_dimension_numbers<[1], [0], [0], [1], [0, 0, 1, 1], [], []>} : vector<8x32xf32>, vector<32x32xf32>, vector<8x32xf32> -> vector<8x32xf32>
    %498 = vector.broadcast %3 : vector<1x32xf32> to vector<8x32xf32>
    %499 = arith.addf %497, %498 : vector<8x32xf32>
    %cst_145 = arith.constant 0.000000e+00 : f32
    %500 = vector.broadcast %cst_145 : f32 to vector<8x32xf32>
    %501 = arith.subf %500, %499 : vector<8x32xf32>
    %502 = math.exp %501 : vector<8x32xf32>
    %cst_146 = arith.constant 1.000000e+00 : f32
    %503 = vector.broadcast %cst_146 : f32 to vector<8x32xf32>
    %504 = arith.addf %503, %502 : vector<8x32xf32>
    %505 = tpu.reciprocal %504 {approx = true} : vector<8x32xf32> -> vector<8x32xf32>
    %506 = arith.mulf %499, %505 : vector<8x32xf32>
    %cst_147 = arith.constant dense<0.000000e+00> : vector<8x32xf32>
    %507 = tpu.matmul %506, %4, %cst_147 {dimension_numbers = #tpu.dot_dimension_numbers<[1], [0], [0], [1], [0, 0, 1, 1], [], []>} : vector<8x32xf32>, vector<32x32xf32>, vector<8x32xf32> -> vector<8x32xf32>
    %508 = vector.broadcast %5 : vector<1x32xf32> to vector<8x32xf32>
    %509 = arith.addf %507, %508 : vector<8x32xf32>
    %510 = vector.broadcast %395 : f32 to vector<8x32xf32>
    %511 = arith.mulf %509, %510 : vector<8x32xf32>
    %cst_148 = arith.constant 6.000000e+00 : f32
    %512 = arith.divf %396, %cst_148 : f32
    %cst_149 = arith.constant 2.000000e+00 : f32
    %513 = vector.broadcast %cst_149 : f32 to vector<8x32xf32>
    %514 = arith.mulf %513, %452 : vector<8x32xf32>
    %515 = arith.addf %421, %514 : vector<8x32xf32>
    %cst_150 = arith.constant 2.000000e+00 : f32
    %516 = vector.broadcast %cst_150 : f32 to vector<8x32xf32>
    %517 = arith.mulf %516, %483 : vector<8x32xf32>
    %518 = arith.addf %515, %517 : vector<8x32xf32>
    %519 = arith.addf %518, %511 : vector<8x32xf32>
    %520 = vector.broadcast %512 : f32 to vector<8x32xf32>
    %521 = arith.mulf %520, %519 : vector<8x32xf32>
    %522 = arith.addf %393, %521 : vector<8x32xf32>
    %c4_151 = arith.constant 4 : index
    %523 = memref.load %arg1[%c4_151] : memref<8xf32, #tpu.memory_space<smem>>
    %c5 = arith.constant 5 : index
    %524 = memref.load %arg1[%c5] : memref<8xf32, #tpu.memory_space<smem>>
    %525 = arith.subf %524, %523 : f32
    %cst_152 = arith.constant dense<0.000000e+00> : vector<8x32xf32>
    %526 = tpu.matmul %522, %0, %cst_152 {dimension_numbers = #tpu.dot_dimension_numbers<[1], [0], [0], [1], [0, 0, 1, 1], [], []>} : vector<8x32xf32>, vector<32x32xf32>, vector<8x32xf32> -> vector<8x32xf32>
    %527 = vector.broadcast %1 : vector<1x32xf32> to vector<8x32xf32>
    %528 = arith.addf %526, %527 : vector<8x32xf32>
    %cst_153 = arith.constant 0.000000e+00 : f32
    %529 = vector.broadcast %cst_153 : f32 to vector<8x32xf32>
    %530 = arith.subf %529, %528 : vector<8x32xf32>
    %531 = math.exp %530 : vector<8x32xf32>
    %cst_154 = arith.constant 1.000000e+00 : f32
    %532 = vector.broadcast %cst_154 : f32 to vector<8x32xf32>
    %533 = arith.addf %532, %531 : vector<8x32xf32>
    %534 = tpu.reciprocal %533 {approx = true} : vector<8x32xf32> -> vector<8x32xf32>
    %535 = arith.mulf %528, %534 : vector<8x32xf32>
    %cst_155 = arith.constant dense<0.000000e+00> : vector<8x32xf32>
    %536 = tpu.matmul %535, %2, %cst_155 {dimension_numbers = #tpu.dot_dimension_numbers<[1], [0], [0], [1], [0, 0, 1, 1], [], []>} : vector<8x32xf32>, vector<32x32xf32>, vector<8x32xf32> -> vector<8x32xf32>
    %537 = vector.broadcast %3 : vector<1x32xf32> to vector<8x32xf32>
    %538 = arith.addf %536, %537 : vector<8x32xf32>
    %cst_156 = arith.constant 0.000000e+00 : f32
    %539 = vector.broadcast %cst_156 : f32 to vector<8x32xf32>
    %540 = arith.subf %539, %538 : vector<8x32xf32>
    %541 = math.exp %540 : vector<8x32xf32>
    %cst_157 = arith.constant 1.000000e+00 : f32
    %542 = vector.broadcast %cst_157 : f32 to vector<8x32xf32>
    %543 = arith.addf %542, %541 : vector<8x32xf32>
    %544 = tpu.reciprocal %543 {approx = true} : vector<8x32xf32> -> vector<8x32xf32>
    %545 = arith.mulf %538, %544 : vector<8x32xf32>
    %cst_158 = arith.constant dense<0.000000e+00> : vector<8x32xf32>
    %546 = tpu.matmul %545, %4, %cst_158 {dimension_numbers = #tpu.dot_dimension_numbers<[1], [0], [0], [1], [0, 0, 1, 1], [], []>} : vector<8x32xf32>, vector<32x32xf32>, vector<8x32xf32> -> vector<8x32xf32>
    %547 = vector.broadcast %5 : vector<1x32xf32> to vector<8x32xf32>
    %548 = arith.addf %546, %547 : vector<8x32xf32>
    %549 = vector.broadcast %523 : f32 to vector<8x32xf32>
    %550 = arith.mulf %548, %549 : vector<8x32xf32>
    %cst_159 = arith.constant 5.000000e-01 : f32
    %551 = arith.mulf %cst_159, %525 : f32
    %552 = arith.addf %523, %551 : f32
    %cst_160 = arith.constant 5.000000e-01 : f32
    %553 = arith.mulf %cst_160, %525 : f32
    %554 = vector.broadcast %553 : f32 to vector<8x32xf32>
    %555 = arith.mulf %554, %550 : vector<8x32xf32>
    %556 = arith.addf %522, %555 : vector<8x32xf32>
    %cst_161 = arith.constant dense<0.000000e+00> : vector<8x32xf32>
    %557 = tpu.matmul %556, %0, %cst_161 {dimension_numbers = #tpu.dot_dimension_numbers<[1], [0], [0], [1], [0, 0, 1, 1], [], []>} : vector<8x32xf32>, vector<32x32xf32>, vector<8x32xf32> -> vector<8x32xf32>
    %558 = vector.broadcast %1 : vector<1x32xf32> to vector<8x32xf32>
    %559 = arith.addf %557, %558 : vector<8x32xf32>
    %cst_162 = arith.constant 0.000000e+00 : f32
    %560 = vector.broadcast %cst_162 : f32 to vector<8x32xf32>
    %561 = arith.subf %560, %559 : vector<8x32xf32>
    %562 = math.exp %561 : vector<8x32xf32>
    %cst_163 = arith.constant 1.000000e+00 : f32
    %563 = vector.broadcast %cst_163 : f32 to vector<8x32xf32>
    %564 = arith.addf %563, %562 : vector<8x32xf32>
    %565 = tpu.reciprocal %564 {approx = true} : vector<8x32xf32> -> vector<8x32xf32>
    %566 = arith.mulf %559, %565 : vector<8x32xf32>
    %cst_164 = arith.constant dense<0.000000e+00> : vector<8x32xf32>
    %567 = tpu.matmul %566, %2, %cst_164 {dimension_numbers = #tpu.dot_dimension_numbers<[1], [0], [0], [1], [0, 0, 1, 1], [], []>} : vector<8x32xf32>, vector<32x32xf32>, vector<8x32xf32> -> vector<8x32xf32>
    %568 = vector.broadcast %3 : vector<1x32xf32> to vector<8x32xf32>
    %569 = arith.addf %567, %568 : vector<8x32xf32>
    %cst_165 = arith.constant 0.000000e+00 : f32
    %570 = vector.broadcast %cst_165 : f32 to vector<8x32xf32>
    %571 = arith.subf %570, %569 : vector<8x32xf32>
    %572 = math.exp %571 : vector<8x32xf32>
    %cst_166 = arith.constant 1.000000e+00 : f32
    %573 = vector.broadcast %cst_166 : f32 to vector<8x32xf32>
    %574 = arith.addf %573, %572 : vector<8x32xf32>
    %575 = tpu.reciprocal %574 {approx = true} : vector<8x32xf32> -> vector<8x32xf32>
    %576 = arith.mulf %569, %575 : vector<8x32xf32>
    %cst_167 = arith.constant dense<0.000000e+00> : vector<8x32xf32>
    %577 = tpu.matmul %576, %4, %cst_167 {dimension_numbers = #tpu.dot_dimension_numbers<[1], [0], [0], [1], [0, 0, 1, 1], [], []>} : vector<8x32xf32>, vector<32x32xf32>, vector<8x32xf32> -> vector<8x32xf32>
    %578 = vector.broadcast %5 : vector<1x32xf32> to vector<8x32xf32>
    %579 = arith.addf %577, %578 : vector<8x32xf32>
    %580 = vector.broadcast %552 : f32 to vector<8x32xf32>
    %581 = arith.mulf %579, %580 : vector<8x32xf32>
    %cst_168 = arith.constant 5.000000e-01 : f32
    %582 = arith.mulf %cst_168, %525 : f32
    %583 = arith.addf %523, %582 : f32
    %cst_169 = arith.constant 5.000000e-01 : f32
    %584 = arith.mulf %cst_169, %525 : f32
    %585 = vector.broadcast %584 : f32 to vector<8x32xf32>
    %586 = arith.mulf %585, %581 : vector<8x32xf32>
    %587 = arith.addf %522, %586 : vector<8x32xf32>
    %cst_170 = arith.constant dense<0.000000e+00> : vector<8x32xf32>
    %588 = tpu.matmul %587, %0, %cst_170 {dimension_numbers = #tpu.dot_dimension_numbers<[1], [0], [0], [1], [0, 0, 1, 1], [], []>} : vector<8x32xf32>, vector<32x32xf32>, vector<8x32xf32> -> vector<8x32xf32>
    %589 = vector.broadcast %1 : vector<1x32xf32> to vector<8x32xf32>
    %590 = arith.addf %588, %589 : vector<8x32xf32>
    %cst_171 = arith.constant 0.000000e+00 : f32
    %591 = vector.broadcast %cst_171 : f32 to vector<8x32xf32>
    %592 = arith.subf %591, %590 : vector<8x32xf32>
    %593 = math.exp %592 : vector<8x32xf32>
    %cst_172 = arith.constant 1.000000e+00 : f32
    %594 = vector.broadcast %cst_172 : f32 to vector<8x32xf32>
    %595 = arith.addf %594, %593 : vector<8x32xf32>
    %596 = tpu.reciprocal %595 {approx = true} : vector<8x32xf32> -> vector<8x32xf32>
    %597 = arith.mulf %590, %596 : vector<8x32xf32>
    %cst_173 = arith.constant dense<0.000000e+00> : vector<8x32xf32>
    %598 = tpu.matmul %597, %2, %cst_173 {dimension_numbers = #tpu.dot_dimension_numbers<[1], [0], [0], [1], [0, 0, 1, 1], [], []>} : vector<8x32xf32>, vector<32x32xf32>, vector<8x32xf32> -> vector<8x32xf32>
    %599 = vector.broadcast %3 : vector<1x32xf32> to vector<8x32xf32>
    %600 = arith.addf %598, %599 : vector<8x32xf32>
    %cst_174 = arith.constant 0.000000e+00 : f32
    %601 = vector.broadcast %cst_174 : f32 to vector<8x32xf32>
    %602 = arith.subf %601, %600 : vector<8x32xf32>
    %603 = math.exp %602 : vector<8x32xf32>
    %cst_175 = arith.constant 1.000000e+00 : f32
    %604 = vector.broadcast %cst_175 : f32 to vector<8x32xf32>
    %605 = arith.addf %604, %603 : vector<8x32xf32>
    %606 = tpu.reciprocal %605 {approx = true} : vector<8x32xf32> -> vector<8x32xf32>
    %607 = arith.mulf %600, %606 : vector<8x32xf32>
    %cst_176 = arith.constant dense<0.000000e+00> : vector<8x32xf32>
    %608 = tpu.matmul %607, %4, %cst_176 {dimension_numbers = #tpu.dot_dimension_numbers<[1], [0], [0], [1], [0, 0, 1, 1], [], []>} : vector<8x32xf32>, vector<32x32xf32>, vector<8x32xf32> -> vector<8x32xf32>
    %609 = vector.broadcast %5 : vector<1x32xf32> to vector<8x32xf32>
    %610 = arith.addf %608, %609 : vector<8x32xf32>
    %611 = vector.broadcast %583 : f32 to vector<8x32xf32>
    %612 = arith.mulf %610, %611 : vector<8x32xf32>
    %613 = vector.broadcast %525 : f32 to vector<8x32xf32>
    %614 = arith.mulf %613, %612 : vector<8x32xf32>
    %615 = arith.addf %522, %614 : vector<8x32xf32>
    %cst_177 = arith.constant dense<0.000000e+00> : vector<8x32xf32>
    %616 = tpu.matmul %615, %0, %cst_177 {dimension_numbers = #tpu.dot_dimension_numbers<[1], [0], [0], [1], [0, 0, 1, 1], [], []>} : vector<8x32xf32>, vector<32x32xf32>, vector<8x32xf32> -> vector<8x32xf32>
    %617 = vector.broadcast %1 : vector<1x32xf32> to vector<8x32xf32>
    %618 = arith.addf %616, %617 : vector<8x32xf32>
    %cst_178 = arith.constant 0.000000e+00 : f32
    %619 = vector.broadcast %cst_178 : f32 to vector<8x32xf32>
    %620 = arith.subf %619, %618 : vector<8x32xf32>
    %621 = math.exp %620 : vector<8x32xf32>
    %cst_179 = arith.constant 1.000000e+00 : f32
    %622 = vector.broadcast %cst_179 : f32 to vector<8x32xf32>
    %623 = arith.addf %622, %621 : vector<8x32xf32>
    %624 = tpu.reciprocal %623 {approx = true} : vector<8x32xf32> -> vector<8x32xf32>
    %625 = arith.mulf %618, %624 : vector<8x32xf32>
    %cst_180 = arith.constant dense<0.000000e+00> : vector<8x32xf32>
    %626 = tpu.matmul %625, %2, %cst_180 {dimension_numbers = #tpu.dot_dimension_numbers<[1], [0], [0], [1], [0, 0, 1, 1], [], []>} : vector<8x32xf32>, vector<32x32xf32>, vector<8x32xf32> -> vector<8x32xf32>
    %627 = vector.broadcast %3 : vector<1x32xf32> to vector<8x32xf32>
    %628 = arith.addf %626, %627 : vector<8x32xf32>
    %cst_181 = arith.constant 0.000000e+00 : f32
    %629 = vector.broadcast %cst_181 : f32 to vector<8x32xf32>
    %630 = arith.subf %629, %628 : vector<8x32xf32>
    %631 = math.exp %630 : vector<8x32xf32>
    %cst_182 = arith.constant 1.000000e+00 : f32
    %632 = vector.broadcast %cst_182 : f32 to vector<8x32xf32>
    %633 = arith.addf %632, %631 : vector<8x32xf32>
    %634 = tpu.reciprocal %633 {approx = true} : vector<8x32xf32> -> vector<8x32xf32>
    %635 = arith.mulf %628, %634 : vector<8x32xf32>
    %cst_183 = arith.constant dense<0.000000e+00> : vector<8x32xf32>
    %636 = tpu.matmul %635, %4, %cst_183 {dimension_numbers = #tpu.dot_dimension_numbers<[1], [0], [0], [1], [0, 0, 1, 1], [], []>} : vector<8x32xf32>, vector<32x32xf32>, vector<8x32xf32> -> vector<8x32xf32>
    %637 = vector.broadcast %5 : vector<1x32xf32> to vector<8x32xf32>
    %638 = arith.addf %636, %637 : vector<8x32xf32>
    %639 = vector.broadcast %524 : f32 to vector<8x32xf32>
    %640 = arith.mulf %638, %639 : vector<8x32xf32>
    %cst_184 = arith.constant 6.000000e+00 : f32
    %641 = arith.divf %525, %cst_184 : f32
    %cst_185 = arith.constant 2.000000e+00 : f32
    %642 = vector.broadcast %cst_185 : f32 to vector<8x32xf32>
    %643 = arith.mulf %642, %581 : vector<8x32xf32>
    %644 = arith.addf %550, %643 : vector<8x32xf32>
    %cst_186 = arith.constant 2.000000e+00 : f32
    %645 = vector.broadcast %cst_186 : f32 to vector<8x32xf32>
    %646 = arith.mulf %645, %612 : vector<8x32xf32>
    %647 = arith.addf %644, %646 : vector<8x32xf32>
    %648 = arith.addf %647, %640 : vector<8x32xf32>
    %649 = vector.broadcast %641 : f32 to vector<8x32xf32>
    %650 = arith.mulf %649, %648 : vector<8x32xf32>
    %651 = arith.addf %522, %650 : vector<8x32xf32>
    %c5_187 = arith.constant 5 : index
    %652 = memref.load %arg1[%c5_187] : memref<8xf32, #tpu.memory_space<smem>>
    %c6 = arith.constant 6 : index
    %653 = memref.load %arg1[%c6] : memref<8xf32, #tpu.memory_space<smem>>
    %654 = arith.subf %653, %652 : f32
    %cst_188 = arith.constant dense<0.000000e+00> : vector<8x32xf32>
    %655 = tpu.matmul %651, %0, %cst_188 {dimension_numbers = #tpu.dot_dimension_numbers<[1], [0], [0], [1], [0, 0, 1, 1], [], []>} : vector<8x32xf32>, vector<32x32xf32>, vector<8x32xf32> -> vector<8x32xf32>
    %656 = vector.broadcast %1 : vector<1x32xf32> to vector<8x32xf32>
    %657 = arith.addf %655, %656 : vector<8x32xf32>
    %cst_189 = arith.constant 0.000000e+00 : f32
    %658 = vector.broadcast %cst_189 : f32 to vector<8x32xf32>
    %659 = arith.subf %658, %657 : vector<8x32xf32>
    %660 = math.exp %659 : vector<8x32xf32>
    %cst_190 = arith.constant 1.000000e+00 : f32
    %661 = vector.broadcast %cst_190 : f32 to vector<8x32xf32>
    %662 = arith.addf %661, %660 : vector<8x32xf32>
    %663 = tpu.reciprocal %662 {approx = true} : vector<8x32xf32> -> vector<8x32xf32>
    %664 = arith.mulf %657, %663 : vector<8x32xf32>
    %cst_191 = arith.constant dense<0.000000e+00> : vector<8x32xf32>
    %665 = tpu.matmul %664, %2, %cst_191 {dimension_numbers = #tpu.dot_dimension_numbers<[1], [0], [0], [1], [0, 0, 1, 1], [], []>} : vector<8x32xf32>, vector<32x32xf32>, vector<8x32xf32> -> vector<8x32xf32>
    %666 = vector.broadcast %3 : vector<1x32xf32> to vector<8x32xf32>
    %667 = arith.addf %665, %666 : vector<8x32xf32>
    %cst_192 = arith.constant 0.000000e+00 : f32
    %668 = vector.broadcast %cst_192 : f32 to vector<8x32xf32>
    %669 = arith.subf %668, %667 : vector<8x32xf32>
    %670 = math.exp %669 : vector<8x32xf32>
    %cst_193 = arith.constant 1.000000e+00 : f32
    %671 = vector.broadcast %cst_193 : f32 to vector<8x32xf32>
    %672 = arith.addf %671, %670 : vector<8x32xf32>
    %673 = tpu.reciprocal %672 {approx = true} : vector<8x32xf32> -> vector<8x32xf32>
    %674 = arith.mulf %667, %673 : vector<8x32xf32>
    %cst_194 = arith.constant dense<0.000000e+00> : vector<8x32xf32>
    %675 = tpu.matmul %674, %4, %cst_194 {dimension_numbers = #tpu.dot_dimension_numbers<[1], [0], [0], [1], [0, 0, 1, 1], [], []>} : vector<8x32xf32>, vector<32x32xf32>, vector<8x32xf32> -> vector<8x32xf32>
    %676 = vector.broadcast %5 : vector<1x32xf32> to vector<8x32xf32>
    %677 = arith.addf %675, %676 : vector<8x32xf32>
    %678 = vector.broadcast %652 : f32 to vector<8x32xf32>
    %679 = arith.mulf %677, %678 : vector<8x32xf32>
    %cst_195 = arith.constant 5.000000e-01 : f32
    %680 = arith.mulf %cst_195, %654 : f32
    %681 = arith.addf %652, %680 : f32
    %cst_196 = arith.constant 5.000000e-01 : f32
    %682 = arith.mulf %cst_196, %654 : f32
    %683 = vector.broadcast %682 : f32 to vector<8x32xf32>
    %684 = arith.mulf %683, %679 : vector<8x32xf32>
    %685 = arith.addf %651, %684 : vector<8x32xf32>
    %cst_197 = arith.constant dense<0.000000e+00> : vector<8x32xf32>
    %686 = tpu.matmul %685, %0, %cst_197 {dimension_numbers = #tpu.dot_dimension_numbers<[1], [0], [0], [1], [0, 0, 1, 1], [], []>} : vector<8x32xf32>, vector<32x32xf32>, vector<8x32xf32> -> vector<8x32xf32>
    %687 = vector.broadcast %1 : vector<1x32xf32> to vector<8x32xf32>
    %688 = arith.addf %686, %687 : vector<8x32xf32>
    %cst_198 = arith.constant 0.000000e+00 : f32
    %689 = vector.broadcast %cst_198 : f32 to vector<8x32xf32>
    %690 = arith.subf %689, %688 : vector<8x32xf32>
    %691 = math.exp %690 : vector<8x32xf32>
    %cst_199 = arith.constant 1.000000e+00 : f32
    %692 = vector.broadcast %cst_199 : f32 to vector<8x32xf32>
    %693 = arith.addf %692, %691 : vector<8x32xf32>
    %694 = tpu.reciprocal %693 {approx = true} : vector<8x32xf32> -> vector<8x32xf32>
    %695 = arith.mulf %688, %694 : vector<8x32xf32>
    %cst_200 = arith.constant dense<0.000000e+00> : vector<8x32xf32>
    %696 = tpu.matmul %695, %2, %cst_200 {dimension_numbers = #tpu.dot_dimension_numbers<[1], [0], [0], [1], [0, 0, 1, 1], [], []>} : vector<8x32xf32>, vector<32x32xf32>, vector<8x32xf32> -> vector<8x32xf32>
    %697 = vector.broadcast %3 : vector<1x32xf32> to vector<8x32xf32>
    %698 = arith.addf %696, %697 : vector<8x32xf32>
    %cst_201 = arith.constant 0.000000e+00 : f32
    %699 = vector.broadcast %cst_201 : f32 to vector<8x32xf32>
    %700 = arith.subf %699, %698 : vector<8x32xf32>
    %701 = math.exp %700 : vector<8x32xf32>
    %cst_202 = arith.constant 1.000000e+00 : f32
    %702 = vector.broadcast %cst_202 : f32 to vector<8x32xf32>
    %703 = arith.addf %702, %701 : vector<8x32xf32>
    %704 = tpu.reciprocal %703 {approx = true} : vector<8x32xf32> -> vector<8x32xf32>
    %705 = arith.mulf %698, %704 : vector<8x32xf32>
    %cst_203 = arith.constant dense<0.000000e+00> : vector<8x32xf32>
    %706 = tpu.matmul %705, %4, %cst_203 {dimension_numbers = #tpu.dot_dimension_numbers<[1], [0], [0], [1], [0, 0, 1, 1], [], []>} : vector<8x32xf32>, vector<32x32xf32>, vector<8x32xf32> -> vector<8x32xf32>
    %707 = vector.broadcast %5 : vector<1x32xf32> to vector<8x32xf32>
    %708 = arith.addf %706, %707 : vector<8x32xf32>
    %709 = vector.broadcast %681 : f32 to vector<8x32xf32>
    %710 = arith.mulf %708, %709 : vector<8x32xf32>
    %cst_204 = arith.constant 5.000000e-01 : f32
    %711 = arith.mulf %cst_204, %654 : f32
    %712 = arith.addf %652, %711 : f32
    %cst_205 = arith.constant 5.000000e-01 : f32
    %713 = arith.mulf %cst_205, %654 : f32
    %714 = vector.broadcast %713 : f32 to vector<8x32xf32>
    %715 = arith.mulf %714, %710 : vector<8x32xf32>
    %716 = arith.addf %651, %715 : vector<8x32xf32>
    %cst_206 = arith.constant dense<0.000000e+00> : vector<8x32xf32>
    %717 = tpu.matmul %716, %0, %cst_206 {dimension_numbers = #tpu.dot_dimension_numbers<[1], [0], [0], [1], [0, 0, 1, 1], [], []>} : vector<8x32xf32>, vector<32x32xf32>, vector<8x32xf32> -> vector<8x32xf32>
    %718 = vector.broadcast %1 : vector<1x32xf32> to vector<8x32xf32>
    %719 = arith.addf %717, %718 : vector<8x32xf32>
    %cst_207 = arith.constant 0.000000e+00 : f32
    %720 = vector.broadcast %cst_207 : f32 to vector<8x32xf32>
    %721 = arith.subf %720, %719 : vector<8x32xf32>
    %722 = math.exp %721 : vector<8x32xf32>
    %cst_208 = arith.constant 1.000000e+00 : f32
    %723 = vector.broadcast %cst_208 : f32 to vector<8x32xf32>
    %724 = arith.addf %723, %722 : vector<8x32xf32>
    %725 = tpu.reciprocal %724 {approx = true} : vector<8x32xf32> -> vector<8x32xf32>
    %726 = arith.mulf %719, %725 : vector<8x32xf32>
    %cst_209 = arith.constant dense<0.000000e+00> : vector<8x32xf32>
    %727 = tpu.matmul %726, %2, %cst_209 {dimension_numbers = #tpu.dot_dimension_numbers<[1], [0], [0], [1], [0, 0, 1, 1], [], []>} : vector<8x32xf32>, vector<32x32xf32>, vector<8x32xf32> -> vector<8x32xf32>
    %728 = vector.broadcast %3 : vector<1x32xf32> to vector<8x32xf32>
    %729 = arith.addf %727, %728 : vector<8x32xf32>
    %cst_210 = arith.constant 0.000000e+00 : f32
    %730 = vector.broadcast %cst_210 : f32 to vector<8x32xf32>
    %731 = arith.subf %730, %729 : vector<8x32xf32>
    %732 = math.exp %731 : vector<8x32xf32>
    %cst_211 = arith.constant 1.000000e+00 : f32
    %733 = vector.broadcast %cst_211 : f32 to vector<8x32xf32>
    %734 = arith.addf %733, %732 : vector<8x32xf32>
    %735 = tpu.reciprocal %734 {approx = true} : vector<8x32xf32> -> vector<8x32xf32>
    %736 = arith.mulf %729, %735 : vector<8x32xf32>
    %cst_212 = arith.constant dense<0.000000e+00> : vector<8x32xf32>
    %737 = tpu.matmul %736, %4, %cst_212 {dimension_numbers = #tpu.dot_dimension_numbers<[1], [0], [0], [1], [0, 0, 1, 1], [], []>} : vector<8x32xf32>, vector<32x32xf32>, vector<8x32xf32> -> vector<8x32xf32>
    %738 = vector.broadcast %5 : vector<1x32xf32> to vector<8x32xf32>
    %739 = arith.addf %737, %738 : vector<8x32xf32>
    %740 = vector.broadcast %712 : f32 to vector<8x32xf32>
    %741 = arith.mulf %739, %740 : vector<8x32xf32>
    %742 = vector.broadcast %654 : f32 to vector<8x32xf32>
    %743 = arith.mulf %742, %741 : vector<8x32xf32>
    %744 = arith.addf %651, %743 : vector<8x32xf32>
    %cst_213 = arith.constant dense<0.000000e+00> : vector<8x32xf32>
    %745 = tpu.matmul %744, %0, %cst_213 {dimension_numbers = #tpu.dot_dimension_numbers<[1], [0], [0], [1], [0, 0, 1, 1], [], []>} : vector<8x32xf32>, vector<32x32xf32>, vector<8x32xf32> -> vector<8x32xf32>
    %746 = vector.broadcast %1 : vector<1x32xf32> to vector<8x32xf32>
    %747 = arith.addf %745, %746 : vector<8x32xf32>
    %cst_214 = arith.constant 0.000000e+00 : f32
    %748 = vector.broadcast %cst_214 : f32 to vector<8x32xf32>
    %749 = arith.subf %748, %747 : vector<8x32xf32>
    %750 = math.exp %749 : vector<8x32xf32>
    %cst_215 = arith.constant 1.000000e+00 : f32
    %751 = vector.broadcast %cst_215 : f32 to vector<8x32xf32>
    %752 = arith.addf %751, %750 : vector<8x32xf32>
    %753 = tpu.reciprocal %752 {approx = true} : vector<8x32xf32> -> vector<8x32xf32>
    %754 = arith.mulf %747, %753 : vector<8x32xf32>
    %cst_216 = arith.constant dense<0.000000e+00> : vector<8x32xf32>
    %755 = tpu.matmul %754, %2, %cst_216 {dimension_numbers = #tpu.dot_dimension_numbers<[1], [0], [0], [1], [0, 0, 1, 1], [], []>} : vector<8x32xf32>, vector<32x32xf32>, vector<8x32xf32> -> vector<8x32xf32>
    %756 = vector.broadcast %3 : vector<1x32xf32> to vector<8x32xf32>
    %757 = arith.addf %755, %756 : vector<8x32xf32>
    %cst_217 = arith.constant 0.000000e+00 : f32
    %758 = vector.broadcast %cst_217 : f32 to vector<8x32xf32>
    %759 = arith.subf %758, %757 : vector<8x32xf32>
    %760 = math.exp %759 : vector<8x32xf32>
    %cst_218 = arith.constant 1.000000e+00 : f32
    %761 = vector.broadcast %cst_218 : f32 to vector<8x32xf32>
    %762 = arith.addf %761, %760 : vector<8x32xf32>
    %763 = tpu.reciprocal %762 {approx = true} : vector<8x32xf32> -> vector<8x32xf32>
    %764 = arith.mulf %757, %763 : vector<8x32xf32>
    %cst_219 = arith.constant dense<0.000000e+00> : vector<8x32xf32>
    %765 = tpu.matmul %764, %4, %cst_219 {dimension_numbers = #tpu.dot_dimension_numbers<[1], [0], [0], [1], [0, 0, 1, 1], [], []>} : vector<8x32xf32>, vector<32x32xf32>, vector<8x32xf32> -> vector<8x32xf32>
    %766 = vector.broadcast %5 : vector<1x32xf32> to vector<8x32xf32>
    %767 = arith.addf %765, %766 : vector<8x32xf32>
    %768 = vector.broadcast %653 : f32 to vector<8x32xf32>
    %769 = arith.mulf %767, %768 : vector<8x32xf32>
    %cst_220 = arith.constant 6.000000e+00 : f32
    %770 = arith.divf %654, %cst_220 : f32
    %cst_221 = arith.constant 2.000000e+00 : f32
    %771 = vector.broadcast %cst_221 : f32 to vector<8x32xf32>
    %772 = arith.mulf %771, %710 : vector<8x32xf32>
    %773 = arith.addf %679, %772 : vector<8x32xf32>
    %cst_222 = arith.constant 2.000000e+00 : f32
    %774 = vector.broadcast %cst_222 : f32 to vector<8x32xf32>
    %775 = arith.mulf %774, %741 : vector<8x32xf32>
    %776 = arith.addf %773, %775 : vector<8x32xf32>
    %777 = arith.addf %776, %769 : vector<8x32xf32>
    %778 = vector.broadcast %770 : f32 to vector<8x32xf32>
    %779 = arith.mulf %778, %777 : vector<8x32xf32>
    %780 = arith.addf %651, %779 : vector<8x32xf32>
    %c6_223 = arith.constant 6 : index
    %781 = memref.load %arg1[%c6_223] : memref<8xf32, #tpu.memory_space<smem>>
    %c7 = arith.constant 7 : index
    %782 = memref.load %arg1[%c7] : memref<8xf32, #tpu.memory_space<smem>>
    %783 = arith.subf %782, %781 : f32
    %cst_224 = arith.constant dense<0.000000e+00> : vector<8x32xf32>
    %784 = tpu.matmul %780, %0, %cst_224 {dimension_numbers = #tpu.dot_dimension_numbers<[1], [0], [0], [1], [0, 0, 1, 1], [], []>} : vector<8x32xf32>, vector<32x32xf32>, vector<8x32xf32> -> vector<8x32xf32>
    %785 = vector.broadcast %1 : vector<1x32xf32> to vector<8x32xf32>
    %786 = arith.addf %784, %785 : vector<8x32xf32>
    %cst_225 = arith.constant 0.000000e+00 : f32
    %787 = vector.broadcast %cst_225 : f32 to vector<8x32xf32>
    %788 = arith.subf %787, %786 : vector<8x32xf32>
    %789 = math.exp %788 : vector<8x32xf32>
    %cst_226 = arith.constant 1.000000e+00 : f32
    %790 = vector.broadcast %cst_226 : f32 to vector<8x32xf32>
    %791 = arith.addf %790, %789 : vector<8x32xf32>
    %792 = tpu.reciprocal %791 {approx = true} : vector<8x32xf32> -> vector<8x32xf32>
    %793 = arith.mulf %786, %792 : vector<8x32xf32>
    %cst_227 = arith.constant dense<0.000000e+00> : vector<8x32xf32>
    %794 = tpu.matmul %793, %2, %cst_227 {dimension_numbers = #tpu.dot_dimension_numbers<[1], [0], [0], [1], [0, 0, 1, 1], [], []>} : vector<8x32xf32>, vector<32x32xf32>, vector<8x32xf32> -> vector<8x32xf32>
    %795 = vector.broadcast %3 : vector<1x32xf32> to vector<8x32xf32>
    %796 = arith.addf %794, %795 : vector<8x32xf32>
    %cst_228 = arith.constant 0.000000e+00 : f32
    %797 = vector.broadcast %cst_228 : f32 to vector<8x32xf32>
    %798 = arith.subf %797, %796 : vector<8x32xf32>
    %799 = math.exp %798 : vector<8x32xf32>
    %cst_229 = arith.constant 1.000000e+00 : f32
    %800 = vector.broadcast %cst_229 : f32 to vector<8x32xf32>
    %801 = arith.addf %800, %799 : vector<8x32xf32>
    %802 = tpu.reciprocal %801 {approx = true} : vector<8x32xf32> -> vector<8x32xf32>
    %803 = arith.mulf %796, %802 : vector<8x32xf32>
    %cst_230 = arith.constant dense<0.000000e+00> : vector<8x32xf32>
    %804 = tpu.matmul %803, %4, %cst_230 {dimension_numbers = #tpu.dot_dimension_numbers<[1], [0], [0], [1], [0, 0, 1, 1], [], []>} : vector<8x32xf32>, vector<32x32xf32>, vector<8x32xf32> -> vector<8x32xf32>
    %805 = vector.broadcast %5 : vector<1x32xf32> to vector<8x32xf32>
    %806 = arith.addf %804, %805 : vector<8x32xf32>
    %807 = vector.broadcast %781 : f32 to vector<8x32xf32>
    %808 = arith.mulf %806, %807 : vector<8x32xf32>
    %cst_231 = arith.constant 5.000000e-01 : f32
    %809 = arith.mulf %cst_231, %783 : f32
    %810 = arith.addf %781, %809 : f32
    %cst_232 = arith.constant 5.000000e-01 : f32
    %811 = arith.mulf %cst_232, %783 : f32
    %812 = vector.broadcast %811 : f32 to vector<8x32xf32>
    %813 = arith.mulf %812, %808 : vector<8x32xf32>
    %814 = arith.addf %780, %813 : vector<8x32xf32>
    %cst_233 = arith.constant dense<0.000000e+00> : vector<8x32xf32>
    %815 = tpu.matmul %814, %0, %cst_233 {dimension_numbers = #tpu.dot_dimension_numbers<[1], [0], [0], [1], [0, 0, 1, 1], [], []>} : vector<8x32xf32>, vector<32x32xf32>, vector<8x32xf32> -> vector<8x32xf32>
    %816 = vector.broadcast %1 : vector<1x32xf32> to vector<8x32xf32>
    %817 = arith.addf %815, %816 : vector<8x32xf32>
    %cst_234 = arith.constant 0.000000e+00 : f32
    %818 = vector.broadcast %cst_234 : f32 to vector<8x32xf32>
    %819 = arith.subf %818, %817 : vector<8x32xf32>
    %820 = math.exp %819 : vector<8x32xf32>
    %cst_235 = arith.constant 1.000000e+00 : f32
    %821 = vector.broadcast %cst_235 : f32 to vector<8x32xf32>
    %822 = arith.addf %821, %820 : vector<8x32xf32>
    %823 = tpu.reciprocal %822 {approx = true} : vector<8x32xf32> -> vector<8x32xf32>
    %824 = arith.mulf %817, %823 : vector<8x32xf32>
    %cst_236 = arith.constant dense<0.000000e+00> : vector<8x32xf32>
    %825 = tpu.matmul %824, %2, %cst_236 {dimension_numbers = #tpu.dot_dimension_numbers<[1], [0], [0], [1], [0, 0, 1, 1], [], []>} : vector<8x32xf32>, vector<32x32xf32>, vector<8x32xf32> -> vector<8x32xf32>
    %826 = vector.broadcast %3 : vector<1x32xf32> to vector<8x32xf32>
    %827 = arith.addf %825, %826 : vector<8x32xf32>
    %cst_237 = arith.constant 0.000000e+00 : f32
    %828 = vector.broadcast %cst_237 : f32 to vector<8x32xf32>
    %829 = arith.subf %828, %827 : vector<8x32xf32>
    %830 = math.exp %829 : vector<8x32xf32>
    %cst_238 = arith.constant 1.000000e+00 : f32
    %831 = vector.broadcast %cst_238 : f32 to vector<8x32xf32>
    %832 = arith.addf %831, %830 : vector<8x32xf32>
    %833 = tpu.reciprocal %832 {approx = true} : vector<8x32xf32> -> vector<8x32xf32>
    %834 = arith.mulf %827, %833 : vector<8x32xf32>
    %cst_239 = arith.constant dense<0.000000e+00> : vector<8x32xf32>
    %835 = tpu.matmul %834, %4, %cst_239 {dimension_numbers = #tpu.dot_dimension_numbers<[1], [0], [0], [1], [0, 0, 1, 1], [], []>} : vector<8x32xf32>, vector<32x32xf32>, vector<8x32xf32> -> vector<8x32xf32>
    %836 = vector.broadcast %5 : vector<1x32xf32> to vector<8x32xf32>
    %837 = arith.addf %835, %836 : vector<8x32xf32>
    %838 = vector.broadcast %810 : f32 to vector<8x32xf32>
    %839 = arith.mulf %837, %838 : vector<8x32xf32>
    %cst_240 = arith.constant 5.000000e-01 : f32
    %840 = arith.mulf %cst_240, %783 : f32
    %841 = arith.addf %781, %840 : f32
    %cst_241 = arith.constant 5.000000e-01 : f32
    %842 = arith.mulf %cst_241, %783 : f32
    %843 = vector.broadcast %842 : f32 to vector<8x32xf32>
    %844 = arith.mulf %843, %839 : vector<8x32xf32>
    %845 = arith.addf %780, %844 : vector<8x32xf32>
    %cst_242 = arith.constant dense<0.000000e+00> : vector<8x32xf32>
    %846 = tpu.matmul %845, %0, %cst_242 {dimension_numbers = #tpu.dot_dimension_numbers<[1], [0], [0], [1], [0, 0, 1, 1], [], []>} : vector<8x32xf32>, vector<32x32xf32>, vector<8x32xf32> -> vector<8x32xf32>
    %847 = vector.broadcast %1 : vector<1x32xf32> to vector<8x32xf32>
    %848 = arith.addf %846, %847 : vector<8x32xf32>
    %cst_243 = arith.constant 0.000000e+00 : f32
    %849 = vector.broadcast %cst_243 : f32 to vector<8x32xf32>
    %850 = arith.subf %849, %848 : vector<8x32xf32>
    %851 = math.exp %850 : vector<8x32xf32>
    %cst_244 = arith.constant 1.000000e+00 : f32
    %852 = vector.broadcast %cst_244 : f32 to vector<8x32xf32>
    %853 = arith.addf %852, %851 : vector<8x32xf32>
    %854 = tpu.reciprocal %853 {approx = true} : vector<8x32xf32> -> vector<8x32xf32>
    %855 = arith.mulf %848, %854 : vector<8x32xf32>
    %cst_245 = arith.constant dense<0.000000e+00> : vector<8x32xf32>
    %856 = tpu.matmul %855, %2, %cst_245 {dimension_numbers = #tpu.dot_dimension_numbers<[1], [0], [0], [1], [0, 0, 1, 1], [], []>} : vector<8x32xf32>, vector<32x32xf32>, vector<8x32xf32> -> vector<8x32xf32>
    %857 = vector.broadcast %3 : vector<1x32xf32> to vector<8x32xf32>
    %858 = arith.addf %856, %857 : vector<8x32xf32>
    %cst_246 = arith.constant 0.000000e+00 : f32
    %859 = vector.broadcast %cst_246 : f32 to vector<8x32xf32>
    %860 = arith.subf %859, %858 : vector<8x32xf32>
    %861 = math.exp %860 : vector<8x32xf32>
    %cst_247 = arith.constant 1.000000e+00 : f32
    %862 = vector.broadcast %cst_247 : f32 to vector<8x32xf32>
    %863 = arith.addf %862, %861 : vector<8x32xf32>
    %864 = tpu.reciprocal %863 {approx = true} : vector<8x32xf32> -> vector<8x32xf32>
    %865 = arith.mulf %858, %864 : vector<8x32xf32>
    %cst_248 = arith.constant dense<0.000000e+00> : vector<8x32xf32>
    %866 = tpu.matmul %865, %4, %cst_248 {dimension_numbers = #tpu.dot_dimension_numbers<[1], [0], [0], [1], [0, 0, 1, 1], [], []>} : vector<8x32xf32>, vector<32x32xf32>, vector<8x32xf32> -> vector<8x32xf32>
    %867 = vector.broadcast %5 : vector<1x32xf32> to vector<8x32xf32>
    %868 = arith.addf %866, %867 : vector<8x32xf32>
    %869 = vector.broadcast %841 : f32 to vector<8x32xf32>
    %870 = arith.mulf %868, %869 : vector<8x32xf32>
    %871 = vector.broadcast %783 : f32 to vector<8x32xf32>
    %872 = arith.mulf %871, %870 : vector<8x32xf32>
    %873 = arith.addf %780, %872 : vector<8x32xf32>
    %cst_249 = arith.constant dense<0.000000e+00> : vector<8x32xf32>
    %874 = tpu.matmul %873, %0, %cst_249 {dimension_numbers = #tpu.dot_dimension_numbers<[1], [0], [0], [1], [0, 0, 1, 1], [], []>} : vector<8x32xf32>, vector<32x32xf32>, vector<8x32xf32> -> vector<8x32xf32>
    %875 = vector.broadcast %1 : vector<1x32xf32> to vector<8x32xf32>
    %876 = arith.addf %874, %875 : vector<8x32xf32>
    %cst_250 = arith.constant 0.000000e+00 : f32
    %877 = vector.broadcast %cst_250 : f32 to vector<8x32xf32>
    %878 = arith.subf %877, %876 : vector<8x32xf32>
    %879 = math.exp %878 : vector<8x32xf32>
    %cst_251 = arith.constant 1.000000e+00 : f32
    %880 = vector.broadcast %cst_251 : f32 to vector<8x32xf32>
    %881 = arith.addf %880, %879 : vector<8x32xf32>
    %882 = tpu.reciprocal %881 {approx = true} : vector<8x32xf32> -> vector<8x32xf32>
    %883 = arith.mulf %876, %882 : vector<8x32xf32>
    %cst_252 = arith.constant dense<0.000000e+00> : vector<8x32xf32>
    %884 = tpu.matmul %883, %2, %cst_252 {dimension_numbers = #tpu.dot_dimension_numbers<[1], [0], [0], [1], [0, 0, 1, 1], [], []>} : vector<8x32xf32>, vector<32x32xf32>, vector<8x32xf32> -> vector<8x32xf32>
    %885 = vector.broadcast %3 : vector<1x32xf32> to vector<8x32xf32>
    %886 = arith.addf %884, %885 : vector<8x32xf32>
    %cst_253 = arith.constant 0.000000e+00 : f32
    %887 = vector.broadcast %cst_253 : f32 to vector<8x32xf32>
    %888 = arith.subf %887, %886 : vector<8x32xf32>
    %889 = math.exp %888 : vector<8x32xf32>
    %cst_254 = arith.constant 1.000000e+00 : f32
    %890 = vector.broadcast %cst_254 : f32 to vector<8x32xf32>
    %891 = arith.addf %890, %889 : vector<8x32xf32>
    %892 = tpu.reciprocal %891 {approx = true} : vector<8x32xf32> -> vector<8x32xf32>
    %893 = arith.mulf %886, %892 : vector<8x32xf32>
    %cst_255 = arith.constant dense<0.000000e+00> : vector<8x32xf32>
    %894 = tpu.matmul %893, %4, %cst_255 {dimension_numbers = #tpu.dot_dimension_numbers<[1], [0], [0], [1], [0, 0, 1, 1], [], []>} : vector<8x32xf32>, vector<32x32xf32>, vector<8x32xf32> -> vector<8x32xf32>
    %895 = vector.broadcast %5 : vector<1x32xf32> to vector<8x32xf32>
    %896 = arith.addf %894, %895 : vector<8x32xf32>
    %897 = vector.broadcast %782 : f32 to vector<8x32xf32>
    %898 = arith.mulf %896, %897 : vector<8x32xf32>
    %cst_256 = arith.constant 6.000000e+00 : f32
    %899 = arith.divf %783, %cst_256 : f32
    %cst_257 = arith.constant 2.000000e+00 : f32
    %900 = vector.broadcast %cst_257 : f32 to vector<8x32xf32>
    %901 = arith.mulf %900, %839 : vector<8x32xf32>
    %902 = arith.addf %808, %901 : vector<8x32xf32>
    %cst_258 = arith.constant 2.000000e+00 : f32
    %903 = vector.broadcast %cst_258 : f32 to vector<8x32xf32>
    %904 = arith.mulf %903, %870 : vector<8x32xf32>
    %905 = arith.addf %902, %904 : vector<8x32xf32>
    %906 = arith.addf %905, %898 : vector<8x32xf32>
    %907 = vector.broadcast %899 : f32 to vector<8x32xf32>
    %908 = arith.mulf %907, %906 : vector<8x32xf32>
    %909 = arith.addf %780, %908 : vector<8x32xf32>
    %910 = vector.shape_cast %6 : vector<8x32xf32> to vector<1x8x32xf32>
    %911 = vector.shape_cast %135 : vector<8x32xf32> to vector<1x8x32xf32>
    %912 = vector.shape_cast %264 : vector<8x32xf32> to vector<1x8x32xf32>
    %913 = vector.shape_cast %393 : vector<8x32xf32> to vector<1x8x32xf32>
    %914 = vector.shape_cast %522 : vector<8x32xf32> to vector<1x8x32xf32>
    %915 = vector.shape_cast %651 : vector<8x32xf32> to vector<1x8x32xf32>
    %916 = vector.shape_cast %780 : vector<8x32xf32> to vector<1x8x32xf32>
    %917 = vector.shape_cast %909 : vector<8x32xf32> to vector<1x8x32xf32>
    %918 = tpu.concatenate %910, %911, %912, %913, %914, %915, %916, %917 in 0 : vector<1x8x32xf32>, vector<1x8x32xf32>, vector<1x8x32xf32>, vector<1x8x32xf32>, vector<1x8x32xf32>, vector<1x8x32xf32>, vector<1x8x32xf32>, vector<1x8x32xf32> -> vector<8x8x32xf32>
    %919 = vector.extract_strided_slice %918 {offsets = [0, 0, 0], sizes = [8, 8, 8], strides = [1, 1, 1]} : vector<8x8x32xf32> to vector<8x8x8xf32>
    %c0_259 = arith.constant 0 : index
    %c0_260 = arith.constant 0 : index
    %c0_261 = arith.constant 0 : index
    %920 = vector.load %arg4[%c0_259, %c0_260, %c0_261] : memref<8x8x8xf32, #tpu.memory_space<vmem>>, vector<8x8x8xf32>
    tpu.vector_store %arg4[%c0_259, %c0_260, %c0_261], %919 {strides = array<i32>} : memref<8x8x8xf32, #tpu.memory_space<vmem>>, vector<8x8x8xf32>,
    return
  }
  func.func @transform_0(%arg0: i32) -> i32 {
    %c0_i32 = arith.constant 0 : i32
    %c0_i32_0 = arith.constant 0 : i32
    return %c0_i32 : i32
  }
  func.func @transform_1(%arg0: i32) -> (i32, i32) {
    %c0_i32 = arith.constant 0 : i32
    %c0_i32_0 = arith.constant 0 : i32
    return %arg0, %c0_i32 : i32, i32
  }
  func.func @transform_2(%arg0: i32) -> (i32, i32) {
    %c0_i32 = arith.constant 0 : i32
    %c0_i32_0 = arith.constant 0 : i32
    %c0_i32_1 = arith.constant 0 : i32
    return %c0_i32, %c0_i32_0 : i32, i32
  }
  func.func @transform_3(%arg0: i32) -> (i32, i32, i32) {
    %c0_i32 = arith.constant 0 : i32
    %c0_i32_0 = arith.constant 0 : i32
    %c0_i32_1 = arith.constant 0 : i32
    return %c0_i32, %arg0, %c0_i32_0 : i32, i32, i32
  }
}

</mosaic_0001>

<bundles_post_ra>
// kernel: ode_func_forward.1
= control target key start
LH: loop header
LB: loop body
LE: loop exit
PB: predicated region body
PF: predicated region fallthrough
CT: control target
= control target key end

     0   :  { %8 = vsyncpa [#allocation3], 0  ;;  %s9973_s0 = inlined_call_operand.vmem [shape: f32[8], index: 0, kind: input, shape index: {}]   ;;  %s9974_s1 = inlined_call_operand.vmem [shape: f32[8,32], index: 1, kind: input, shape index: {}]   ;;  %s9975_s2 = inlined_call_operand.vmem [shape: f32[120,32], index: 2, kind: input, shape index: {}]   ;;  %s9976_s3 = inlined_call_operand.vmem [shape: f32[8,8,8], index: 3, kind: output, shape index: {}]  }
   0x1   :  { %s15_s14 = sshll.u32 %s9973_s0, 4  ;;  %s16_s14 = int_to_ptr.vmem [resolvable:$true] %s15_s14 }
   0x2   :  { %s8919_s15 = scalar_lea.vmem %s16_s14, 16  ;;  %p8924_p1 = scmp.lt.s32.totalorder %s16_s14, %s16_s14 }
   0x3   :  { %p8920_p0 = scmp.ne.s32.totalorder %s16_s14, %s8919_s15  ;;  %p8925_p2 = scmp.lt.s32.totalorder %s8919_s15, %s8919_s15 }
   0x5   :  { %p8926_p3 = por %p8925_p2, %p8924_p1 }
   0x7   :  { %p8927_p4 = pnand %p8926_p3, %p8920_p0 }
   0x9   :  { %8930 = shalt.err (!%p8927_p4)
}
   0xa   :  { %s8933_s16 = smov [#allocation2]  }
   0xb   :  { %18 = dma.vmem_to_smem %s16_s14, 16, %s8933_s16, [#allocation3]  }
   0xc   :  { %8931 = dma.done.wait [#allocation3], 16  }
   0xd   :  { %8932 = vsyncadd [#allocation3], 4294967280 }
   0xe   :  { %26 = sfence }
   0xf   :  { %v27_v0 = vld [vmem:[%s9975_s2] sm:$0xff]  ;;  %v28_v1 = vld [vmem:[%s9975_s2 + $0x8] sm:$0xff]  ;;  %v29_v2 = vld [vmem:[%s9975_s2 + $0x10] sm:$0xff]  ;;  %v8934_v3 = vmov 0.0|0.0   ;;  %vm8935_vm0 = vmmov 0   ;;  %v8936_v6 = vmov 0.0  }
  0x10   :  { %8181 = vmatprep.subr.bf16.mxu0 %v8934_v3  ;;  %v8970_v4 = vpack.c.bf16 %v28_v1, %v27_v0  ;;  %v30_v5 = vld [vmem:[%s9975_s2 + $0x18] sm:$0xff]  ;;  %7265 = vmatprep.mubr.msk.f32.mxu0 %vm8935_vm0, %v8936_v6  ;;  %v8980_v7 = vld [vmem:[%s9974_s1] sm:$0xff]  ;;  %vm6729_vm1 = vcmask 64512   ;;  %vm50_vm2 = vcmask 261120   ;;  %v32_v9 = vld [vmem:[%s9975_s2 + $0x28] sm:$0xff]  ;;  %s9066_s20 = sld [smem:[#allocation2]] }
  0x11   :  { %6730 = vst.msk [vmem:[%s9976_s3] sm:$0xff] %vm6729_vm1, %v8980_v7  ;;  %8187 = vmatprep.subr.bf16.mxu1 %v8934_v3  ;;  %7276 = vmatprep.mubr.msk.f32.mxu1 %vm8935_vm0, %v8936_v6  ;;  %v8991_v8 = vpack.c.bf16 %v30_v5, %v29_v2  ;;  %v33_v10 = vld [vmem:[%s9975_s2 + $0x30] sm:$0xff]  ;;  %v34_v12 = vld [vmem:[%s9975_s2 + $0x38] sm:$0xff]  ;;  %v35_v13 = vld [vmem:[%s9975_s2 + $0x40] sm:$0xff]  ;;  %s9068_s0 = sld [smem:[#allocation2 + $0x1]]  ;;  %s9204_s28 = sld [smem:[#allocation2 + $0x2]] }
  0x12   :  { %8183 = vmatpush3.bf16.msra.mxu0 %v8970_v4  ;;  %v9006_v11 = vpack.c.bf16 %v33_v10, %v32_v9  ;;  %v9016_v14 = vpack.c.bf16 %v35_v13, %v34_v12  ;;  %v9023_v15 = vld [vmem:[%s9975_s2 + $0x20] ss:$0 sm:$0xff]  ;;  %v37_v25 = vld [vmem:[%s9975_s2 + $0x50] sm:$0xff]  ;;  %v38_v26 = vld [vmem:[%s9975_s2 + $0x58] sm:$0xff]  ;;  %s9334_s8 = sld [smem:[#allocation2 + $0x3]]  ;;  %s9609_s27 = sld [smem:[#allocation2 + $0x5]] }
  0x13   :  { %8184 = vmatprep.subr.bf16.mxu0 %v8934_v3  ;;  %v9039_v27 = vpack.c.bf16 %v38_v26, %v37_v25  ;;  %v39_v28 = vld [vmem:[%s9975_s2 + $0x60] sm:$0xff]  ;;  %v40_v29 = vld [vmem:[%s9975_s2 + $0x68] sm:$0xff]  ;;  %v9077_v41 = vld [vmem:[%s9975_s2 + $0x70] ss:$0 sm:$0xff]  ;;  %s9739_s6 = sld [smem:[#allocation2 + $0x6]]  ;;  %s9884_s18 = sld [smem:[#allocation2 + $0x7]] }
  0x14   :  { %8189 = vmatpush3.bf16.msra.mxu1 %v9006_v11  ;;  %v9049_v30 = vpack.c.bf16 %v40_v29, %v39_v28  ;;  %v9056_v31 = vld [vmem:[%s9975_s2 + $0x48] ss:$0 sm:$0xff] }
  0x15   :  { %8190 = vmatprep.subr.bf16.mxu1 %v8934_v3 }
  0x16   :  { %8186 = vmatpush3.bf16.msra.mxu0 %v8991_v8  ;;  %v290_v43 = vstv %s9066_s20 }
  0x17   :  { %8193 = vmatprep.subr.bf16.mxu0 %v8934_v3  ;;  %s9072_s21 = ssub.f32 %s9068_s0, %s9066_s20 }
  0x18   :  { %8192 = vmatpush3.bf16.msra.mxu1 %v9016_v14  ;;  %s9208_s29 = ssub.f32 %s9204_s28, %s9068_s0 }
  0x19   :  { %7266 = vmatmul.mubr.msk.f32.vlgmr.msra.gmra.mrb[0].mxu0 %vm50_vm2, %v8980_v7  ;;  %8199 = vmatprep.subr.bf16.mxu1 %v8934_v3  ;;  %s292_s24 = smul.f32 0.5, %s9072_s21  ;;  %s9338_s9 = ssub.f32 %s9334_s8, %s9204_s28 }
  0x1a   :  { %7287 = vmatprep.mubr.msk.f32.mxu0 %vm8935_vm0, %v8936_v6  ;;  %8195 = vmatpush3.bf16.msra.mxu0 %v9039_v27  ;;  %s1002_s26 = smul.f32 0.16666667, %s9072_s21  ;;  %s9743_s7 = ssub.f32 %s9739_s6, %s9609_s27 }
  0x1b   :  { %8196 = vmatprep.subr.bf16.mxu0 %v8934_v3  ;;  %v294_v46 = vstv %s292_s24  ;;  %s9114_s25 = sadd.f32 %s292_s24, %s9066_s20  ;;  %s1245_s30 = smul.f32 0.5, %s9208_s29 }
  0x1c   :  { %s1955_s5 = smul.f32 0.16666667, %s9208_s29  ;;  %s9888_s19 = ssub.f32 %s9884_s18, %s9739_s6 }
  0x1d   :  { %v528_v10 = vstv %s9114_s25  ;;  %s9244_s4 = sadd.f32 %s9068_s0, %s1245_s30  ;;  %s2198_s10 = smul.f32 0.5, %s9338_s9 }
  0x1e   :  { %8198 = vmatpush3.bf16.msra.mxu0 %v9049_v30  ;;  %s2908_s16 = smul.f32 0.16666667, %s9338_s9 }
  0x1f   :  { %8205 = vmatprep.subr.bf16.mxu0 %v8934_v3  ;;  %s9374_s11 = sadd.f32 %s9204_s28, %s2198_s10  ;;  %s6010_s20 = smul.f32 0.5, %s9888_s19 }
  0xec   :  { %v120_v16 = vpop.f32.mrb[0].mxu0 }
  0xed   :  { %v121_v17 = vadd.f32 %v9023_v15, %v120_v16  ;;  %v7267_v18 = vpop.f32.mrb[1].mxu0 }
  0xef   :  { %v124_v19 = vsub.f32 0.0, %v121_v17 }
  0xf1   :  { %v125_v20 = vmul.f32 1.442695, %v124_v19 }
  0xf3   :  { %8689 = vpow2.f32 %v125_v20 }
  0xfd   :  { %v8690_v21 = vpop.eup %8689 }
  0xfe   :  { %v127_v22 = vadd.f32 1.0, %v8690_v21 }
 0x100   :  { %8691 = vrcp.f32 %v127_v22 }
 0x10a   :  { %v8692_v23 = vpop.eup %8691 }
 0x10b   :  { %v129_v24 = vmul.f32 %v8692_v23, %v121_v17 }
 0x10d   :  { %7277 = vmatmul.mubr.msk.f32.vlgmr.msra.gmra.mrb[0].mxu1 %vm50_vm2, %v129_v24 }
 0x10e   :  { %8201 = vmatpush3.bf16.msra.mxu1 %v8970_v4  ;;  %7298 = vmatprep.mubr.msk.f32.mxu1 %vm8935_vm0, %v8936_v6 }
 0x10f   :  { %8202 = vmatprep.subr.bf16.mxu1 %v8934_v3 }
 0x112   :  { %8204 = vmatpush3.bf16.msra.mxu1 %v8991_v8 }
 0x113   :  { %8211 = vmatprep.subr.bf16.mxu1 %v8934_v3 }
 0x1e0   :  { %v203_v32 = vpop.f32.mrb[0].mxu1 }
 0x1e1   :  { %v204_v33 = vadd.f32 %v9056_v31, %v203_v32  ;;  %v7278_v34 = vpop.f32.mrb[1].mxu1 }
 0x1e3   :  { %v207_v35 = vsub.f32 0.0, %v204_v33 }
 0x1e5   :  { %v208_v36 = vmul.f32 1.442695, %v207_v35 }
 0x1e7   :  { %8693 = vpow2.f32 %v208_v36 }
 0x1f1   :  { %v8694_v37 = vpop.eup %8693 }
 0x1f2   :  { %v210_v38 = vadd.f32 1.0, %v8694_v37 }
 0x1f4   :  { %8695 = vrcp.f32 %v210_v38 }
 0x1fe   :  { %v8696_v39 = vpop.eup %8695 }
 0x1ff   :  { %v212_v40 = vmul.f32 %v8696_v39, %v204_v33 }
 0x201   :  { %7288 = vmatmul.mubr.msk.f32.vlgmr.msra.gmra.mrb[2].mxu0 %vm50_vm2, %v212_v40 }
 0x202   :  { %8207 = vmatpush3.bf16.msra.mxu0 %v9006_v11  ;;  %7309 = vmatprep.mubr.msk.f32.mxu0 %vm8935_vm0, %v8936_v6 }
 0x203   :  { %8208 = vmatprep.subr.bf16.mxu0 %v8934_v3 }
 0x206   :  { %8210 = vmatpush3.bf16.msra.mxu0 %v9016_v14 }
 0x207   :  { %8217 = vmatprep.subr.bf16.mxu0 %v8934_v3 }
 0x2d4   :  { %v286_v42 = vpop.f32.mrb[2].mxu0 }
 0x2d5   :  { %v287_v44 = vadd.f32 %v9077_v41, %v286_v42  ;;  %v7289_v45 = vpop.f32.mrb[3].mxu0 }
 0x2d6   :  { %v764_v45 = vstv %s9072_s21 }
 0x2d7   :  { %v9084_v47 = vmul.f32 %v290_v43, %v287_v44 }
 0x2d9   :  { %v295_v48 = vmul.f32 %v294_v46, %v9084_v47 }
 0x2db   :  { %v296_v49 = vadd.f32 %v295_v48, %v8980_v7 }
 0x2dd   :  { %7299 = vmatmul.mubr.msk.f32.vlgmr.msra.gmra.mrb[2].mxu1 %vm50_vm2, %v296_v49 }
 0x2de   :  { %8213 = vmatpush3.bf16.msra.mxu1 %v9039_v27  ;;  %7320 = vmatprep.mubr.msk.f32.mxu1 %vm8935_vm0, %v8936_v6 }
 0x2df   :  { %8214 = vmatprep.subr.bf16.mxu1 %v8934_v3 }
 0x2e2   :  { %8216 = vmatpush3.bf16.msra.mxu1 %v9049_v30 }
 0x2e3   :  { %8223 = vmatprep.subr.bf16.mxu1 %v8934_v3 }
 0x3b0   :  { %v366_v50 = vpop.f32.mrb[2].mxu1 }
 0x3b1   :  { %v367_v51 = vadd.f32 %v9023_v15, %v366_v50  ;;  %v7300_v52 = vpop.f32.mrb[3].mxu1 }
 0x3b3   :  { %v370_v53 = vsub.f32 0.0, %v367_v51 }
 0x3b5   :  { %v371_v54 = vmul.f32 1.442695, %v370_v53 }
 0x3b7   :  { %8697 = vpow2.f32 %v371_v54 }
 0x3c1   :  { %v8698_v55 = vpop.eup %8697 }
 0x3c2   :  { %v373_v56 = vadd.f32 1.0, %v8698_v55 }
 0x3c4   :  { %8699 = vrcp.f32 %v373_v56 }
 0x3ce   :  { %v8700_v57 = vpop.eup %8699 }
 0x3cf   :  { %v375_v58 = vmul.f32 %v8700_v57, %v367_v51 }
 0x3d1   :  { %7310 = vmatmul.mubr.msk.f32.vlgmr.msra.gmra.mrb[4].mxu0 %vm50_vm2, %v375_v58 }
 0x3d2   :  { %8219 = vmatpush3.bf16.msra.mxu0 %v8970_v4  ;;  %7331 = vmatprep.mubr.msk.f32.mxu0 %vm8935_vm0, %v8936_v6 }
 0x3d3   :  { %8220 = vmatprep.subr.bf16.mxu0 %v8934_v3 }
 0x3d6   :  { %8222 = vmatpush3.bf16.msra.mxu0 %v8991_v8 }
 0x3d7   :  { %8229 = vmatprep.subr.bf16.mxu0 %v8934_v3 }
 0x4a4   :  { %v445_v59 = vpop.f32.mrb[4].mxu0 }
 0x4a5   :  { %v446_v60 = vadd.f32 %v9056_v31, %v445_v59  ;;  %v7311_v61 = vpop.f32.mrb[5].mxu0 }
 0x4a7   :  { %v449_v62 = vsub.f32 0.0, %v446_v60 }
 0x4a9   :  { %v450_v63 = vmul.f32 1.442695, %v449_v62 }
 0x4ab   :  { %8701 = vpow2.f32 %v450_v63 }
 0x4b5   :  { %v8702_v0 = vpop.eup %8701 }
 0x4b6   :  { %v452_v1 = vadd.f32 1.0, %v8702_v0 }
 0x4b8   :  { %8703 = vrcp.f32 %v452_v1 }
 0x4c2   :  { %v8704_v2 = vpop.eup %8703 }
 0x4c3   :  { %v454_v5 = vmul.f32 %v8704_v2, %v446_v60 }
 0x4c5   :  { %7321 = vmatmul.mubr.msk.f32.vlgmr.msra.gmra.mrb[4].mxu1 %vm50_vm2, %v454_v5 }
 0x4c6   :  { %8225 = vmatpush3.bf16.msra.mxu1 %v9006_v11  ;;  %7342 = vmatprep.mubr.msk.f32.mxu1 %vm8935_vm0, %v8936_v6 }
 0x4c7   :  { %8226 = vmatprep.subr.bf16.mxu1 %v8934_v3 }
 0x4ca   :  { %8228 = vmatpush3.bf16.msra.mxu1 %v9016_v14 }
 0x4cb   :  { %8235 = vmatprep.subr.bf16.mxu1 %v8934_v3 }
 0x598   :  { %v524_v9 = vpop.f32.mrb[4].mxu1 }
 0x599   :  { %v525_v12 = vadd.f32 %v9077_v41, %v524_v9  ;;  %v7322_v13 = vpop.f32.mrb[5].mxu1 }
 0x59a   :  { %v998_v13 = vstv %s9068_s0  ;;  %s9479_s0 = sld [smem:[#allocation2 + $0x4]] }
 0x59b   :  { %v529_v16 = vmul.f32 %v528_v10, %v525_v12 }
 0x59d   :  { %v530_v17 = vmul.f32 %v529_v16, %v294_v46  ;;  %v1003_v42 = vmul.f32 2.0, %v529_v16 }
 0x59f   :  { %v531_v18 = vadd.f32 %v530_v17, %v8980_v7  ;;  %v1004_v48 = vadd.f32 %v1003_v42, %v9084_v47 }
 0x5a0   :  { %s9483_s21 = ssub.f32 %s9479_s0, %s9334_s8 }
 0x5a1   :  { %7332 = vmatmul.mubr.msk.f32.vlgmr.msra.gmra.mrb[6].mxu0 %vm50_vm2, %v531_v18  ;;  %s9613_s1 = ssub.f32 %s9609_s27, %s9479_s0 }
 0x5a2   :  { %8231 = vmatpush3.bf16.msra.mxu0 %v9039_v27  ;;  %7353 = vmatprep.mubr.msk.f32.mxu0 %vm8935_vm0, %v8936_v6  ;;  %s3151_s22 = smul.f32 0.5, %s9483_s21 }
 0x5a3   :  { %8232 = vmatprep.subr.bf16.mxu0 %v8934_v3  ;;  %s3861_s24 = smul.f32 0.16666667, %s9483_s21 }
 0x5a4   :  { %s9519_s23 = sadd.f32 %s9334_s8, %s3151_s22 }
 0x5a6   :  { %8234 = vmatpush3.bf16.msra.mxu0 %v9049_v30 }
 0x5a7   :  { %8241 = vmatprep.subr.bf16.mxu0 %v8934_v3 }
 0x674   :  { %v601_v19 = vpop.f32.mrb[6].mxu0 }
 0x675   :  { %v602_v20 = vadd.f32 %v9023_v15, %v601_v19  ;;  %v7333_v21 = vpop.f32.mrb[7].mxu0  ;;  %v1008_v19 = vstv %s1002_s26 }
 0x677   :  { %v605_v22 = vsub.f32 0.0, %v602_v20 }
 0x679   :  { %v606_v23 = vmul.f32 1.442695, %v605_v22 }
 0x67b   :  { %8705 = vpow2.f32 %v606_v23 }
 0x685   :  { %v8706_v24 = vpop.eup %8705 }
 0x686   :  { %v608_v25 = vadd.f32 1.0, %v8706_v24 }
 0x688   :  { %8707 = vrcp.f32 %v608_v25 }
 0x692   :  { %v8708_v26 = vpop.eup %8707 }
 0x693   :  { %v610_v28 = vmul.f32 %v8708_v26, %v602_v20 }
 0x695   :  { %7343 = vmatmul.mubr.msk.f32.vlgmr.msra.gmra.mrb[6].mxu1 %vm50_vm2, %v610_v28 }
 0x696   :  { %8237 = vmatpush3.bf16.msra.mxu1 %v8970_v4  ;;  %7364 = vmatprep.mubr.msk.f32.mxu1 %vm8935_vm0, %v8936_v6 }
 0x697   :  { %8238 = vmatprep.subr.bf16.mxu1 %v8934_v3 }
 0x69a   :  { %8240 = vmatpush3.bf16.msra.mxu1 %v8991_v8 }
 0x69b   :  { %8247 = vmatprep.subr.bf16.mxu1 %v8934_v3 }
 0x768   :  { %v680_v29 = vpop.f32.mrb[6].mxu1 }
 0x769   :  { %v681_v32 = vadd.f32 %v9056_v31, %v680_v29  ;;  %v7344_v33 = vpop.f32.mrb[7].mxu1 }
 0x76b   :  { %v684_v34 = vsub.f32 0.0, %v681_v32 }
 0x76d   :  { %v685_v35 = vmul.f32 1.442695, %v684_v34 }
 0x76f   :  { %8709 = vpow2.f32 %v685_v35 }
 0x779   :  { %v8710_v36 = vpop.eup %8709 }
 0x77a   :  { %v687_v37 = vadd.f32 1.0, %v8710_v36 }
 0x77c   :  { %8711 = vrcp.f32 %v687_v37 }
 0x786   :  { %v8712_v38 = vpop.eup %8711 }
 0x787   :  { %v689_v39 = vmul.f32 %v8712_v38, %v681_v32 }
 0x789   :  { %7354 = vmatmul.mubr.msk.f32.vlgmr.msra.gmra.mrb[8].mxu0 %vm50_vm2, %v689_v39 }
 0x78a   :  { %8243 = vmatpush3.bf16.msra.mxu0 %v9006_v11  ;;  %7375 = vmatprep.mubr.msk.f32.mxu0 %vm8935_vm0, %v8936_v6 }
 0x78b   :  { %8244 = vmatprep.subr.bf16.mxu0 %v8934_v3 }
 0x78e   :  { %8246 = vmatpush3.bf16.msra.mxu0 %v9016_v14 }
 0x78f   :  { %8253 = vmatprep.subr.bf16.mxu0 %v8934_v3 }
 0x85c   :  { %v759_v40 = vpop.f32.mrb[8].mxu0 }
 0x85d   :  { %v760_v43 = vadd.f32 %v9077_v41, %v759_v40  ;;  %v7355_v44 = vpop.f32.mrb[9].mxu0 }
 0x85f   :  { %v763_v46 = vmul.f32 %v760_v43, %v528_v10 }
 0x861   :  { %v765_v49 = vmul.f32 %v764_v45, %v763_v46  ;;  %v1005_v50 = vmul.f32 2.0, %v763_v46 }
 0x863   :  { %v766_v51 = vadd.f32 %v765_v49, %v8980_v7  ;;  %v1006_v52 = vadd.f32 %v1005_v50, %v1004_v48  ;;  %v1247_v48 = vstv %s1245_s30  ;;  %s4814_s30 = smul.f32 0.16666667, %s9613_s1 }
 0x865   :  { %7365 = vmatmul.mubr.msk.f32.vlgmr.msra.gmra.mrb[8].mxu1 %vm50_vm2, %v766_v51 }
 0x866   :  { %8249 = vmatpush3.bf16.msra.mxu1 %v9039_v27  ;;  %7386 = vmatprep.mubr.msk.f32.mxu1 %vm8935_vm0, %v8936_v6 }
 0x867   :  { %8250 = vmatprep.subr.bf16.mxu1 %v8934_v3 }
 0x86a   :  { %8252 = vmatpush3.bf16.msra.mxu1 %v9049_v30 }
 0x86b   :  { %8259 = vmatprep.subr.bf16.mxu1 %v8934_v3 }
 0x938   :  { %v836_v53 = vpop.f32.mrb[8].mxu1 }
 0x939   :  { %v837_v47 = vadd.f32 %v9023_v15, %v836_v53  ;;  %v7366_v54 = vpop.f32.mrb[9].mxu1 }
 0x93b   :  { %v840_v55 = vsub.f32 0.0, %v837_v47 }
 0x93d   :  { %v841_v56 = vmul.f32 1.442695, %v840_v55 }
 0x93f   :  { %8713 = vpow2.f32 %v841_v56 }
 0x949   :  { %v8714_v57 = vpop.eup %8713 }
 0x94a   :  { %v843_v58 = vadd.f32 1.0, %v8714_v57 }
 0x94c   :  { %8715 = vrcp.f32 %v843_v58 }
 0x956   :  { %v8716_v59 = vpop.eup %8715 }
 0x957   :  { %v845_v60 = vmul.f32 %v8716_v59, %v837_v47 }
 0x959   :  { %7376 = vmatmul.mubr.msk.f32.vlgmr.msra.gmra.mrb[10].mxu0 %vm50_vm2, %v845_v60 }
 0x95a   :  { %8255 = vmatpush3.bf16.msra.mxu0 %v8970_v4  ;;  %7397 = vmatprep.mubr.msk.f32.mxu0 %vm8935_vm0, %v8936_v6 }
 0x95b   :  { %8256 = vmatprep.subr.bf16.mxu0 %v8934_v3 }
 0x95e   :  { %8258 = vmatpush3.bf16.msra.mxu0 %v8991_v8 }
 0x95f   :  { %8265 = vmatprep.subr.bf16.mxu0 %v8934_v3 }
 0xa2c   :  { %v915_v61 = vpop.f32.mrb[10].mxu0 }
 0xa2d   :  { %v916_v62 = vadd.f32 %v9056_v31, %v915_v61  ;;  %v7377_v63 = vpop.f32.mrb[11].mxu0 }
 0xa2f   :  { %v919_v0 = vsub.f32 0.0, %v916_v62 }
 0xa31   :  { %v920_v1 = vmul.f32 1.442695, %v919_v0 }
 0xa33   :  { %8717 = vpow2.f32 %v920_v1 }
 0xa3d   :  { %v8718_v2 = vpop.eup %8717 }
 0xa3e   :  { %v922_v5 = vadd.f32 1.0, %v8718_v2 }
 0xa40   :  { %8719 = vrcp.f32 %v922_v5 }
 0xa4a   :  { %v8720_v9 = vpop.eup %8719 }
 0xa4b   :  { %v924_v10 = vmul.f32 %v8720_v9, %v916_v62 }
 0xa4d   :  { %7387 = vmatmul.mubr.msk.f32.vlgmr.msra.gmra.mrb[10].mxu1 %vm50_vm2, %v924_v10 }
 0xa4e   :  { %8261 = vmatpush3.bf16.msra.mxu1 %v9006_v11  ;;  %7408 = vmatprep.mubr.msk.f32.mxu1 %vm8935_vm0, %v8936_v6 }
 0xa4f   :  { %8262 = vmatprep.subr.bf16.mxu1 %v8934_v3 }
 0xa52   :  { %8264 = vmatpush3.bf16.msra.mxu1 %v9016_v14 }
 0xa53   :  { %8271 = vmatprep.subr.bf16.mxu1 %v8934_v3 }
 0xb20   :  { %v994_v12 = vpop.f32.mrb[10].mxu1 }
 0xb21   :  { %v995_v16 = vadd.f32 %v9077_v41, %v994_v12  ;;  %v7388_v17 = vpop.f32.mrb[11].mxu1  ;;  %v1481_v12 = vstv %s9244_s4 }
 0xb23   :  { %v999_v18 = vmul.f32 %v998_v13, %v995_v16 }
 0xb25   :  { %v1007_v20 = vadd.f32 %v1006_v52, %v999_v18 }
 0xb27   :  { %v1009_v21 = vmul.f32 %v1008_v19, %v1007_v20 }
 0xb29   :  { %v9173_v22 = vadd.f32 %v1009_v21, %v8980_v7 }
 0xb2b   :  { %6731 = vst.msk [vmem:[%s9976_s3 + $0x8] sm:$0xff] %vm6729_vm1, %v9173_v22  ;;  %7398 = vmatmul.mubr.msk.f32.vlgmr.msra.gmra.mrb[12].mxu0 %vm50_vm2, %v9173_v22 }
 0xb2c   :  { %8267 = vmatpush3.bf16.msra.mxu0 %v9039_v27  ;;  %7419 = vmatprep.mubr.msk.f32.mxu0 %vm8935_vm0, %v8936_v6 }
 0xb2d   :  { %8268 = vmatprep.subr.bf16.mxu0 %v8934_v3 }
 0xb30   :  { %8270 = vmatpush3.bf16.msra.mxu0 %v9049_v30 }
 0xb31   :  { %8277 = vmatprep.subr.bf16.mxu0 %v8934_v3 }
 0xbfe   :  { %v1082_v7 = vpop.f32.mrb[12].mxu0 }
 0xbff   :  { %v1083_v23 = vadd.f32 %v9023_v15, %v1082_v7  ;;  %v7399_v24 = vpop.f32.mrb[13].mxu0 }
 0xc01   :  { %v1086_v25 = vsub.f32 0.0, %v1083_v23 }
 0xc03   :  { %v1087_v26 = vmul.f32 1.442695, %v1086_v25 }
 0xc05   :  { %8721 = vpow2.f32 %v1087_v26 }
 0xc0f   :  { %v8722_v28 = vpop.eup %8721 }
 0xc10   :  { %v1089_v29 = vadd.f32 1.0, %v8722_v28 }
 0xc12   :  { %8723 = vrcp.f32 %v1089_v29 }
 0xc1c   :  { %v8724_v32 = vpop.eup %8723 }
 0xc1d   :  { %v1091_v33 = vmul.f32 %v8724_v32, %v1083_v23 }
 0xc1f   :  { %7409 = vmatmul.mubr.msk.f32.vlgmr.msra.gmra.mrb[12].mxu1 %vm50_vm2, %v1091_v33 }
 0xc20   :  { %8273 = vmatpush3.bf16.msra.mxu1 %v8970_v4  ;;  %7430 = vmatprep.mubr.msk.f32.mxu1 %vm8935_vm0, %v8936_v6 }
 0xc21   :  { %8274 = vmatprep.subr.bf16.mxu1 %v8934_v3 }
 0xc24   :  { %8276 = vmatpush3.bf16.msra.mxu1 %v8991_v8 }
 0xc25   :  { %8283 = vmatprep.subr.bf16.mxu1 %v8934_v3 }
 0xcf2   :  { %v1161_v34 = vpop.f32.mrb[12].mxu1 }
 0xcf3   :  { %v1162_v35 = vadd.f32 %v9056_v31, %v1161_v34  ;;  %v7410_v36 = vpop.f32.mrb[13].mxu1 }
 0xcf5   :  { %v1165_v37 = vsub.f32 0.0, %v1162_v35 }
 0xcf7   :  { %v1166_v38 = vmul.f32 1.442695, %v1165_v37 }
 0xcf9   :  { %8725 = vpow2.f32 %v1166_v38 }
 0xd03   :  { %v8726_v39 = vpop.eup %8725 }
 0xd04   :  { %v1168_v40 = vadd.f32 1.0, %v8726_v39 }
 0xd06   :  { %8727 = vrcp.f32 %v1168_v40 }
 0xd10   :  { %v8728_v42 = vpop.eup %8727 }
 0xd11   :  { %v1170_v43 = vmul.f32 %v8728_v42, %v1162_v35 }
 0xd13   :  { %7420 = vmatmul.mubr.msk.f32.vlgmr.msra.gmra.mrb[14].mxu0 %vm50_vm2, %v1170_v43 }
 0xd14   :  { %8279 = vmatpush3.bf16.msra.mxu0 %v9006_v11  ;;  %7441 = vmatprep.mubr.msk.f32.mxu0 %vm8935_vm0, %v8936_v6 }
 0xd15   :  { %8280 = vmatprep.subr.bf16.mxu0 %v8934_v3 }
 0xd18   :  { %8282 = vmatpush3.bf16.msra.mxu0 %v9016_v14 }
 0xd19   :  { %8289 = vmatprep.subr.bf16.mxu0 %v8934_v3 }
 0xde6   :  { %v1240_v44 = vpop.f32.mrb[14].mxu0 }
 0xde7   :  { %v1241_v45 = vadd.f32 %v9077_v41, %v1240_v44  ;;  %v7421_v46 = vpop.f32.mrb[15].mxu0 }
 0xde8   :  { %v1717_v46 = vstv %s9208_s29 }
 0xde9   :  { %v9214_v49 = vmul.f32 %v1241_v45, %v998_v13 }
 0xdeb   :  { %v1248_v50 = vmul.f32 %v1247_v48, %v9214_v49 }
 0xded   :  { %v1249_v51 = vadd.f32 %v1248_v50, %v9173_v22 }
 0xdef   :  { %7431 = vmatmul.mubr.msk.f32.vlgmr.msra.gmra.mrb[14].mxu1 %vm50_vm2, %v1249_v51 }
 0xdf0   :  { %8285 = vmatpush3.bf16.msra.mxu1 %v9039_v27  ;;  %7452 = vmatprep.mubr.msk.f32.mxu1 %vm8935_vm0, %v8936_v6 }
 0xdf1   :  { %8286 = vmatprep.subr.bf16.mxu1 %v8934_v3 }
 0xdf4   :  { %8288 = vmatpush3.bf16.msra.mxu1 %v9049_v30 }
 0xdf5   :  { %8295 = vmatprep.subr.bf16.mxu1 %v8934_v3 }
 0xec2   :  { %v1319_v52 = vpop.f32.mrb[14].mxu1 }
 0xec3   :  { %v1320_v53 = vadd.f32 %v9023_v15, %v1319_v52  ;;  %v7432_v47 = vpop.f32.mrb[15].mxu1 }
 0xec5   :  { %v1323_v54 = vsub.f32 0.0, %v1320_v53 }
 0xec7   :  { %v1324_v55 = vmul.f32 1.442695, %v1323_v54 }
 0xec9   :  { %8729 = vpow2.f32 %v1324_v55 }
 0xed3   :  { %v8730_v56 = vpop.eup %8729 }
 0xed4   :  { %v1326_v57 = vadd.f32 1.0, %v8730_v56 }
 0xed6   :  { %8731 = vrcp.f32 %v1326_v57 }
 0xee0   :  { %v8732_v58 = vpop.eup %8731 }
 0xee1   :  { %v1328_v59 = vmul.f32 %v8732_v58, %v1320_v53 }
 0xee3   :  { %7442 = vmatmul.mubr.msk.f32.vlgmr.msra.gmra.mrb[16].mxu0 %vm50_vm2, %v1328_v59 }
 0xee4   :  { %8291 = vmatpush3.bf16.msra.mxu0 %v8970_v4  ;;  %7463 = vmatprep.mubr.msk.f32.mxu0 %vm8935_vm0, %v8936_v6 }
 0xee5   :  { %8292 = vmatprep.subr.bf16.mxu0 %v8934_v3 }
 0xee8   :  { %8294 = vmatpush3.bf16.msra.mxu0 %v8991_v8 }
 0xee9   :  { %8301 = vmatprep.subr.bf16.mxu0 %v8934_v3 }
 0xfb6   :  { %v1398_v60 = vpop.f32.mrb[16].mxu0 }
 0xfb7   :  { %v1399_v61 = vadd.f32 %v9056_v31, %v1398_v60  ;;  %v7443_v62 = vpop.f32.mrb[17].mxu0 }
 0xfb9   :  { %v1402_v63 = vsub.f32 0.0, %v1399_v61 }
 0xfbb   :  { %v1403_v0 = vmul.f32 1.442695, %v1402_v63 }
 0xfbd   :  { %8733 = vpow2.f32 %v1403_v0 }
 0xfc7   :  { %v8734_v1 = vpop.eup %8733 }
 0xfc8   :  { %v1405_v2 = vadd.f32 1.0, %v8734_v1 }
 0xfca   :  { %8735 = vrcp.f32 %v1405_v2 }
 0xfd4   :  { %v8736_v5 = vpop.eup %8735 }
 0xfd5   :  { %v1407_v9 = vmul.f32 %v8736_v5, %v1399_v61 }
 0xfd7   :  { %7453 = vmatmul.mubr.msk.f32.vlgmr.msra.gmra.mrb[16].mxu1 %vm50_vm2, %v1407_v9 }
 0xfd8   :  { %8297 = vmatpush3.bf16.msra.mxu1 %v9006_v11  ;;  %7474 = vmatprep.mubr.msk.f32.mxu1 %vm8935_vm0, %v8936_v6 }
 0xfd9   :  { %8298 = vmatprep.subr.bf16.mxu1 %v8934_v3 }
 0xfdc   :  { %8300 = vmatpush3.bf16.msra.mxu1 %v9016_v14 }
 0xfdd   :  { %8307 = vmatprep.subr.bf16.mxu1 %v8934_v3 }
0x10aa   :  { %v1477_v10 = vpop.f32.mrb[16].mxu1 }
0x10ab   :  { %v1478_v13 = vadd.f32 %v9077_v41, %v1477_v10  ;;  %v7454_v16 = vpop.f32.mrb[17].mxu1 }
0x10ac   :  { %v1951_v16 = vstv %s9204_s28  ;;  %s4104_s28 = smul.f32 0.5, %s9613_s1 }
0x10ad   :  { %v1482_v17 = vmul.f32 %v1481_v12, %v1478_v13 }
0x10ae   :  { %s9649_s29 = sadd.f32 %s9479_s0, %s4104_s28 }
0x10af   :  { %v1483_v18 = vmul.f32 %v1482_v17, %v1247_v48  ;;  %v1956_v43 = vmul.f32 2.0, %v1482_v17 }
0x10b1   :  { %v1484_v19 = vadd.f32 %v1483_v18, %v9173_v22  ;;  %v1957_v50 = vadd.f32 %v1956_v43, %v9214_v49 }
0x10b3   :  { %7464 = vmatmul.mubr.msk.f32.vlgmr.msra.gmra.mrb[18].mxu0 %vm50_vm2, %v1484_v19 }
0x10b4   :  { %8303 = vmatpush3.bf16.msra.mxu0 %v9039_v27  ;;  %7485 = vmatprep.mubr.msk.f32.mxu0 %vm8935_vm0, %v8936_v6 }
0x10b5   :  { %8304 = vmatprep.subr.bf16.mxu0 %v8934_v3 }
0x10b8   :  { %8306 = vmatpush3.bf16.msra.mxu0 %v9049_v30 }
0x10b9   :  { %8313 = vmatprep.subr.bf16.mxu0 %v8934_v3 }
0x1186   :  { %v1554_v20 = vpop.f32.mrb[18].mxu0 }
0x1187   :  { %v1555_v21 = vadd.f32 %v9023_v15, %v1554_v20  ;;  %v7465_v7 = vpop.f32.mrb[19].mxu0  ;;  %v1961_v20 = vstv %s1955_s5 }
0x1189   :  { %v1558_v23 = vsub.f32 0.0, %v1555_v21 }
0x118b   :  { %v1559_v24 = vmul.f32 1.442695, %v1558_v23 }
0x118d   :  { %8737 = vpow2.f32 %v1559_v24 }
0x1197   :  { %v8738_v25 = vpop.eup %8737 }
0x1198   :  { %v1561_v26 = vadd.f32 1.0, %v8738_v25 }
0x119a   :  { %8739 = vrcp.f32 %v1561_v26 }
0x11a4   :  { %v8740_v28 = vpop.eup %8739 }
0x11a5   :  { %v1563_v29 = vmul.f32 %v8740_v28, %v1555_v21 }
0x11a7   :  { %7475 = vmatmul.mubr.msk.f32.vlgmr.msra.gmra.mrb[18].mxu1 %vm50_vm2, %v1563_v29 }
0x11a8   :  { %8309 = vmatpush3.bf16.msra.mxu1 %v8970_v4  ;;  %7496 = vmatprep.mubr.msk.f32.mxu1 %vm8935_vm0, %v8936_v6 }
0x11a9   :  { %8310 = vmatprep.subr.bf16.mxu1 %v8934_v3 }
0x11ac   :  { %8312 = vmatpush3.bf16.msra.mxu1 %v8991_v8 }
0x11ad   :  { %8319 = vmatprep.subr.bf16.mxu1 %v8934_v3 }
0x127a   :  { %v1633_v32 = vpop.f32.mrb[18].mxu1 }
0x127b   :  { %v1634_v33 = vadd.f32 %v9056_v31, %v1633_v32  ;;  %v7476_v34 = vpop.f32.mrb[19].mxu1 }
0x127d   :  { %v1637_v35 = vsub.f32 0.0, %v1634_v33 }
0x127f   :  { %v1638_v36 = vmul.f32 1.442695, %v1637_v35 }
0x1281   :  { %8741 = vpow2.f32 %v1638_v36 }
0x128b   :  { %v8742_v37 = vpop.eup %8741 }
0x128c   :  { %v1640_v38 = vadd.f32 1.0, %v8742_v37 }
0x128e   :  { %8743 = vrcp.f32 %v1640_v38 }
0x1298   :  { %v8744_v39 = vpop.eup %8743 }
0x1299   :  { %v1642_v40 = vmul.f32 %v8744_v39, %v1634_v33 }
0x129b   :  { %7486 = vmatmul.mubr.msk.f32.vlgmr.msra.gmra.mrb[20].mxu0 %vm50_vm2, %v1642_v40 }
0x129c   :  { %8315 = vmatpush3.bf16.msra.mxu0 %v9006_v11  ;;  %7507 = vmatprep.mubr.msk.f32.mxu0 %vm8935_vm0, %v8936_v6 }
0x129d   :  { %8316 = vmatprep.subr.bf16.mxu0 %v8934_v3 }
0x12a0   :  { %8318 = vmatpush3.bf16.msra.mxu0 %v9016_v14 }
0x12a1   :  { %8325 = vmatprep.subr.bf16.mxu0 %v8934_v3 }
0x136e   :  { %v1712_v42 = vpop.f32.mrb[20].mxu0 }
0x136f   :  { %v1713_v44 = vadd.f32 %v9077_v41, %v1712_v42  ;;  %v7487_v45 = vpop.f32.mrb[21].mxu0 }
0x1371   :  { %v1716_v48 = vmul.f32 %v1713_v44, %v1481_v12 }
0x1373   :  { %v1718_v51 = vmul.f32 %v1717_v46, %v1716_v48  ;;  %v1958_v52 = vmul.f32 2.0, %v1716_v48 }
0x1375   :  { %v1719_v53 = vadd.f32 %v1718_v51, %v9173_v22  ;;  %v1959_v47 = vadd.f32 %v1958_v52, %v1957_v50  ;;  %v2200_v50 = vstv %s2198_s10 }
0x1377   :  { %7497 = vmatmul.mubr.msk.f32.vlgmr.msra.gmra.mrb[20].mxu1 %vm50_vm2, %v1719_v53 }
0x1378   :  { %8321 = vmatpush3.bf16.msra.mxu1 %v9039_v27  ;;  %7518 = vmatprep.mubr.msk.f32.mxu1 %vm8935_vm0, %v8936_v6 }
0x1379   :  { %8322 = vmatprep.subr.bf16.mxu1 %v8934_v3 }
0x137c   :  { %8324 = vmatpush3.bf16.msra.mxu1 %v9049_v30 }
0x137d   :  { %8331 = vmatprep.subr.bf16.mxu1 %v8934_v3 }
0x144a   :  { %v1789_v54 = vpop.f32.mrb[20].mxu1 }
0x144b   :  { %v1790_v49 = vadd.f32 %v9023_v15, %v1789_v54  ;;  %v7498_v55 = vpop.f32.mrb[21].mxu1 }
0x144d   :  { %v1793_v56 = vsub.f32 0.0, %v1790_v49 }
0x144f   :  { %v1794_v57 = vmul.f32 1.442695, %v1793_v56 }
0x1451   :  { %8745 = vpow2.f32 %v1794_v57 }
0x145b   :  { %v8746_v58 = vpop.eup %8745 }
0x145c   :  { %v1796_v59 = vadd.f32 1.0, %v8746_v58 }
0x145e   :  { %8747 = vrcp.f32 %v1796_v59 }
0x1468   :  { %v8748_v60 = vpop.eup %8747 }
0x1469   :  { %v1798_v61 = vmul.f32 %v8748_v60, %v1790_v49 }
0x146b   :  { %7508 = vmatmul.mubr.msk.f32.vlgmr.msra.gmra.mrb[22].mxu0 %vm50_vm2, %v1798_v61 }
0x146c   :  { %8327 = vmatpush3.bf16.msra.mxu0 %v8970_v4  ;;  %7529 = vmatprep.mubr.msk.f32.mxu0 %vm8935_vm0, %v8936_v6 }
0x146d   :  { %8328 = vmatprep.subr.bf16.mxu0 %v8934_v3 }
0x1470   :  { %8330 = vmatpush3.bf16.msra.mxu0 %v8991_v8 }
0x1471   :  { %8337 = vmatprep.subr.bf16.mxu0 %v8934_v3 }
0x153e   :  { %v1868_v62 = vpop.f32.mrb[22].mxu0 }
0x153f   :  { %v1869_v63 = vadd.f32 %v9056_v31, %v1868_v62  ;;  %v7509_v0 = vpop.f32.mrb[23].mxu0 }
0x1541   :  { %v1872_v1 = vsub.f32 0.0, %v1869_v63 }
0x1543   :  { %v1873_v2 = vmul.f32 1.442695, %v1872_v1 }
0x1545   :  { %8749 = vpow2.f32 %v1873_v2 }
0x154f   :  { %v8750_v5 = vpop.eup %8749 }
0x1550   :  { %v1875_v9 = vadd.f32 1.0, %v8750_v5 }
0x1552   :  { %8751 = vrcp.f32 %v1875_v9 }
0x155c   :  { %v8752_v10 = vpop.eup %8751 }
0x155d   :  { %v1877_v12 = vmul.f32 %v8752_v10, %v1869_v63 }
0x155f   :  { %7519 = vmatmul.mubr.msk.f32.vlgmr.msra.gmra.mrb[22].mxu1 %vm50_vm2, %v1877_v12  ;;  %v2434_v12 = vstv %s9374_s11 }
0x1560   :  { %8333 = vmatpush3.bf16.msra.mxu1 %v9006_v11  ;;  %7540 = vmatprep.mubr.msk.f32.mxu1 %vm8935_vm0, %v8936_v6 }
0x1561   :  { %8334 = vmatprep.subr.bf16.mxu1 %v8934_v3 }
0x1564   :  { %8336 = vmatpush3.bf16.msra.mxu1 %v9016_v14 }
0x1565   :  { %8343 = vmatprep.subr.bf16.mxu1 %v8934_v3 }
0x1632   :  { %v1947_v13 = vpop.f32.mrb[22].mxu1 }
0x1633   :  { %v1948_v17 = vadd.f32 %v9077_v41, %v1947_v13  ;;  %v7520_v18 = vpop.f32.mrb[23].mxu1 }
0x1635   :  { %v1952_v19 = vmul.f32 %v1951_v16, %v1948_v17 }
0x1637   :  { %v1960_v21 = vadd.f32 %v1959_v47, %v1952_v19 }
0x1639   :  { %v1962_v7 = vmul.f32 %v1961_v20, %v1960_v21  ;;  %v9389_v21 = vld [vmem:[%s9975_s2 + $0x20] ss:$0 sm:$0xff] }
0x163b   :  { %v9303_v23 = vadd.f32 %v1962_v7, %v9173_v22 }
0x163d   :  { %6732 = vst.msk [vmem:[%s9976_s3 + $0x10] sm:$0xff] %vm6729_vm1, %v9303_v23  ;;  %7530 = vmatmul.mubr.msk.f32.vlgmr.msra.gmra.mrb[24].mxu0 %vm50_vm2, %v9303_v23 }
0x163e   :  { %8339 = vmatpush3.bf16.msra.mxu0 %v9039_v27  ;;  %7551 = vmatprep.mubr.msk.f32.mxu0 %vm8935_vm0, %v8936_v6 }
0x163f   :  { %8340 = vmatprep.subr.bf16.mxu0 %v8934_v3 }
0x1642   :  { %8342 = vmatpush3.bf16.msra.mxu0 %v9049_v30 }
0x1643   :  { %8349 = vmatprep.subr.bf16.mxu0 %v8934_v3 }
0x1710   :  { %v2035_v22 = vpop.f32.mrb[24].mxu0 }
0x1711   :  { %v2036_v24 = vadd.f32 %v9023_v15, %v2035_v22  ;;  %v7531_v25 = vpop.f32.mrb[25].mxu0 }
0x1713   :  { %v2039_v26 = vsub.f32 0.0, %v2036_v24 }
0x1715   :  { %v2040_v28 = vmul.f32 1.442695, %v2039_v26 }
0x1717   :  { %8753 = vpow2.f32 %v2040_v28 }
0x1721   :  { %v8754_v29 = vpop.eup %8753 }
0x1722   :  { %v2042_v32 = vadd.f32 1.0, %v8754_v29 }
0x1724   :  { %8755 = vrcp.f32 %v2042_v32 }
0x172e   :  { %v8756_v33 = vpop.eup %8755 }
0x172f   :  { %v2044_v34 = vmul.f32 %v8756_v33, %v2036_v24 }
0x1731   :  { %7541 = vmatmul.mubr.msk.f32.vlgmr.msra.gmra.mrb[24].mxu1 %vm50_vm2, %v2044_v34 }
0x1732   :  { %8345 = vmatpush3.bf16.msra.mxu1 %v8970_v4  ;;  %7562 = vmatprep.mubr.msk.f32.mxu1 %vm8935_vm0, %v8936_v6 }
0x1733   :  { %8346 = vmatprep.subr.bf16.mxu1 %v8934_v3 }
0x1736   :  { %8348 = vmatpush3.bf16.msra.mxu1 %v8991_v8 }
0x1737   :  { %8355 = vmatprep.subr.bf16.mxu1 %v8934_v3 }
0x1804   :  { %v2114_v35 = vpop.f32.mrb[24].mxu1 }
0x1805   :  { %v2115_v36 = vadd.f32 %v9056_v31, %v2114_v35  ;;  %v7542_v37 = vpop.f32.mrb[25].mxu1 }
0x1807   :  { %v2118_v38 = vsub.f32 0.0, %v2115_v36 }
0x1809   :  { %v2119_v39 = vmul.f32 1.442695, %v2118_v38 }
0x180b   :  { %8757 = vpow2.f32 %v2119_v39 }
0x1815   :  { %v8758_v40 = vpop.eup %8757 }
0x1816   :  { %v2121_v42 = vadd.f32 1.0, %v8758_v40 }
0x1818   :  { %8759 = vrcp.f32 %v2121_v42 }
0x1822   :  { %v8760_v43 = vpop.eup %8759 }
0x1823   :  { %v2123_v44 = vmul.f32 %v8760_v43, %v2115_v36 }
0x1825   :  { %7552 = vmatmul.mubr.msk.f32.vlgmr.msra.gmra.mrb[26].mxu0 %vm50_vm2, %v2123_v44 }
0x1826   :  { %8351 = vmatpush3.bf16.msra.mxu0 %v9006_v11  ;;  %7573 = vmatprep.mubr.msk.f32.mxu0 %vm8935_vm0, %v8936_v6 }
0x1827   :  { %8352 = vmatprep.subr.bf16.mxu0 %v8934_v3 }
0x182a   :  { %8354 = vmatpush3.bf16.msra.mxu0 %v9016_v14 }
0x182b   :  { %8361 = vmatprep.subr.bf16.mxu0 %v8934_v3 }
0x18f8   :  { %v2193_v45 = vpop.f32.mrb[26].mxu0 }
0x18f9   :  { %v2194_v46 = vadd.f32 %v9077_v41, %v2193_v45  ;;  %v7553_v48 = vpop.f32.mrb[27].mxu0 }
0x18fb   :  { %v9344_v51 = vmul.f32 %v2194_v46, %v1951_v16  ;;  %v2670_v46 = vstv %s9338_s9 }
0x18fd   :  { %v2201_v52 = vmul.f32 %v2200_v50, %v9344_v51 }
0x18ff   :  { %v2202_v53 = vadd.f32 %v2201_v52, %v9303_v23 }
0x1901   :  { %7563 = vmatmul.mubr.msk.f32.vlgmr.msra.gmra.mrb[26].mxu1 %vm50_vm2, %v2202_v53 }
0x1902   :  { %8357 = vmatpush3.bf16.msra.mxu1 %v9039_v27  ;;  %7584 = vmatprep.mubr.msk.f32.mxu1 %vm8935_vm0, %v8936_v6 }
0x1903   :  { %8358 = vmatprep.subr.bf16.mxu1 %v8934_v3 }
0x1906   :  { %8360 = vmatpush3.bf16.msra.mxu1 %v9049_v30 }
0x1907   :  { %8367 = vmatprep.subr.bf16.mxu1 %v8934_v3 }
0x19d4   :  { %v2272_v47 = vpop.f32.mrb[26].mxu1 }
0x19d5   :  { %v2273_v54 = vadd.f32 %v9023_v15, %v2272_v47  ;;  %v7564_v49 = vpop.f32.mrb[27].mxu1 }
0x19d7   :  { %v2276_v55 = vsub.f32 0.0, %v2273_v54 }
0x19d9   :  { %v2277_v56 = vmul.f32 1.442695, %v2276_v55 }
0x19db   :  { %8761 = vpow2.f32 %v2277_v56 }
0x19e5   :  { %v8762_v57 = vpop.eup %8761 }
0x19e6   :  { %v2279_v58 = vadd.f32 1.0, %v8762_v57 }
0x19e8   :  { %8763 = vrcp.f32 %v2279_v58 }
0x19f2   :  { %v8764_v59 = vpop.eup %8763 }
0x19f3   :  { %v2281_v60 = vmul.f32 %v8764_v59, %v2273_v54 }
0x19f5   :  { %7574 = vmatmul.mubr.msk.f32.vlgmr.msra.gmra.mrb[28].mxu0 %vm50_vm2, %v2281_v60 }
0x19f6   :  { %8363 = vmatpush3.bf16.msra.mxu0 %v8970_v4  ;;  %7595 = vmatprep.mubr.msk.f32.mxu0 %vm8935_vm0, %v8936_v6 }
0x19f7   :  { %8364 = vmatprep.subr.bf16.mxu0 %v8934_v3 }
0x19fa   :  { %8366 = vmatpush3.bf16.msra.mxu0 %v8991_v8 }
0x19fb   :  { %8373 = vmatprep.subr.bf16.mxu0 %v8934_v3 }
0x1ac8   :  { %v2351_v15 = vpop.f32.mrb[28].mxu0 }
0x1ac9   :  { %v2352_v61 = vadd.f32 %v9056_v31, %v2351_v15  ;;  %v7575_v62 = vpop.f32.mrb[29].mxu0 }
0x1acb   :  { %v2355_v63 = vsub.f32 0.0, %v2352_v61 }
0x1acd   :  { %v2356_v0 = vmul.f32 1.442695, %v2355_v63 }
0x1acf   :  { %8765 = vpow2.f32 %v2356_v0 }
0x1ad9   :  { %v8766_v1 = vpop.eup %8765 }
0x1ada   :  { %v2358_v2 = vadd.f32 1.0, %v8766_v1 }
0x1adc   :  { %8767 = vrcp.f32 %v2358_v2 }
0x1ae6   :  { %v8768_v5 = vpop.eup %8767 }
0x1ae7   :  { %v2360_v9 = vmul.f32 %v8768_v5, %v2352_v61  ;;  %v9429_v61 = vld [vmem:[%s9975_s2 + $0x48] ss:$0 sm:$0xff] }
0x1ae9   :  { %7585 = vmatmul.mubr.msk.f32.vlgmr.msra.gmra.mrb[28].mxu1 %vm50_vm2, %v2360_v9 }
0x1aea   :  { %8369 = vmatpush3.bf16.msra.mxu1 %v9006_v11  ;;  %7606 = vmatprep.mubr.msk.f32.mxu1 %vm8935_vm0, %v8936_v6 }
0x1aeb   :  { %8370 = vmatprep.subr.bf16.mxu1 %v8934_v3 }
0x1aee   :  { %8372 = vmatpush3.bf16.msra.mxu1 %v9016_v14 }
0x1aef   :  { %8379 = vmatprep.subr.bf16.mxu1 %v8934_v3 }
0x1bbc   :  { %v2430_v10 = vpop.f32.mrb[28].mxu1 }
0x1bbd   :  { %v2431_v13 = vadd.f32 %v9077_v41, %v2430_v10  ;;  %v7586_v16 = vpop.f32.mrb[29].mxu1 }
0x1bbe   :  { %v9444_v16 = vld [vmem:[%s9975_s2 + $0x70] ss:$0 sm:$0xff] }
0x1bbf   :  { %v2435_v17 = vmul.f32 %v2434_v12, %v2431_v13  ;;  %v2904_v13 = vstv %s9334_s8  ;;  %s5057_s8 = smul.f32 0.5, %s9743_s7 }
0x1bc1   :  { %v2436_v18 = vmul.f32 %v2435_v17, %v2200_v50  ;;  %v2909_v43 = vmul.f32 2.0, %v2435_v17  ;;  %s9784_s11 = sadd.f32 %s9609_s27, %s5057_s8 }
0x1bc3   :  { %v2437_v19 = vadd.f32 %v2436_v18, %v9303_v23  ;;  %v2910_v50 = vadd.f32 %v2909_v43, %v9344_v51 }
0x1bc5   :  { %7596 = vmatmul.mubr.msk.f32.vlgmr.msra.gmra.mrb[30].mxu0 %vm50_vm2, %v2437_v19 }
0x1bc6   :  { %8375 = vmatpush3.bf16.msra.mxu0 %v9039_v27  ;;  %7617 = vmatprep.mubr.msk.f32.mxu0 %vm8935_vm0, %v8936_v6 }
0x1bc7   :  { %8376 = vmatprep.subr.bf16.mxu0 %v8934_v3 }
0x1bca   :  { %8378 = vmatpush3.bf16.msra.mxu0 %v9049_v30 }
0x1bcb   :  { %8385 = vmatprep.subr.bf16.mxu0 %v8934_v3 }
0x1c98   :  { %v2507_v20 = vpop.f32.mrb[30].mxu0 }
0x1c99   :  { %v2508_v7 = vadd.f32 %v9389_v21, %v2507_v20  ;;  %v7597_v22 = vpop.f32.mrb[31].mxu0  ;;  %v2914_v20 = vstv %s2908_s16 }
0x1c9b   :  { %v2511_v24 = vsub.f32 0.0, %v2508_v7 }
0x1c9d   :  { %v2512_v25 = vmul.f32 1.442695, %v2511_v24 }
0x1c9f   :  { %8769 = vpow2.f32 %v2512_v25 }
0x1ca9   :  { %v8770_v26 = vpop.eup %8769 }
0x1caa   :  { %v2514_v28 = vadd.f32 1.0, %v8770_v26 }
0x1cac   :  { %8771 = vrcp.f32 %v2514_v28 }
0x1cb6   :  { %v8772_v29 = vpop.eup %8771 }
0x1cb7   :  { %v2516_v32 = vmul.f32 %v8772_v29, %v2508_v7 }
0x1cb9   :  { %7607 = vmatmul.mubr.msk.f32.vlgmr.msra.gmra.mrb[30].mxu1 %vm50_vm2, %v2516_v32 }
0x1cba   :  { %8381 = vmatpush3.bf16.msra.mxu1 %v8970_v4  ;;  %7628 = vmatprep.mubr.msk.f32.mxu1 %vm8935_vm0, %v8936_v6 }
0x1cbb   :  { %8382 = vmatprep.subr.bf16.mxu1 %v8934_v3 }
0x1cbe   :  { %8384 = vmatpush3.bf16.msra.mxu1 %v8991_v8 }
0x1cbf   :  { %8391 = vmatprep.subr.bf16.mxu1 %v8934_v3 }
0x1d8c   :  { %v2586_v33 = vpop.f32.mrb[30].mxu1 }
0x1d8d   :  { %v2587_v34 = vadd.f32 %v9056_v31, %v2586_v33  ;;  %v7608_v35 = vpop.f32.mrb[31].mxu1 }
0x1d8f   :  { %v2590_v36 = vsub.f32 0.0, %v2587_v34 }
0x1d91   :  { %v2591_v37 = vmul.f32 1.442695, %v2590_v36 }
0x1d93   :  { %8773 = vpow2.f32 %v2591_v37 }
0x1d9d   :  { %v8774_v38 = vpop.eup %8773 }
0x1d9e   :  { %v2593_v39 = vadd.f32 1.0, %v8774_v38 }
0x1da0   :  { %8775 = vrcp.f32 %v2593_v39 }
0x1daa   :  { %v8776_v40 = vpop.eup %8775 }
0x1dab   :  { %v2595_v42 = vmul.f32 %v8776_v40, %v2587_v34 }
0x1dad   :  { %7618 = vmatmul.mubr.msk.f32.vlgmr.msra.gmra.mrb[32].mxu0 %vm50_vm2, %v2595_v42 }
0x1dae   :  { %8387 = vmatpush3.bf16.msra.mxu0 %v9006_v11  ;;  %7639 = vmatprep.mubr.msk.f32.mxu0 %vm8935_vm0, %v8936_v6 }
0x1daf   :  { %8388 = vmatprep.subr.bf16.mxu0 %v8934_v3 }
0x1db2   :  { %8390 = vmatpush3.bf16.msra.mxu0 %v9016_v14 }
0x1db3   :  { %8397 = vmatprep.subr.bf16.mxu0 %v8934_v3 }
0x1e80   :  { %v2665_v31 = vpop.f32.mrb[32].mxu0 }
0x1e81   :  { %v2666_v44 = vadd.f32 %v9077_v41, %v2665_v31  ;;  %v7619_v45 = vpop.f32.mrb[33].mxu0 }
0x1e83   :  { %v2669_v48 = vmul.f32 %v2666_v44, %v2434_v12 }
0x1e85   :  { %v2671_v52 = vmul.f32 %v2670_v46, %v2669_v48  ;;  %v2911_v53 = vmul.f32 2.0, %v2669_v48 }
0x1e87   :  { %v2672_v47 = vadd.f32 %v2671_v52, %v9303_v23  ;;  %v2912_v54 = vadd.f32 %v2911_v53, %v2910_v50  ;;  %v3153_v50 = vstv %s3151_s22 }
0x1e89   :  { %7629 = vmatmul.mubr.msk.f32.vlgmr.msra.gmra.mrb[32].mxu1 %vm50_vm2, %v2672_v47 }
0x1e8a   :  { %8393 = vmatpush3.bf16.msra.mxu1 %v9039_v27  ;;  %7650 = vmatprep.mubr.msk.f32.mxu1 %vm8935_vm0, %v8936_v6 }
0x1e8b   :  { %8394 = vmatprep.subr.bf16.mxu1 %v8934_v3 }
0x1e8e   :  { %8396 = vmatpush3.bf16.msra.mxu1 %v9049_v30 }
0x1e8f   :  { %8403 = vmatprep.subr.bf16.mxu1 %v8934_v3 }
0x1f5c   :  { %v2742_v41 = vpop.f32.mrb[32].mxu1 }
0x1f5d   :  { %v2743_v51 = vadd.f32 %v9389_v21, %v2742_v41  ;;  %v7630_v49 = vpop.f32.mrb[33].mxu1 }
0x1f5f   :  { %v2746_v55 = vsub.f32 0.0, %v2743_v51 }
0x1f61   :  { %v2747_v56 = vmul.f32 1.442695, %v2746_v55 }
0x1f63   :  { %8777 = vpow2.f32 %v2747_v56 }
0x1f6d   :  { %v8778_v57 = vpop.eup %8777 }
0x1f6e   :  { %v2749_v58 = vadd.f32 1.0, %v8778_v57 }
0x1f70   :  { %8779 = vrcp.f32 %v2749_v58 }
0x1f7a   :  { %v8780_v59 = vpop.eup %8779 }
0x1f7b   :  { %v2751_v60 = vmul.f32 %v8780_v59, %v2743_v51 }
0x1f7d   :  { %7640 = vmatmul.mubr.msk.f32.vlgmr.msra.gmra.mrb[34].mxu0 %vm50_vm2, %v2751_v60 }
0x1f7e   :  { %8399 = vmatpush3.bf16.msra.mxu0 %v8970_v4  ;;  %7661 = vmatprep.mubr.msk.f32.mxu0 %vm8935_vm0, %v8936_v6 }
0x1f7f   :  { %8400 = vmatprep.subr.bf16.mxu0 %v8934_v3 }
0x1f82   :  { %8402 = vmatpush3.bf16.msra.mxu0 %v8991_v8 }
0x1f83   :  { %8409 = vmatprep.subr.bf16.mxu0 %v8934_v3 }
0x2050   :  { %v2821_v15 = vpop.f32.mrb[34].mxu0 }
0x2051   :  { %v2822_v62 = vadd.f32 %v9429_v61, %v2821_v15  ;;  %v7641_v63 = vpop.f32.mrb[35].mxu0 }
0x2053   :  { %v2825_v0 = vsub.f32 0.0, %v2822_v62 }
0x2055   :  { %v2826_v1 = vmul.f32 1.442695, %v2825_v0 }
0x2057   :  { %8781 = vpow2.f32 %v2826_v1 }
0x2061   :  { %v8782_v2 = vpop.eup %8781 }
0x2062   :  { %v2828_v5 = vadd.f32 1.0, %v8782_v2 }
0x2064   :  { %8783 = vrcp.f32 %v2828_v5 }
0x206e   :  { %v8784_v9 = vpop.eup %8783 }
0x206f   :  { %v2830_v10 = vmul.f32 %v8784_v9, %v2822_v62 }
0x2071   :  { %7651 = vmatmul.mubr.msk.f32.vlgmr.msra.gmra.mrb[34].mxu1 %vm50_vm2, %v2830_v10 }
0x2072   :  { %8405 = vmatpush3.bf16.msra.mxu1 %v9006_v11  ;;  %7672 = vmatprep.mubr.msk.f32.mxu1 %vm8935_vm0, %v8936_v6 }
0x2073   :  { %8406 = vmatprep.subr.bf16.mxu1 %v8934_v3 }
0x2076   :  { %8408 = vmatpush3.bf16.msra.mxu1 %v9016_v14 }
0x2077   :  { %8415 = vmatprep.subr.bf16.mxu1 %v8934_v3 }
0x2144   :  { %v2900_v12 = vpop.f32.mrb[34].mxu1 }
0x2145   :  { %v2901_v17 = vadd.f32 %v9444_v16, %v2900_v12  ;;  %v7652_v18 = vpop.f32.mrb[35].mxu1  ;;  %v3387_v12 = vstv %s9519_s23 }
0x2147   :  { %v2905_v19 = vmul.f32 %v2904_v13, %v2901_v17 }
0x2149   :  { %v2913_v7 = vadd.f32 %v2912_v54, %v2905_v19 }
0x214b   :  { %v2915_v22 = vmul.f32 %v2914_v20, %v2913_v7 }
0x214d   :  { %v9448_v24 = vadd.f32 %v2915_v22, %v9303_v23 }
0x214f   :  { %6733 = vst.msk [vmem:[%s9976_s3 + $0x18] sm:$0xff] %vm6729_vm1, %v9448_v24  ;;  %7662 = vmatmul.mubr.msk.f32.vlgmr.msra.gmra.mrb[36].mxu0 %vm50_vm2, %v9448_v24 }
0x2150   :  { %8411 = vmatpush3.bf16.msra.mxu0 %v9039_v27  ;;  %7683 = vmatprep.mubr.msk.f32.mxu0 %vm8935_vm0, %v8936_v6 }
0x2151   :  { %8412 = vmatprep.subr.bf16.mxu0 %v8934_v3 }
0x2154   :  { %8414 = vmatpush3.bf16.msra.mxu0 %v9049_v30 }
0x2155   :  { %8421 = vmatprep.subr.bf16.mxu0 %v8934_v3 }
0x2222   :  { %v2988_v23 = vpop.f32.mrb[36].mxu0 }
0x2223   :  { %v2989_v25 = vadd.f32 %v9389_v21, %v2988_v23  ;;  %v7663_v26 = vpop.f32.mrb[37].mxu0 }
0x2225   :  { %v2992_v28 = vsub.f32 0.0, %v2989_v25 }
0x2227   :  { %v2993_v29 = vmul.f32 1.442695, %v2992_v28 }
0x2229   :  { %8785 = vpow2.f32 %v2993_v29 }
0x2233   :  { %v8786_v32 = vpop.eup %8785 }
0x2234   :  { %v2995_v33 = vadd.f32 1.0, %v8786_v32 }
0x2236   :  { %8787 = vrcp.f32 %v2995_v33 }
0x2240   :  { %v8788_v34 = vpop.eup %8787 }
0x2241   :  { %v2997_v35 = vmul.f32 %v8788_v34, %v2989_v25 }
0x2243   :  { %7673 = vmatmul.mubr.msk.f32.vlgmr.msra.gmra.mrb[36].mxu1 %vm50_vm2, %v2997_v35 }
0x2244   :  { %8417 = vmatpush3.bf16.msra.mxu1 %v8970_v4  ;;  %7694 = vmatprep.mubr.msk.f32.mxu1 %vm8935_vm0, %v8936_v6 }
0x2245   :  { %8418 = vmatprep.subr.bf16.mxu1 %v8934_v3 }
0x2248   :  { %8420 = vmatpush3.bf16.msra.mxu1 %v8991_v8 }
0x2249   :  { %8427 = vmatprep.subr.bf16.mxu1 %v8934_v3 }
0x2316   :  { %v3067_v36 = vpop.f32.mrb[36].mxu1 }
0x2317   :  { %v3068_v37 = vadd.f32 %v9429_v61, %v3067_v36  ;;  %v7674_v38 = vpop.f32.mrb[37].mxu1 }
0x2319   :  { %v3071_v39 = vsub.f32 0.0, %v3068_v37 }
0x231b   :  { %v3072_v40 = vmul.f32 1.442695, %v3071_v39 }
0x231d   :  { %8789 = vpow2.f32 %v3072_v40 }
0x2327   :  { %v8790_v42 = vpop.eup %8789 }
0x2328   :  { %v3074_v31 = vadd.f32 1.0, %v8790_v42 }
0x232a   :  { %8791 = vrcp.f32 %v3074_v31 }
0x2334   :  { %v8792_v43 = vpop.eup %8791 }
0x2335   :  { %v3076_v44 = vmul.f32 %v8792_v43, %v3068_v37 }
0x2337   :  { %7684 = vmatmul.mubr.msk.f32.vlgmr.msra.gmra.mrb[38].mxu0 %vm50_vm2, %v3076_v44 }
0x2338   :  { %8423 = vmatpush3.bf16.msra.mxu0 %v9006_v11  ;;  %7705 = vmatprep.mubr.msk.f32.mxu0 %vm8935_vm0, %v8936_v6 }
0x2339   :  { %8424 = vmatprep.subr.bf16.mxu0 %v8934_v3 }
0x233c   :  { %8426 = vmatpush3.bf16.msra.mxu0 %v9016_v14 }
0x233d   :  { %8433 = vmatprep.subr.bf16.mxu0 %v8934_v3 }
0x240a   :  { %v3146_v45 = vpop.f32.mrb[38].mxu0 }
0x240b   :  { %v3147_v46 = vadd.f32 %v9444_v16, %v3146_v45  ;;  %v7685_v48 = vpop.f32.mrb[39].mxu0 }
0x240c   :  { %v3623_v48 = vstv %s9483_s21  ;;  %s6720_s21 = smul.f32 0.16666667, %s9888_s19 }
0x240d   :  { %v9489_v52 = vmul.f32 %v3147_v46, %v2904_v13 }
0x240f   :  { %v3154_v53 = vmul.f32 %v3153_v50, %v9489_v52 }
0x2411   :  { %v3155_v47 = vadd.f32 %v3154_v53, %v9448_v24 }
0x2413   :  { %7695 = vmatmul.mubr.msk.f32.vlgmr.msra.gmra.mrb[38].mxu1 %vm50_vm2, %v3155_v47 }
0x2414   :  { %8429 = vmatpush3.bf16.msra.mxu1 %v9039_v27  ;;  %7716 = vmatprep.mubr.msk.f32.mxu1 %vm8935_vm0, %v8936_v6 }
0x2415   :  { %8430 = vmatprep.subr.bf16.mxu1 %v8934_v3 }
0x2418   :  { %8432 = vmatpush3.bf16.msra.mxu1 %v9049_v30 }
0x2419   :  { %8439 = vmatprep.subr.bf16.mxu1 %v8934_v3 }
0x24e6   :  { %v3225_v54 = vpop.f32.mrb[38].mxu1 }
0x24e7   :  { %v3226_v41 = vadd.f32 %v9389_v21, %v3225_v54  ;;  %v7696_v51 = vpop.f32.mrb[39].mxu1 }
0x24e9   :  { %v3229_v49 = vsub.f32 0.0, %v3226_v41 }
0x24eb   :  { %v3230_v55 = vmul.f32 1.442695, %v3229_v49 }
0x24ed   :  { %8793 = vpow2.f32 %v3230_v55 }
0x24f7   :  { %v8794_v56 = vpop.eup %8793 }
0x24f8   :  { %v3232_v57 = vadd.f32 1.0, %v8794_v56 }
0x24fa   :  { %8795 = vrcp.f32 %v3232_v57 }
0x2504   :  { %v8796_v58 = vpop.eup %8795 }
0x2505   :  { %v3234_v59 = vmul.f32 %v8796_v58, %v3226_v41 }
0x2507   :  { %7706 = vmatmul.mubr.msk.f32.vlgmr.msra.gmra.mrb[40].mxu0 %vm50_vm2, %v3234_v59 }
0x2508   :  { %8435 = vmatpush3.bf16.msra.mxu0 %v8970_v4  ;;  %7727 = vmatprep.mubr.msk.f32.mxu0 %vm8935_vm0, %v8936_v6 }
0x2509   :  { %8436 = vmatprep.subr.bf16.mxu0 %v8934_v3 }
0x250c   :  { %8438 = vmatpush3.bf16.msra.mxu0 %v8991_v8 }
0x250d   :  { %8445 = vmatprep.subr.bf16.mxu0 %v8934_v3 }
0x25da   :  { %v3304_v60 = vpop.f32.mrb[40].mxu0 }
0x25db   :  { %v3305_v15 = vadd.f32 %v9429_v61, %v3304_v60  ;;  %v7707_v62 = vpop.f32.mrb[41].mxu0 }
0x25dd   :  { %v3308_v63 = vsub.f32 0.0, %v3305_v15 }
0x25df   :  { %v3309_v0 = vmul.f32 1.442695, %v3308_v63 }
0x25e1   :  { %8797 = vpow2.f32 %v3309_v0 }
0x25eb   :  { %v8798_v1 = vpop.eup %8797 }
0x25ec   :  { %v3311_v2 = vadd.f32 1.0, %v8798_v1 }
0x25ee   :  { %8799 = vrcp.f32 %v3311_v2 }
0x25f8   :  { %v8800_v5 = vpop.eup %8799 }
0x25f9   :  { %v3313_v9 = vmul.f32 %v8800_v5, %v3305_v15 }
0x25fb   :  { %7717 = vmatmul.mubr.msk.f32.vlgmr.msra.gmra.mrb[40].mxu1 %vm50_vm2, %v3313_v9 }
0x25fc   :  { %8441 = vmatpush3.bf16.msra.mxu1 %v9006_v11  ;;  %7738 = vmatprep.mubr.msk.f32.mxu1 %vm8935_vm0, %v8936_v6 }
0x25fd   :  { %8442 = vmatprep.subr.bf16.mxu1 %v8934_v3 }
0x2600   :  { %8444 = vmatpush3.bf16.msra.mxu1 %v9016_v14 }
0x2601   :  { %8451 = vmatprep.subr.bf16.mxu1 %v8934_v3 }
0x26ce   :  { %v3383_v10 = vpop.f32.mrb[40].mxu1 }
0x26cf   :  { %v3384_v13 = vadd.f32 %v9444_v16, %v3383_v10  ;;  %v7718_v17 = vpop.f32.mrb[41].mxu1 }
0x26d0   :  { %v3857_v17 = vstv %s9479_s0  ;;  %s9924_s0 = sadd.f32 %s9739_s6, %s6010_s20 }
0x26d1   :  { %v3388_v18 = vmul.f32 %v3387_v12, %v3384_v13 }
0x26d3   :  { %v3389_v19 = vmul.f32 %v3388_v18, %v3153_v50  ;;  %v3862_v44 = vmul.f32 2.0, %v3388_v18 }
0x26d5   :  { %v3390_v20 = vadd.f32 %v3389_v19, %v9448_v24  ;;  %v3863_v53 = vadd.f32 %v3862_v44, %v9489_v52 }
0x26d7   :  { %7728 = vmatmul.mubr.msk.f32.vlgmr.msra.gmra.mrb[42].mxu0 %vm50_vm2, %v3390_v20 }
0x26d8   :  { %8447 = vmatpush3.bf16.msra.mxu0 %v9039_v27  ;;  %7749 = vmatprep.mubr.msk.f32.mxu0 %vm8935_vm0, %v8936_v6 }
0x26d9   :  { %8448 = vmatprep.subr.bf16.mxu0 %v8934_v3 }
0x26dc   :  { %8450 = vmatpush3.bf16.msra.mxu0 %v9049_v30 }
0x26dd   :  { %8457 = vmatprep.subr.bf16.mxu0 %v8934_v3 }
0x27aa   :  { %v3460_v7 = vpop.f32.mrb[42].mxu0 }
0x27ab   :  { %v3461_v22 = vadd.f32 %v9389_v21, %v3460_v7  ;;  %v7729_v23 = vpop.f32.mrb[43].mxu0  ;;  %v3867_v7 = vstv %s3861_s24 }
0x27ad   :  { %v3464_v25 = vsub.f32 0.0, %v3461_v22 }
0x27af   :  { %v3465_v26 = vmul.f32 1.442695, %v3464_v25 }
0x27b1   :  { %8801 = vpow2.f32 %v3465_v26 }
0x27bb   :  { %v8802_v28 = vpop.eup %8801 }
0x27bc   :  { %v3467_v29 = vadd.f32 1.0, %v8802_v28 }
0x27be   :  { %8803 = vrcp.f32 %v3467_v29 }
0x27c8   :  { %v8804_v32 = vpop.eup %8803 }
0x27c9   :  { %v3469_v33 = vmul.f32 %v8804_v32, %v3461_v22 }
0x27cb   :  { %7739 = vmatmul.mubr.msk.f32.vlgmr.msra.gmra.mrb[42].mxu1 %vm50_vm2, %v3469_v33 }
0x27cc   :  { %8453 = vmatpush3.bf16.msra.mxu1 %v8970_v4  ;;  %7760 = vmatprep.mubr.msk.f32.mxu1 %vm8935_vm0, %v8936_v6 }
0x27cd   :  { %8454 = vmatprep.subr.bf16.mxu1 %v8934_v3 }
0x27d0   :  { %8456 = vmatpush3.bf16.msra.mxu1 %v8991_v8 }
0x27d1   :  { %8463 = vmatprep.subr.bf16.mxu1 %v8934_v3 }
0x289e   :  { %v3539_v34 = vpop.f32.mrb[42].mxu1 }
0x289f   :  { %v3540_v35 = vadd.f32 %v9429_v61, %v3539_v34  ;;  %v7740_v36 = vpop.f32.mrb[43].mxu1 }
0x28a1   :  { %v3543_v37 = vsub.f32 0.0, %v3540_v35 }
0x28a3   :  { %v3544_v38 = vmul.f32 1.442695, %v3543_v37 }
0x28a5   :  { %8805 = vpow2.f32 %v3544_v38 }
0x28af   :  { %v8806_v39 = vpop.eup %8805 }
0x28b0   :  { %v3546_v40 = vadd.f32 1.0, %v8806_v39 }
0x28b2   :  { %8807 = vrcp.f32 %v3546_v40 }
0x28bc   :  { %v8808_v42 = vpop.eup %8807 }
0x28bd   :  { %v3548_v31 = vmul.f32 %v8808_v42, %v3540_v35 }
0x28bf   :  { %7750 = vmatmul.mubr.msk.f32.vlgmr.msra.gmra.mrb[44].mxu0 %vm50_vm2, %v3548_v31 }
0x28c0   :  { %8459 = vmatpush3.bf16.msra.mxu0 %v9006_v11  ;;  %7771 = vmatprep.mubr.msk.f32.mxu0 %vm8935_vm0, %v8936_v6 }
0x28c1   :  { %8460 = vmatprep.subr.bf16.mxu0 %v8934_v3 }
0x28c4   :  { %8462 = vmatpush3.bf16.msra.mxu0 %v9016_v14 }
0x28c5   :  { %8469 = vmatprep.subr.bf16.mxu0 %v8934_v3 }
0x2992   :  { %v3618_v43 = vpop.f32.mrb[44].mxu0 }
0x2993   :  { %v3619_v45 = vadd.f32 %v9444_v16, %v3618_v43  ;;  %v7751_v46 = vpop.f32.mrb[45].mxu0 }
0x2995   :  { %v3622_v50 = vmul.f32 %v3619_v45, %v3387_v12 }
0x2997   :  { %v3624_v47 = vmul.f32 %v3623_v48, %v3622_v50  ;;  %v3864_v54 = vmul.f32 2.0, %v3622_v50 }
0x2999   :  { %v3625_v41 = vadd.f32 %v3624_v47, %v9448_v24  ;;  %v3865_v51 = vadd.f32 %v3864_v54, %v3863_v53  ;;  %v4106_v53 = vstv %s4104_s28 }
0x299b   :  { %7761 = vmatmul.mubr.msk.f32.vlgmr.msra.gmra.mrb[44].mxu1 %vm50_vm2, %v3625_v41 }
0x299c   :  { %8465 = vmatpush3.bf16.msra.mxu1 %v9039_v27  ;;  %7782 = vmatprep.mubr.msk.f32.mxu1 %vm8935_vm0, %v8936_v6 }
0x299d   :  { %8466 = vmatprep.subr.bf16.mxu1 %v8934_v3 }
0x29a0   :  { %8468 = vmatpush3.bf16.msra.mxu1 %v9049_v30 }
0x29a1   :  { %8475 = vmatprep.subr.bf16.mxu1 %v8934_v3 }
0x2a6e   :  { %v3695_v49 = vpop.f32.mrb[44].mxu1 }
0x2a6f   :  { %v3696_v52 = vadd.f32 %v9389_v21, %v3695_v49  ;;  %v7762_v55 = vpop.f32.mrb[45].mxu1 }
0x2a71   :  { %v3699_v56 = vsub.f32 0.0, %v3696_v52 }
0x2a73   :  { %v3700_v57 = vmul.f32 1.442695, %v3699_v56 }
0x2a75   :  { %8809 = vpow2.f32 %v3700_v57 }
0x2a7f   :  { %v8810_v58 = vpop.eup %8809 }
0x2a80   :  { %v3702_v59 = vadd.f32 1.0, %v8810_v58 }
0x2a82   :  { %8811 = vrcp.f32 %v3702_v59 }
0x2a8c   :  { %v8812_v60 = vpop.eup %8811 }
0x2a8d   :  { %v3704_v15 = vmul.f32 %v8812_v60, %v3696_v52 }
0x2a8f   :  { %7772 = vmatmul.mubr.msk.f32.vlgmr.msra.gmra.mrb[46].mxu0 %vm50_vm2, %v3704_v15 }
0x2a90   :  { %8471 = vmatpush3.bf16.msra.mxu0 %v8970_v4  ;;  %7793 = vmatprep.mubr.msk.f32.mxu0 %vm8935_vm0, %v8936_v6 }
0x2a91   :  { %8472 = vmatprep.subr.bf16.mxu0 %v8934_v3 }
0x2a94   :  { %8474 = vmatpush3.bf16.msra.mxu0 %v8991_v8 }
0x2a95   :  { %8481 = vmatprep.subr.bf16.mxu0 %v8934_v3 }
0x2b62   :  { %v3774_v62 = vpop.f32.mrb[46].mxu0 }
0x2b63   :  { %v3775_v63 = vadd.f32 %v9429_v61, %v3774_v62  ;;  %v7773_v0 = vpop.f32.mrb[47].mxu0 }
0x2b65   :  { %v3778_v1 = vsub.f32 0.0, %v3775_v63 }
0x2b67   :  { %v3779_v2 = vmul.f32 1.442695, %v3778_v1 }
0x2b69   :  { %8813 = vpow2.f32 %v3779_v2 }
0x2b73   :  { %v8814_v5 = vpop.eup %8813 }
0x2b74   :  { %v3781_v9 = vadd.f32 1.0, %v8814_v5 }
0x2b76   :  { %8815 = vrcp.f32 %v3781_v9 }
0x2b80   :  { %v8816_v10 = vpop.eup %8815 }
0x2b81   :  { %v3783_v12 = vmul.f32 %v8816_v10, %v3775_v63 }
0x2b83   :  { %7783 = vmatmul.mubr.msk.f32.vlgmr.msra.gmra.mrb[46].mxu1 %vm50_vm2, %v3783_v12 }
0x2b84   :  { %8477 = vmatpush3.bf16.msra.mxu1 %v9006_v11  ;;  %7804 = vmatprep.mubr.msk.f32.mxu1 %vm8935_vm0, %v8936_v6 }
0x2b85   :  { %8478 = vmatprep.subr.bf16.mxu1 %v8934_v3 }
0x2b88   :  { %8480 = vmatpush3.bf16.msra.mxu1 %v9016_v14 }
0x2b89   :  { %8487 = vmatprep.subr.bf16.mxu1 %v8934_v3 }
0x2c56   :  { %v3853_v13 = vpop.f32.mrb[46].mxu1 }
0x2c57   :  { %v3854_v18 = vadd.f32 %v9444_v16, %v3853_v13  ;;  %v7784_v19 = vpop.f32.mrb[47].mxu1  ;;  %v4340_v13 = vstv %s9649_s29 }
0x2c59   :  { %v3858_v20 = vmul.f32 %v3857_v17, %v3854_v18 }
0x2c5b   :  { %v3866_v22 = vadd.f32 %v3865_v51, %v3858_v20 }
0x2c5d   :  { %v3868_v23 = vmul.f32 %v3867_v7, %v3866_v22 }
0x2c5f   :  { %v9578_v25 = vadd.f32 %v3868_v23, %v9448_v24 }
0x2c61   :  { %6734 = vst.msk [vmem:[%s9976_s3 + $0x20] sm:$0xff] %vm6729_vm1, %v9578_v25  ;;  %7794 = vmatmul.mubr.msk.f32.vlgmr.msra.gmra.mrb[48].mxu0 %vm50_vm2, %v9578_v25 }
0x2c62   :  { %8483 = vmatpush3.bf16.msra.mxu0 %v9039_v27  ;;  %7815 = vmatprep.mubr.msk.f32.mxu0 %vm8935_vm0, %v8936_v6 }
0x2c63   :  { %8484 = vmatprep.subr.bf16.mxu0 %v8934_v3 }
0x2c66   :  { %8486 = vmatpush3.bf16.msra.mxu0 %v9049_v30 }
0x2c67   :  { %8493 = vmatprep.subr.bf16.mxu0 %v8934_v3 }
0x2d34   :  { %v3941_v24 = vpop.f32.mrb[48].mxu0 }
0x2d35   :  { %v3942_v26 = vadd.f32 %v9389_v21, %v3941_v24  ;;  %v7795_v28 = vpop.f32.mrb[49].mxu0 }
0x2d37   :  { %v3945_v29 = vsub.f32 0.0, %v3942_v26 }
0x2d39   :  { %v3946_v32 = vmul.f32 1.442695, %v3945_v29 }
0x2d3b   :  { %8817 = vpow2.f32 %v3946_v32 }
0x2d45   :  { %v8818_v33 = vpop.eup %8817 }
0x2d46   :  { %v3948_v34 = vadd.f32 1.0, %v8818_v33 }
0x2d48   :  { %8819 = vrcp.f32 %v3948_v34 }
0x2d52   :  { %v8820_v35 = vpop.eup %8819 }
0x2d53   :  { %v3950_v36 = vmul.f32 %v8820_v35, %v3942_v26 }
0x2d55   :  { %7805 = vmatmul.mubr.msk.f32.vlgmr.msra.gmra.mrb[48].mxu1 %vm50_vm2, %v3950_v36 }
0x2d56   :  { %8489 = vmatpush3.bf16.msra.mxu1 %v8970_v4  ;;  %7826 = vmatprep.mubr.msk.f32.mxu1 %vm8935_vm0, %v8936_v6 }
0x2d57   :  { %8490 = vmatprep.subr.bf16.mxu1 %v8934_v3 }
0x2d5a   :  { %8492 = vmatpush3.bf16.msra.mxu1 %v8991_v8 }
0x2d5b   :  { %8499 = vmatprep.subr.bf16.mxu1 %v8934_v3 }
0x2e28   :  { %v4020_v37 = vpop.f32.mrb[48].mxu1 }
0x2e29   :  { %v4021_v38 = vadd.f32 %v9429_v61, %v4020_v37  ;;  %v7806_v39 = vpop.f32.mrb[49].mxu1 }
0x2e2b   :  { %v4024_v40 = vsub.f32 0.0, %v4021_v38 }
0x2e2d   :  { %v4025_v42 = vmul.f32 1.442695, %v4024_v40 }
0x2e2f   :  { %8821 = vpow2.f32 %v4025_v42 }
0x2e39   :  { %v8822_v31 = vpop.eup %8821 }
0x2e3a   :  { %v4027_v43 = vadd.f32 1.0, %v8822_v31 }
0x2e3c   :  { %8823 = vrcp.f32 %v4027_v43 }
0x2e46   :  { %v8824_v44 = vpop.eup %8823 }
0x2e47   :  { %v4029_v45 = vmul.f32 %v8824_v44, %v4021_v38 }
0x2e49   :  { %7816 = vmatmul.mubr.msk.f32.vlgmr.msra.gmra.mrb[50].mxu0 %vm50_vm2, %v4029_v45 }
0x2e4a   :  { %8495 = vmatpush3.bf16.msra.mxu0 %v9006_v11  ;;  %7837 = vmatprep.mubr.msk.f32.mxu0 %vm8935_vm0, %v8936_v6 }
0x2e4b   :  { %8496 = vmatprep.subr.bf16.mxu0 %v8934_v3 }
0x2e4e   :  { %8498 = vmatpush3.bf16.msra.mxu0 %v9016_v14 }
0x2e4f   :  { %8505 = vmatprep.subr.bf16.mxu0 %v8934_v3 }
0x2f1c   :  { %v4099_v46 = vpop.f32.mrb[50].mxu0 }
0x2f1d   :  { %v4100_v48 = vadd.f32 %v9444_v16, %v4099_v46  ;;  %v7817_v50 = vpop.f32.mrb[51].mxu0 }
0x2f1e   :  { %v4576_v50 = vstv %s9613_s1 }
0x2f1f   :  { %v9619_v47 = vmul.f32 %v4100_v48, %v3857_v17 }
0x2f21   :  { %v4107_v54 = vmul.f32 %v4106_v53, %v9619_v47 }
0x2f23   :  { %v4108_v41 = vadd.f32 %v4107_v54, %v9578_v25 }
0x2f25   :  { %7827 = vmatmul.mubr.msk.f32.vlgmr.msra.gmra.mrb[50].mxu1 %vm50_vm2, %v4108_v41 }
0x2f26   :  { %8501 = vmatpush3.bf16.msra.mxu1 %v9039_v27  ;;  %7848 = vmatprep.mubr.msk.f32.mxu1 %vm8935_vm0, %v8936_v6 }
0x2f27   :  { %8502 = vmatprep.subr.bf16.mxu1 %v8934_v3 }
0x2f2a   :  { %8504 = vmatpush3.bf16.msra.mxu1 %v9049_v30 }
0x2f2b   :  { %8511 = vmatprep.subr.bf16.mxu1 %v8934_v3 }
0x2ff8   :  { %v4178_v51 = vpop.f32.mrb[50].mxu1 }
0x2ff9   :  { %v4179_v49 = vadd.f32 %v9389_v21, %v4178_v51  ;;  %v7828_v52 = vpop.f32.mrb[51].mxu1 }
0x2ffb   :  { %v4182_v55 = vsub.f32 0.0, %v4179_v49 }
0x2ffd   :  { %v4183_v56 = vmul.f32 1.442695, %v4182_v55 }
0x2fff   :  { %8825 = vpow2.f32 %v4183_v56 }
0x3009   :  { %v8826_v57 = vpop.eup %8825 }
0x300a   :  { %v4185_v58 = vadd.f32 1.0, %v8826_v57 }
0x300c   :  { %8827 = vrcp.f32 %v4185_v58 }
0x3016   :  { %v8828_v59 = vpop.eup %8827 }
0x3017   :  { %v4187_v60 = vmul.f32 %v8828_v59, %v4179_v49 }
0x3019   :  { %7838 = vmatmul.mubr.msk.f32.vlgmr.msra.gmra.mrb[52].mxu0 %vm50_vm2, %v4187_v60 }
0x301a   :  { %8507 = vmatpush3.bf16.msra.mxu0 %v8970_v4  ;;  %7859 = vmatprep.mubr.msk.f32.mxu0 %vm8935_vm0, %v8936_v6 }
0x301b   :  { %8508 = vmatprep.subr.bf16.mxu0 %v8934_v3 }
0x301e   :  { %8510 = vmatpush3.bf16.msra.mxu0 %v8991_v8 }
0x301f   :  { %8517 = vmatprep.subr.bf16.mxu0 %v8934_v3 }
0x30ec   :  { %v4257_v15 = vpop.f32.mrb[52].mxu0 }
0x30ed   :  { %v4258_v62 = vadd.f32 %v9429_v61, %v4257_v15  ;;  %v7839_v63 = vpop.f32.mrb[53].mxu0 }
0x30ef   :  { %v4261_v0 = vsub.f32 0.0, %v4258_v62 }
0x30f1   :  { %v4262_v1 = vmul.f32 1.442695, %v4261_v0 }
0x30f3   :  { %8829 = vpow2.f32 %v4262_v1 }
0x30fd   :  { %v8830_v2 = vpop.eup %8829 }
0x30fe   :  { %v4264_v5 = vadd.f32 1.0, %v8830_v2 }
0x3100   :  { %8831 = vrcp.f32 %v4264_v5 }
0x310a   :  { %v8832_v9 = vpop.eup %8831 }
0x310b   :  { %v4266_v10 = vmul.f32 %v8832_v9, %v4258_v62 }
0x310d   :  { %7849 = vmatmul.mubr.msk.f32.vlgmr.msra.gmra.mrb[52].mxu1 %vm50_vm2, %v4266_v10 }
0x310e   :  { %8513 = vmatpush3.bf16.msra.mxu1 %v9006_v11  ;;  %7870 = vmatprep.mubr.msk.f32.mxu1 %vm8935_vm0, %v8936_v6 }
0x310f   :  { %8514 = vmatprep.subr.bf16.mxu1 %v8934_v3 }
0x3112   :  { %8516 = vmatpush3.bf16.msra.mxu1 %v9016_v14 }
0x3113   :  { %8523 = vmatprep.subr.bf16.mxu1 %v8934_v3 }
0x31e0   :  { %v4336_v12 = vpop.f32.mrb[52].mxu1 }
0x31e1   :  { %v4337_v17 = vadd.f32 %v9444_v16, %v4336_v12  ;;  %v7850_v18 = vpop.f32.mrb[53].mxu1 }
0x31e2   :  { %v4810_v18 = vstv %s9609_s27 }
0x31e3   :  { %v4341_v19 = vmul.f32 %v4340_v13, %v4337_v17 }
0x31e5   :  { %v4342_v20 = vmul.f32 %v4341_v19, %v4106_v53  ;;  %v4815_v45 = vmul.f32 2.0, %v4341_v19 }
0x31e7   :  { %v4343_v7 = vadd.f32 %v4342_v20, %v9578_v25  ;;  %v4816_v54 = vadd.f32 %v4815_v45, %v9619_v47 }
0x31e9   :  { %7860 = vmatmul.mubr.msk.f32.vlgmr.msra.gmra.mrb[54].mxu0 %vm50_vm2, %v4343_v7 }
0x31ea   :  { %8519 = vmatpush3.bf16.msra.mxu0 %v9039_v27  ;;  %7881 = vmatprep.mubr.msk.f32.mxu0 %vm8935_vm0, %v8936_v6 }
0x31eb   :  { %8520 = vmatprep.subr.bf16.mxu0 %v8934_v3 }
0x31ee   :  { %8522 = vmatpush3.bf16.msra.mxu0 %v9049_v30 }
0x31ef   :  { %8529 = vmatprep.subr.bf16.mxu0 %v8934_v3 }
0x32bc   :  { %v4413_v22 = vpop.f32.mrb[54].mxu0 }
0x32bd   :  { %v4414_v23 = vadd.f32 %v9389_v21, %v4413_v22  ;;  %v7861_v24 = vpop.f32.mrb[55].mxu0  ;;  %v4820_v22 = vstv %s4814_s30 }
0x32bf   :  { %v4417_v26 = vsub.f32 0.0, %v4414_v23 }
0x32c1   :  { %v4418_v28 = vmul.f32 1.442695, %v4417_v26 }
0x32c3   :  { %8833 = vpow2.f32 %v4418_v28 }
0x32cd   :  { %v8834_v29 = vpop.eup %8833 }
0x32ce   :  { %v4420_v32 = vadd.f32 1.0, %v8834_v29 }
0x32d0   :  { %8835 = vrcp.f32 %v4420_v32 }
0x32da   :  { %v8836_v33 = vpop.eup %8835 }
0x32db   :  { %v4422_v34 = vmul.f32 %v8836_v33, %v4414_v23 }
0x32dd   :  { %7871 = vmatmul.mubr.msk.f32.vlgmr.msra.gmra.mrb[54].mxu1 %vm50_vm2, %v4422_v34 }
0x32de   :  { %8525 = vmatpush3.bf16.msra.mxu1 %v8970_v4  ;;  %7892 = vmatprep.mubr.msk.f32.mxu1 %vm8935_vm0, %v8936_v6 }
0x32df   :  { %8526 = vmatprep.subr.bf16.mxu1 %v8934_v3 }
0x32e2   :  { %8528 = vmatpush3.bf16.msra.mxu1 %v8991_v8 }
0x32e3   :  { %8535 = vmatprep.subr.bf16.mxu1 %v8934_v3 }
0x33b0   :  { %v4492_v35 = vpop.f32.mrb[54].mxu1 }
0x33b1   :  { %v4493_v36 = vadd.f32 %v9429_v61, %v4492_v35  ;;  %v7872_v37 = vpop.f32.mrb[55].mxu1 }
0x33b3   :  { %v4496_v38 = vsub.f32 0.0, %v4493_v36 }
0x33b5   :  { %v4497_v39 = vmul.f32 1.442695, %v4496_v38 }
0x33b7   :  { %8837 = vpow2.f32 %v4497_v39 }
0x33c1   :  { %v8838_v40 = vpop.eup %8837 }
0x33c2   :  { %v4499_v42 = vadd.f32 1.0, %v8838_v40 }
0x33c4   :  { %8839 = vrcp.f32 %v4499_v42 }
0x33ce   :  { %v8840_v31 = vpop.eup %8839 }
0x33cf   :  { %v4501_v43 = vmul.f32 %v8840_v31, %v4493_v36 }
0x33d1   :  { %7882 = vmatmul.mubr.msk.f32.vlgmr.msra.gmra.mrb[56].mxu0 %vm50_vm2, %v4501_v43 }
0x33d2   :  { %8531 = vmatpush3.bf16.msra.mxu0 %v9006_v11  ;;  %7903 = vmatprep.mubr.msk.f32.mxu0 %vm8935_vm0, %v8936_v6 }
0x33d3   :  { %8532 = vmatprep.subr.bf16.mxu0 %v8934_v3 }
0x33d6   :  { %8534 = vmatpush3.bf16.msra.mxu0 %v9016_v14 }
0x33d7   :  { %8541 = vmatprep.subr.bf16.mxu0 %v8934_v3 }
0x34a4   :  { %v4571_v44 = vpop.f32.mrb[56].mxu0 }
0x34a5   :  { %v4572_v46 = vadd.f32 %v9444_v16, %v4571_v44  ;;  %v7883_v48 = vpop.f32.mrb[57].mxu0 }
0x34a7   :  { %v4575_v53 = vmul.f32 %v4572_v46, %v4340_v13 }
0x34a9   :  { %v4577_v41 = vmul.f32 %v4576_v50, %v4575_v53  ;;  %v4817_v51 = vmul.f32 2.0, %v4575_v53  ;;  %v5059_v53 = vstv %s5057_s8 }
0x34ab   :  { %v4578_v49 = vadd.f32 %v4577_v41, %v9578_v25  ;;  %v4818_v52 = vadd.f32 %v4817_v51, %v4816_v54 }
0x34ad   :  { %7893 = vmatmul.mubr.msk.f32.vlgmr.msra.gmra.mrb[56].mxu1 %vm50_vm2, %v4578_v49 }
0x34ae   :  { %8537 = vmatpush3.bf16.msra.mxu1 %v9039_v27  ;;  %7914 = vmatprep.mubr.msk.f32.mxu1 %vm8935_vm0, %v8936_v6 }
0x34af   :  { %8538 = vmatprep.subr.bf16.mxu1 %v8934_v3 }
0x34b2   :  { %8540 = vmatpush3.bf16.msra.mxu1 %v9049_v30 }
0x34b3   :  { %8547 = vmatprep.subr.bf16.mxu1 %v8934_v3 }
0x3580   :  { %v4648_v55 = vpop.f32.mrb[56].mxu1 }
0x3581   :  { %v4649_v47 = vadd.f32 %v9389_v21, %v4648_v55  ;;  %v7894_v56 = vpop.f32.mrb[57].mxu1 }
0x3583   :  { %v4652_v57 = vsub.f32 0.0, %v4649_v47 }
0x3585   :  { %v4653_v58 = vmul.f32 1.442695, %v4652_v57 }
0x3587   :  { %8841 = vpow2.f32 %v4653_v58 }
0x3591   :  { %v8842_v59 = vpop.eup %8841 }
0x3592   :  { %v4655_v60 = vadd.f32 1.0, %v8842_v59 }
0x3594   :  { %8843 = vrcp.f32 %v4655_v60 }
0x359e   :  { %v8844_v15 = vpop.eup %8843 }
0x359f   :  { %v4657_v62 = vmul.f32 %v8844_v15, %v4649_v47 }
0x35a1   :  { %7904 = vmatmul.mubr.msk.f32.vlgmr.msra.gmra.mrb[58].mxu0 %vm50_vm2, %v4657_v62 }
0x35a2   :  { %8543 = vmatpush3.bf16.msra.mxu0 %v8970_v4  ;;  %7925 = vmatprep.mubr.msk.f32.mxu0 %vm8935_vm0, %v8936_v6 }
0x35a3   :  { %8544 = vmatprep.subr.bf16.mxu0 %v8934_v3 }
0x35a6   :  { %8546 = vmatpush3.bf16.msra.mxu0 %v8991_v8 }
0x35a7   :  { %8553 = vmatprep.subr.bf16.mxu0 %v8934_v3 }
0x3674   :  { %v4727_v63 = vpop.f32.mrb[58].mxu0 }
0x3675   :  { %v4728_v0 = vadd.f32 %v9429_v61, %v4727_v63  ;;  %v7905_v1 = vpop.f32.mrb[59].mxu0 }
0x3677   :  { %v4731_v2 = vsub.f32 0.0, %v4728_v0 }
0x3679   :  { %v4732_v5 = vmul.f32 1.442695, %v4731_v2 }
0x367b   :  { %8845 = vpow2.f32 %v4732_v5 }
0x3685   :  { %v8846_v9 = vpop.eup %8845 }
0x3686   :  { %v4734_v10 = vadd.f32 1.0, %v8846_v9 }
0x3688   :  { %8847 = vrcp.f32 %v4734_v10 }
0x3692   :  { %v8848_v12 = vpop.eup %8847 }
0x3693   :  { %v4736_v13 = vmul.f32 %v8848_v12, %v4728_v0 }
0x3695   :  { %7915 = vmatmul.mubr.msk.f32.vlgmr.msra.gmra.mrb[58].mxu1 %vm50_vm2, %v4736_v13  ;;  %v5293_v13 = vstv %s9784_s11 }
0x3696   :  { %8549 = vmatpush3.bf16.msra.mxu1 %v9006_v11  ;;  %7936 = vmatprep.mubr.msk.f32.mxu1 %vm8935_vm0, %v8936_v6 }
0x3697   :  { %8550 = vmatprep.subr.bf16.mxu1 %v8934_v3 }
0x369a   :  { %8552 = vmatpush3.bf16.msra.mxu1 %v9016_v14 }
0x369b   :  { %8559 = vmatprep.subr.bf16.mxu1 %v8934_v3 }
0x3768   :  { %v4806_v17 = vpop.f32.mrb[58].mxu1 }
0x3769   :  { %v4807_v19 = vadd.f32 %v9444_v16, %v4806_v17  ;;  %v7916_v20 = vpop.f32.mrb[59].mxu1 }
0x376b   :  { %v4811_v7 = vmul.f32 %v4810_v18, %v4807_v19 }
0x376d   :  { %v4819_v23 = vadd.f32 %v4818_v52, %v4811_v7  ;;  %v9763_v52 = vld [vmem:[%s9975_s2 + $0x20] ss:$0 sm:$0xff] }
0x376f   :  { %v4821_v24 = vmul.f32 %v4820_v22, %v4819_v23 }
0x3771   :  { %v9708_v26 = vadd.f32 %v4821_v24, %v9578_v25 }
0x3773   :  { %6735 = vst.msk [vmem:[%s9976_s3 + $0x28] sm:$0xff] %vm6729_vm1, %v9708_v26  ;;  %7926 = vmatmul.mubr.msk.f32.vlgmr.msra.gmra.mrb[60].mxu0 %vm50_vm2, %v9708_v26 }
0x3774   :  { %8555 = vmatpush3.bf16.msra.mxu0 %v9039_v27  ;;  %7947 = vmatprep.mubr.msk.f32.mxu0 %vm8935_vm0, %v8936_v6 }
0x3775   :  { %8556 = vmatprep.subr.bf16.mxu0 %v8934_v3 }
0x3778   :  { %8558 = vmatpush3.bf16.msra.mxu0 %v9049_v30 }
0x3779   :  { %8565 = vmatprep.subr.bf16.mxu0 %v8934_v3 }
0x3846   :  { %v4894_v25 = vpop.f32.mrb[60].mxu0 }
0x3847   :  { %v4895_v28 = vadd.f32 %v9389_v21, %v4894_v25  ;;  %v7927_v29 = vpop.f32.mrb[61].mxu0 }
0x3849   :  { %v4898_v32 = vsub.f32 0.0, %v4895_v28 }
0x384b   :  { %v4899_v33 = vmul.f32 1.442695, %v4898_v32 }
0x384d   :  { %8849 = vpow2.f32 %v4899_v33 }
0x3857   :  { %v8850_v34 = vpop.eup %8849 }
0x3858   :  { %v4901_v35 = vadd.f32 1.0, %v8850_v34 }
0x385a   :  { %8851 = vrcp.f32 %v4901_v35  ;;  %v9807_v35 = vld [vmem:[%s9975_s2 + $0x48] ss:$0 sm:$0xff] }
0x3864   :  { %v8852_v36 = vpop.eup %8851 }
0x3865   :  { %v4903_v37 = vmul.f32 %v8852_v36, %v4895_v28 }
0x3867   :  { %7937 = vmatmul.mubr.msk.f32.vlgmr.msra.gmra.mrb[60].mxu1 %vm50_vm2, %v4903_v37 }
0x3868   :  { %8561 = vmatpush3.bf16.msra.mxu1 %v8970_v4  ;;  %7958 = vmatprep.mubr.msk.f32.mxu1 %vm8935_vm0, %v8936_v6 }
0x3869   :  { %8562 = vmatprep.subr.bf16.mxu1 %v8934_v3 }
0x386c   :  { %8564 = vmatpush3.bf16.msra.mxu1 %v8991_v8 }
0x386d   :  { %8571 = vmatprep.subr.bf16.mxu1 %v8934_v3 }
0x393a   :  { %v4973_v21 = vpop.f32.mrb[60].mxu1 }
0x393b   :  { %v4974_v38 = vadd.f32 %v9429_v61, %v4973_v21  ;;  %v7938_v39 = vpop.f32.mrb[61].mxu1 }
0x393d   :  { %v4977_v40 = vsub.f32 0.0, %v4974_v38 }
0x393f   :  { %v4978_v42 = vmul.f32 1.442695, %v4977_v40 }
0x3941   :  { %8853 = vpow2.f32 %v4978_v42 }
0x394b   :  { %v8854_v31 = vpop.eup %8853 }
0x394c   :  { %v4980_v43 = vadd.f32 1.0, %v8854_v31 }
0x394e   :  { %8855 = vrcp.f32 %v4980_v43 }
0x3958   :  { %v8856_v44 = vpop.eup %8855 }
0x3959   :  { %v4982_v45 = vmul.f32 %v8856_v44, %v4974_v38 }
0x395b   :  { %7948 = vmatmul.mubr.msk.f32.vlgmr.msra.gmra.mrb[62].mxu0 %vm50_vm2, %v4982_v45  ;;  %v9820_v45 = vld [vmem:[%s9975_s2 + $0x70] ss:$0 sm:$0xff]  ;;  %s5767_s2 = smul.f32 0.16666667, %s9743_s7 }
0x395c   :  { %8567 = vmatpush3.bf16.msra.mxu0 %v9006_v11  ;;  %7969 = vmatprep.mubr.msk.f32.mxu0 %vm8935_vm0, %v8936_v6 }
0x395d   :  { %8568 = vmatprep.subr.bf16.mxu0 %v8934_v3 }
0x3960   :  { %8570 = vmatpush3.bf16.msra.mxu0 %v9016_v14 }
0x3961   :  { %8577 = vmatprep.subr.bf16.mxu0 %v8934_v3 }
0x3a2e   :  { %v5052_v46 = vpop.f32.mrb[62].mxu0 }
0x3a2f   :  { %v5053_v48 = vadd.f32 %v9444_v16, %v5052_v46  ;;  %v7949_v50 = vpop.f32.mrb[63].mxu0 }
0x3a30   :  { %v5529_v50 = vstv %s9743_s7 }
0x3a31   :  { %v9749_v54 = vmul.f32 %v5053_v48, %v4810_v18 }
0x3a33   :  { %v5060_v41 = vmul.f32 %v5059_v53, %v9749_v54 }
0x3a35   :  { %v5061_v51 = vadd.f32 %v5060_v41, %v9708_v26 }
0x3a37   :  { %7959 = vmatmul.mubr.msk.f32.vlgmr.msra.gmra.mrb[62].mxu1 %vm50_vm2, %v5061_v51 }
0x3a38   :  { %8573 = vmatpush3.bf16.msra.mxu1 %v9039_v27  ;;  %7980 = vmatprep.mubr.msk.f32.mxu1 %vm8935_vm0, %v8936_v6 }
0x3a39   :  { %8574 = vmatprep.subr.bf16.mxu1 %v8934_v3 }
0x3a3c   :  { %8576 = vmatpush3.bf16.msra.mxu1 %v9049_v30 }
0x3a3d   :  { %8583 = vmatprep.subr.bf16.mxu1 %v8934_v3 }
0x3b0a   :  { %v5131_v49 = vpop.f32.mrb[62].mxu1 }
0x3b0b   :  { %v5132_v55 = vadd.f32 %v9763_v52, %v5131_v49  ;;  %v7960_v47 = vpop.f32.mrb[63].mxu1 }
0x3b0d   :  { %v5135_v56 = vsub.f32 0.0, %v5132_v55 }
0x3b0f   :  { %v5136_v57 = vmul.f32 1.442695, %v5135_v56 }
0x3b11   :  { %8857 = vpow2.f32 %v5136_v57 }
0x3b1b   :  { %v8858_v58 = vpop.eup %8857 }
0x3b1c   :  { %v5138_v59 = vadd.f32 1.0, %v8858_v58 }
0x3b1e   :  { %8859 = vrcp.f32 %v5138_v59 }
0x3b28   :  { %v8860_v60 = vpop.eup %8859 }
0x3b29   :  { %v5140_v15 = vmul.f32 %v8860_v60, %v5132_v55 }
0x3b2b   :  { %7970 = vmatmul.mubr.msk.f32.vlgmr.msra.gmra.mrb[64].mxu0 %vm50_vm2, %v5140_v15 }
0x3b2c   :  { %8579 = vmatpush3.bf16.msra.mxu0 %v8970_v4  ;;  %7991 = vmatprep.mubr.msk.f32.mxu0 %vm8935_vm0, %v8936_v6 }
0x3b2d   :  { %8580 = vmatprep.subr.bf16.mxu0 %v8934_v3 }
0x3b30   :  { %8582 = vmatpush3.bf16.msra.mxu0 %v8991_v8 }
0x3b31   :  { %8589 = vmatprep.subr.bf16.mxu0 %v8934_v3 }
0x3bfe   :  { %v5210_v62 = vpop.f32.mrb[64].mxu0 }
0x3bff   :  { %v5211_v63 = vadd.f32 %v9429_v61, %v5210_v62  ;;  %v7971_v0 = vpop.f32.mrb[65].mxu0 }
0x3c01   :  { %v5214_v1 = vsub.f32 0.0, %v5211_v63 }
0x3c03   :  { %v5215_v2 = vmul.f32 1.442695, %v5214_v1 }
0x3c05   :  { %8861 = vpow2.f32 %v5215_v2 }
0x3c0f   :  { %v8862_v5 = vpop.eup %8861 }
0x3c10   :  { %v5217_v9 = vadd.f32 1.0, %v8862_v5 }
0x3c12   :  { %8863 = vrcp.f32 %v5217_v9 }
0x3c1c   :  { %v8864_v10 = vpop.eup %8863 }
0x3c1d   :  { %v5219_v12 = vmul.f32 %v8864_v10, %v5211_v63 }
0x3c1f   :  { %7981 = vmatmul.mubr.msk.f32.vlgmr.msra.gmra.mrb[64].mxu1 %vm50_vm2, %v5219_v12 }
0x3c20   :  { %8585 = vmatpush3.bf16.msra.mxu1 %v9006_v11  ;;  %8002 = vmatprep.mubr.msk.f32.mxu1 %vm8935_vm0, %v8936_v6 }
0x3c21   :  { %8586 = vmatprep.subr.bf16.mxu1 %v8934_v3 }
0x3c24   :  { %8588 = vmatpush3.bf16.msra.mxu1 %v9016_v14 }
0x3c25   :  { %8595 = vmatprep.subr.bf16.mxu1 %v8934_v3 }
0x3cf2   :  { %v5289_v61 = vpop.f32.mrb[64].mxu1 }
0x3cf3   :  { %v5290_v17 = vadd.f32 %v9444_v16, %v5289_v61  ;;  %v7982_v18 = vpop.f32.mrb[65].mxu1 }
0x3cf4   :  { %v5763_v18 = vstv %s9739_s6 }
0x3cf5   :  { %v5294_v19 = vmul.f32 %v5293_v13, %v5290_v17 }
0x3cf7   :  { %v5295_v20 = vmul.f32 %v5294_v19, %v5059_v53  ;;  %v5768_v44 = vmul.f32 2.0, %v5294_v19 }
0x3cf9   :  { %v5296_v7 = vadd.f32 %v5295_v20, %v9708_v26  ;;  %v5769_v41 = vadd.f32 %v5768_v44, %v9749_v54 }
0x3cfb   :  { %7992 = vmatmul.mubr.msk.f32.vlgmr.msra.gmra.mrb[66].mxu0 %vm50_vm2, %v5296_v7 }
0x3cfc   :  { %8591 = vmatpush3.bf16.msra.mxu0 %v9039_v27  ;;  %8013 = vmatprep.mubr.msk.f32.mxu0 %vm8935_vm0, %v8936_v6 }
0x3cfd   :  { %8592 = vmatprep.subr.bf16.mxu0 %v8934_v3 }
0x3d00   :  { %8594 = vmatpush3.bf16.msra.mxu0 %v9049_v30 }
0x3d01   :  { %8601 = vmatprep.subr.bf16.mxu0 %v8934_v3 }
0x3dce   :  { %v5366_v22 = vpop.f32.mrb[66].mxu0 }
0x3dcf   :  { %v5367_v16 = vadd.f32 %v9763_v52, %v5366_v22  ;;  %v7993_v23 = vpop.f32.mrb[67].mxu0  ;;  %v5773_v22 = vstv %s5767_s2 }
0x3dd1   :  { %v5370_v24 = vsub.f32 0.0, %v5367_v16 }
0x3dd3   :  { %v5371_v25 = vmul.f32 1.442695, %v5370_v24 }
0x3dd5   :  { %8865 = vpow2.f32 %v5371_v25 }
0x3ddf   :  { %v8866_v28 = vpop.eup %8865 }
0x3de0   :  { %v5373_v29 = vadd.f32 1.0, %v8866_v28 }
0x3de2   :  { %8867 = vrcp.f32 %v5373_v29 }
0x3dec   :  { %v8868_v32 = vpop.eup %8867 }
0x3ded   :  { %v5375_v33 = vmul.f32 %v8868_v32, %v5367_v16 }
0x3def   :  { %8003 = vmatmul.mubr.msk.f32.vlgmr.msra.gmra.mrb[66].mxu1 %vm50_vm2, %v5375_v33 }
0x3df0   :  { %8597 = vmatpush3.bf16.msra.mxu1 %v8970_v4  ;;  %8024 = vmatprep.mubr.msk.f32.mxu1 %vm8935_vm0, %v8936_v6 }
0x3df1   :  { %8598 = vmatprep.subr.bf16.mxu1 %v8934_v3 }
0x3df4   :  { %8600 = vmatpush3.bf16.msra.mxu1 %v8991_v8 }
0x3df5   :  { %8607 = vmatprep.subr.bf16.mxu1 %v8934_v3 }
0x3ec2   :  { %v5445_v34 = vpop.f32.mrb[66].mxu1 }
0x3ec3   :  { %v5446_v36 = vadd.f32 %v9807_v35, %v5445_v34  ;;  %v8004_v37 = vpop.f32.mrb[67].mxu1 }
0x3ec5   :  { %v5449_v21 = vsub.f32 0.0, %v5446_v36 }
0x3ec7   :  { %v5450_v38 = vmul.f32 1.442695, %v5449_v21 }
0x3ec9   :  { %8869 = vpow2.f32 %v5450_v38 }
0x3ed3   :  { %v8870_v39 = vpop.eup %8869 }
0x3ed4   :  { %v5452_v40 = vadd.f32 1.0, %v8870_v39 }
0x3ed6   :  { %8871 = vrcp.f32 %v5452_v40 }
0x3ee0   :  { %v8872_v42 = vpop.eup %8871 }
0x3ee1   :  { %v5454_v31 = vmul.f32 %v8872_v42, %v5446_v36 }
0x3ee3   :  { %8014 = vmatmul.mubr.msk.f32.vlgmr.msra.gmra.mrb[68].mxu0 %vm50_vm2, %v5454_v31 }
0x3ee4   :  { %8603 = vmatpush3.bf16.msra.mxu0 %v9006_v11  ;;  %8035 = vmatprep.mubr.msk.f32.mxu0 %vm8935_vm0, %v8936_v6 }
0x3ee5   :  { %8604 = vmatprep.subr.bf16.mxu0 %v8934_v3 }
0x3ee8   :  { %8606 = vmatpush3.bf16.msra.mxu0 %v9016_v14 }
0x3ee9   :  { %8613 = vmatprep.subr.bf16.mxu0 %v8934_v3 }
0x3fb6   :  { %v5524_v43 = vpop.f32.mrb[68].mxu0 }
0x3fb7   :  { %v5525_v46 = vadd.f32 %v9820_v45, %v5524_v43  ;;  %v8015_v48 = vpop.f32.mrb[69].mxu0 }
0x3fb9   :  { %v5528_v53 = vmul.f32 %v5525_v46, %v5293_v13 }
0x3fbb   :  { %v5530_v51 = vmul.f32 %v5529_v50, %v5528_v53  ;;  %v5770_v49 = vmul.f32 2.0, %v5528_v53 }
0x3fbd   :  { %v5531_v55 = vadd.f32 %v5530_v51, %v9708_v26  ;;  %v5771_v47 = vadd.f32 %v5770_v49, %v5769_v41  ;;  %v6012_v41 = vstv %s6010_s20 }
0x3fbf   :  { %8025 = vmatmul.mubr.msk.f32.vlgmr.msra.gmra.mrb[68].mxu1 %vm50_vm2, %v5531_v55 }
0x3fc0   :  { %8609 = vmatpush3.bf16.msra.mxu1 %v9039_v27  ;;  %8046 = vmatprep.mubr.msk.f32.mxu1 %vm8935_vm0, %v8936_v6 }
0x3fc1   :  { %8610 = vmatprep.subr.bf16.mxu1 %v8934_v3 }
0x3fc4   :  { %8612 = vmatpush3.bf16.msra.mxu1 %v9049_v30 }
0x3fc5   :  { %8619 = vmatprep.subr.bf16.mxu1 %v8934_v3 }
0x4092   :  { %v5601_v56 = vpop.f32.mrb[68].mxu1 }
0x4093   :  { %v5602_v54 = vadd.f32 %v9763_v52, %v5601_v56  ;;  %v8026_v57 = vpop.f32.mrb[69].mxu1 }
0x4095   :  { %v5605_v58 = vsub.f32 0.0, %v5602_v54 }
0x4097   :  { %v5606_v59 = vmul.f32 1.442695, %v5605_v58 }
0x4099   :  { %8873 = vpow2.f32 %v5606_v59 }
0x40a3   :  { %v8874_v60 = vpop.eup %8873 }
0x40a4   :  { %v5608_v15 = vadd.f32 1.0, %v8874_v60 }
0x40a6   :  { %8875 = vrcp.f32 %v5608_v15 }
0x40b0   :  { %v8876_v62 = vpop.eup %8875 }
0x40b1   :  { %v5610_v63 = vmul.f32 %v8876_v62, %v5602_v54 }
0x40b3   :  { %8036 = vmatmul.mubr.msk.f32.vlgmr.msra.gmra.mrb[70].mxu0 %vm50_vm2, %v5610_v63 }
0x40b4   :  { %8615 = vmatpush3.bf16.msra.mxu0 %v8970_v4  ;;  %8057 = vmatprep.mubr.msk.f32.mxu0 %vm8935_vm0, %v8936_v6 }
0x40b5   :  { %8616 = vmatprep.subr.bf16.mxu0 %v8934_v3 }
0x40b8   :  { %8618 = vmatpush3.bf16.msra.mxu0 %v8991_v8 }
0x40b9   :  { %8625 = vmatprep.subr.bf16.mxu0 %v8934_v3 }
0x4186   :  { %v5680_v0 = vpop.f32.mrb[70].mxu0 }
0x4187   :  { %v5681_v1 = vadd.f32 %v9807_v35, %v5680_v0  ;;  %v8037_v2 = vpop.f32.mrb[71].mxu0 }
0x4189   :  { %v5684_v5 = vsub.f32 0.0, %v5681_v1 }
0x418b   :  { %v5685_v9 = vmul.f32 1.442695, %v5684_v5 }
0x418d   :  { %8877 = vpow2.f32 %v5685_v9 }
0x4197   :  { %v8878_v10 = vpop.eup %8877 }
0x4198   :  { %v5687_v12 = vadd.f32 1.0, %v8878_v10 }
0x419a   :  { %8879 = vrcp.f32 %v5687_v12 }
0x41a4   :  { %v8880_v61 = vpop.eup %8879 }
0x41a5   :  { %v5689_v13 = vmul.f32 %v8880_v61, %v5681_v1 }
0x41a7   :  { %8047 = vmatmul.mubr.msk.f32.vlgmr.msra.gmra.mrb[70].mxu1 %vm50_vm2, %v5689_v13 }
0x41a8   :  { %8621 = vmatpush3.bf16.msra.mxu1 %v9006_v11  ;;  %8068 = vmatprep.mubr.msk.f32.mxu1 %vm8935_vm0, %v8936_v6 }
0x41a9   :  { %8622 = vmatprep.subr.bf16.mxu1 %v8934_v3 }
0x41ac   :  { %8624 = vmatpush3.bf16.msra.mxu1 %v9016_v14 }
0x41ad   :  { %8631 = vmatprep.subr.bf16.mxu1 %v8934_v3 }
0x427a   :  { %v5759_v17 = vpop.f32.mrb[70].mxu1 }
0x427b   :  { %v5760_v19 = vadd.f32 %v9820_v45, %v5759_v17  ;;  %v8048_v20 = vpop.f32.mrb[71].mxu1  ;;  %v6246_v17 = vstv %s9924_s0 }
0x427d   :  { %v5764_v7 = vmul.f32 %v5763_v18, %v5760_v19 }
0x427f   :  { %v5772_v16 = vadd.f32 %v5771_v47, %v5764_v7 }
0x4281   :  { %v5774_v23 = vmul.f32 %v5773_v22, %v5772_v16 }
0x4283   :  { %v9853_v24 = vadd.f32 %v5774_v23, %v9708_v26 }
0x4285   :  { %6736 = vst.msk [vmem:[%s9976_s3 + $0x30] sm:$0xff] %vm6729_vm1, %v9853_v24  ;;  %8058 = vmatmul.mubr.msk.f32.vlgmr.msra.gmra.mrb[72].mxu0 %vm50_vm2, %v9853_v24 }
0x4286   :  { %8627 = vmatpush3.bf16.msra.mxu0 %v9039_v27  ;;  %8079 = vmatprep.mubr.msk.f32.mxu0 %vm8935_vm0, %v8936_v6 }
0x4287   :  { %8628 = vmatprep.subr.bf16.mxu0 %v8934_v3 }
0x428a   :  { %8630 = vmatpush3.bf16.msra.mxu0 %v9049_v30 }
0x428b   :  { %8637 = vmatprep.subr.bf16.mxu0 %v8934_v3 }
0x4358   :  { %v5847_v26 = vpop.f32.mrb[72].mxu0 }
0x4359   :  { %v5848_v25 = vadd.f32 %v9763_v52, %v5847_v26  ;;  %v8059_v28 = vpop.f32.mrb[73].mxu0 }
0x435b   :  { %v5851_v29 = vsub.f32 0.0, %v5848_v25 }
0x435d   :  { %v5852_v32 = vmul.f32 1.442695, %v5851_v29 }
0x435f   :  { %8881 = vpow2.f32 %v5852_v32 }
0x4369   :  { %v8882_v33 = vpop.eup %8881 }
0x436a   :  { %v5854_v34 = vadd.f32 1.0, %v8882_v33 }
0x436c   :  { %8883 = vrcp.f32 %v5854_v34 }
0x4376   :  { %v8884_v36 = vpop.eup %8883 }
0x4377   :  { %v5856_v37 = vmul.f32 %v8884_v36, %v5848_v25 }
0x4379   :  { %8069 = vmatmul.mubr.msk.f32.vlgmr.msra.gmra.mrb[72].mxu1 %vm50_vm2, %v5856_v37 }
0x437a   :  { %8633 = vmatpush3.bf16.msra.mxu1 %v8970_v4  ;;  %8090 = vmatprep.mubr.msk.f32.mxu1 %vm8935_vm0, %v8936_v6 }
0x437b   :  { %8634 = vmatprep.subr.bf16.mxu1 %v8934_v3 }
0x437e   :  { %8636 = vmatpush3.bf16.msra.mxu1 %v8991_v8 }
0x437f   :  { %8643 = vmatprep.subr.bf16.mxu1 %v8934_v3 }
0x444c   :  { %v5926_v21 = vpop.f32.mrb[72].mxu1 }
0x444d   :  { %v5927_v38 = vadd.f32 %v9807_v35, %v5926_v21  ;;  %v8070_v39 = vpop.f32.mrb[73].mxu1 }
0x444f   :  { %v5930_v40 = vsub.f32 0.0, %v5927_v38 }
0x4451   :  { %v5931_v42 = vmul.f32 1.442695, %v5930_v40 }
0x4453   :  { %8885 = vpow2.f32 %v5931_v42 }
0x445d   :  { %v8886_v31 = vpop.eup %8885 }
0x445e   :  { %v5933_v43 = vadd.f32 1.0, %v8886_v31 }
0x4460   :  { %8887 = vrcp.f32 %v5933_v43 }
0x446a   :  { %v8888_v44 = vpop.eup %8887 }
0x446b   :  { %v5935_v46 = vmul.f32 %v8888_v44, %v5927_v38 }
0x446d   :  { %8080 = vmatmul.mubr.msk.f32.vlgmr.msra.gmra.mrb[74].mxu0 %vm50_vm2, %v5935_v46 }
0x446e   :  { %8639 = vmatpush3.bf16.msra.mxu0 %v9006_v11  ;;  %8101 = vmatprep.mubr.msk.f32.mxu0 %vm8935_vm0, %v8936_v6 }
0x446f   :  { %8640 = vmatprep.subr.bf16.mxu0 %v8934_v3 }
0x4472   :  { %8642 = vmatpush3.bf16.msra.mxu0 %v9016_v14 }
0x4473   :  { %8649 = vmatprep.subr.bf16.mxu0 %v8934_v3 }
0x4540   :  { %v6005_v48 = vpop.f32.mrb[74].mxu0 }
0x4541   :  { %v6006_v50 = vadd.f32 %v9820_v45, %v6005_v48  ;;  %v8081_v53 = vpop.f32.mrb[75].mxu0  ;;  %v6482_v48 = vstv %s9888_s19 }
0x4543   :  { %v9894_v51 = vmul.f32 %v6006_v50, %v5763_v18 }
0x4545   :  { %v6013_v49 = vmul.f32 %v6012_v41, %v9894_v51 }
0x4547   :  { %v6014_v55 = vadd.f32 %v6013_v49, %v9853_v24 }
0x4549   :  { %8091 = vmatmul.mubr.msk.f32.vlgmr.msra.gmra.mrb[74].mxu1 %vm50_vm2, %v6014_v55 }
0x454a   :  { %8645 = vmatpush3.bf16.msra.mxu1 %v9039_v27  ;;  %8112 = vmatprep.mubr.msk.f32.mxu1 %vm8935_vm0, %v8936_v6 }
0x454b   :  { %8646 = vmatprep.subr.bf16.mxu1 %v8934_v3 }
0x454e   :  { %8648 = vmatpush3.bf16.msra.mxu1 %v9049_v30 }
0x454f   :  { %8655 = vmatprep.subr.bf16.mxu1 %v8934_v3 }
0x461c   :  { %v6084_v47 = vpop.f32.mrb[74].mxu1 }
0x461d   :  { %v6085_v56 = vadd.f32 %v9763_v52, %v6084_v47  ;;  %v8092_v54 = vpop.f32.mrb[75].mxu1 }
0x461f   :  { %v6088_v57 = vsub.f32 0.0, %v6085_v56 }
0x4621   :  { %v6089_v58 = vmul.f32 1.442695, %v6088_v57 }
0x4623   :  { %8889 = vpow2.f32 %v6089_v58 }
0x462d   :  { %v8890_v59 = vpop.eup %8889 }
0x462e   :  { %v6091_v60 = vadd.f32 1.0, %v8890_v59 }
0x4630   :  { %8891 = vrcp.f32 %v6091_v60 }
0x463a   :  { %v8892_v15 = vpop.eup %8891 }
0x463b   :  { %v6093_v62 = vmul.f32 %v8892_v15, %v6085_v56 }
0x463d   :  { %8102 = vmatmul.mubr.msk.f32.vlgmr.msra.gmra.mrb[76].mxu0 %vm50_vm2, %v6093_v62 }
0x463e   :  { %8651 = vmatpush3.bf16.msra.mxu0 %v8970_v4  ;;  %8123 = vmatprep.mubr.msk.f32.mxu0 %vm8935_vm0, %v8936_v6 }
0x463f   :  { %8652 = vmatprep.subr.bf16.mxu0 %v8934_v3 }
0x4642   :  { %8654 = vmatpush3.bf16.msra.mxu0 %v8991_v8 }
0x4643   :  { %8661 = vmatprep.subr.bf16.mxu0 %v8934_v3 }
0x4710   :  { %v6163_v63 = vpop.f32.mrb[76].mxu0 }
0x4711   :  { %v6164_v0 = vadd.f32 %v9807_v35, %v6163_v63  ;;  %v8103_v1 = vpop.f32.mrb[77].mxu0 }
0x4713   :  { %v6167_v2 = vsub.f32 0.0, %v6164_v0 }
0x4715   :  { %v6168_v5 = vmul.f32 1.442695, %v6167_v2  ;;  %v6716_v2 = vstv %s9884_s18 }
0x4717   :  { %8893 = vpow2.f32 %v6168_v5 }
0x4721   :  { %v8894_v9 = vpop.eup %8893 }
0x4722   :  { %v6170_v10 = vadd.f32 1.0, %v8894_v9 }
0x4724   :  { %8895 = vrcp.f32 %v6170_v10 }
0x472e   :  { %v8896_v12 = vpop.eup %8895 }
0x472f   :  { %v6172_v61 = vmul.f32 %v8896_v12, %v6164_v0  ;;  %v6726_v12 = vstv %s6720_s21 }
0x4731   :  { %8113 = vmatmul.mubr.msk.f32.vlgmr.msra.gmra.mrb[76].mxu1 %vm50_vm2, %v6172_v61 }
0x4732   :  { %8657 = vmatpush3.bf16.msra.mxu1 %v9006_v11  ;;  %8134 = vmatprep.mubr.msk.f32.mxu1 %vm8935_vm0, %v8936_v6 }
0x4733   :  { %8658 = vmatprep.subr.bf16.mxu1 %v8934_v3 }
0x4736   :  { %8660 = vmatpush3.bf16.msra.mxu1 %v9016_v14 }
0x4737   :  { %8667 = vmatprep.subr.bf16.mxu1 %v8934_v3 }
0x4804   :  { %v6242_v13 = vpop.f32.mrb[76].mxu1 }
0x4805   :  { %v6243_v18 = vadd.f32 %v9820_v45, %v6242_v13  ;;  %v8114_v19 = vpop.f32.mrb[77].mxu1 }
0x4807   :  { %v6247_v20 = vmul.f32 %v6246_v17, %v6243_v18 }
0x4809   :  { %v6248_v7 = vmul.f32 %v6247_v20, %v6012_v41  ;;  %v6721_v43 = vmul.f32 2.0, %v6247_v20 }
0x480b   :  { %v6249_v22 = vadd.f32 %v6248_v7, %v9853_v24  ;;  %v6722_v53 = vadd.f32 %v6721_v43, %v9894_v51 }
0x480d   :  { %8124 = vmatmul.mubr.msk.f32.vlgmr.msra.gmra.mrb[78].mxu0 %vm50_vm2, %v6249_v22 }
0x480e   :  { %8663 = vmatpush3.bf16.msra.mxu0 %v9039_v27  ;;  %8145 = vmatprep.mubr.msk.f32.mxu0 %vm8935_vm0, %v8936_v6 }
0x480f   :  { %8664 = vmatprep.subr.bf16.mxu0 %v8934_v3 }
0x4812   :  { %8666 = vmatpush3.bf16.msra.mxu0 %v9049_v30 }
0x4813   :  { %8673 = vmatprep.subr.bf16.mxu0 %v8934_v3 }
0x48e0   :  { %v6319_v16 = vpop.f32.mrb[78].mxu0 }
0x48e1   :  { %v6320_v23 = vadd.f32 %v9763_v52, %v6319_v16  ;;  %v8125_v26 = vpop.f32.mrb[79].mxu0 }
0x48e3   :  { %v6323_v25 = vsub.f32 0.0, %v6320_v23 }
0x48e5   :  { %v6324_v28 = vmul.f32 1.442695, %v6323_v25 }
0x48e7   :  { %8897 = vpow2.f32 %v6324_v28 }
0x48f1   :  { %v8898_v29 = vpop.eup %8897 }
0x48f2   :  { %v6326_v32 = vadd.f32 1.0, %v8898_v29 }
0x48f4   :  { %8899 = vrcp.f32 %v6326_v32 }
0x48fe   :  { %v8900_v33 = vpop.eup %8899 }
0x48ff   :  { %v6328_v34 = vmul.f32 %v8900_v33, %v6320_v23 }
0x4901   :  { %8135 = vmatmul.mubr.msk.f32.vlgmr.msra.gmra.mrb[78].mxu1 %vm50_vm2, %v6328_v34 }
0x4902   :  { %8669 = vmatpush3.bf16.msra.mxu1 %v8970_v4  ;;  %8156 = vmatprep.mubr.msk.f32.mxu1 %vm8935_vm0, %v8936_v6 }
0x4903   :  { %8670 = vmatprep.subr.bf16.mxu1 %v8934_v3 }
0x4906   :  { %8672 = vmatpush3.bf16.msra.mxu1 %v8991_v8 }
0x4907   :  { %8679 = vmatprep.subr.bf16.mxu1 %v8934_v3 }
0x49d4   :  { %v6398_v36 = vpop.f32.mrb[78].mxu1 }
0x49d5   :  { %v6399_v37 = vadd.f32 %v9807_v35, %v6398_v36  ;;  %v8136_v21 = vpop.f32.mrb[79].mxu1 }
0x49d7   :  { %v6402_v38 = vsub.f32 0.0, %v6399_v37 }
0x49d9   :  { %v6403_v39 = vmul.f32 1.442695, %v6402_v38 }
0x49db   :  { %8901 = vpow2.f32 %v6403_v39 }
0x49e5   :  { %v8902_v40 = vpop.eup %8901 }
0x49e6   :  { %v6405_v42 = vadd.f32 1.0, %v8902_v40 }
0x49e8   :  { %8903 = vrcp.f32 %v6405_v42 }
0x49f2   :  { %v8904_v4 = vpop.eup %8903 }
0x49f3   :  { %v6407_v31 = vmul.f32 %v8904_v4, %v6399_v37 }
0x49f5   :  { %8146 = vmatmul.mubr.msk.f32.vlgmr.msra.gmra.mrb[80].mxu0 %vm50_vm2, %v6407_v31 }
0x49f6   :  { %8675 = vmatpush3.bf16.msra.mxu0 %v9006_v11  ;;  %8167 = vmatprep.mubr.msk.f32.mxu0 %vm8935_vm0, %v8936_v6 }
0x49f7   :  { %8676 = vmatprep.subr.bf16.mxu0 %v8934_v3 }
0x49fa   :  { %8678 = vmatpush3.bf16.msra.mxu0 %v9016_v14 }
0x4ac8   :  { %v6477_v8 = vpop.f32.mrb[80].mxu0 }
0x4ac9   :  { %v6478_v44 = vadd.f32 %v9820_v45, %v6477_v8  ;;  %v8147_v46 = vpop.f32.mrb[81].mxu0 }
0x4acb   :  { %v6481_v50 = vmul.f32 %v6478_v44, %v6246_v17 }
0x4acd   :  { %v6483_v41 = vmul.f32 %v6482_v48, %v6481_v50  ;;  %v6723_v49 = vmul.f32 2.0, %v6481_v50 }
0x4acf   :  { %v6484_v11 = vadd.f32 %v6483_v41, %v9853_v24  ;;  %v6724_v55 = vadd.f32 %v6723_v49, %v6722_v53 }
0x4ad1   :  { %8157 = vmatmul.mubr.msk.f32.vlgmr.msra.gmra.mrb[80].mxu1 %vm50_vm2, %v6484_v11 }
0x4ad2   :  { %8681 = vmatpush3.bf16.msra.mxu1 %v9039_v27  ;;  %8178 = vmatprep.mubr.msk.f32.mxu1 %vm8935_vm0, %v8936_v6 }
0x4ad3   :  { %8682 = vmatprep.subr.bf16.mxu1 %v8934_v3 }
0x4ad6   :  { %8684 = vmatpush3.bf16.msra.mxu1 %v9049_v30 }
0x4ba4   :  { %v6554_v14 = vpop.f32.mrb[80].mxu1 }
0x4ba5   :  { %v6555_v47 = vadd.f32 %v9763_v52, %v6554_v14  ;;  %v8158_v51 = vpop.f32.mrb[81].mxu1 }
0x4ba7   :  { %v6558_v56 = vsub.f32 0.0, %v6555_v47 }
0x4ba9   :  { %v6559_v54 = vmul.f32 1.442695, %v6558_v56 }
0x4bab   :  { %8905 = vpow2.f32 %v6559_v54 }
0x4bb5   :  { %v8906_v57 = vpop.eup %8905 }
0x4bb6   :  { %v6561_v58 = vadd.f32 1.0, %v8906_v57 }
0x4bb8   :  { %8907 = vrcp.f32 %v6561_v58 }
0x4bc2   :  { %v8908_v59 = vpop.eup %8907 }
0x4bc3   :  { %v6563_v27 = vmul.f32 %v8908_v59, %v6555_v47 }
0x4bc5   :  { %8168 = vmatmul.mubr.msk.f32.vlgmr.msra.gmra.mrb[82].mxu0 %vm50_vm2, %v6563_v27 }
0x4c98   :  { %v6633_v6 = vpop.f32.mrb[82].mxu0 }
0x4c99   :  { %v6634_v3 = vadd.f32 %v9807_v35, %v6633_v6  ;;  %v8169_v30 = vpop.f32.mrb[83].mxu0 }
0x4c9b   :  { %v6637_v60 = vsub.f32 0.0, %v6634_v3 }
0x4c9d   :  { %v6638_v15 = vmul.f32 1.442695, %v6637_v60 }
0x4c9f   :  { %8909 = vpow2.f32 %v6638_v15 }
0x4ca9   :  { %v8910_v52 = vpop.eup %8909 }
0x4caa   :  { %v6640_v62 = vadd.f32 1.0, %v8910_v52 }
0x4cac   :  { %8911 = vrcp.f32 %v6640_v62 }
0x4cb6   :  { %v8912_v63 = vpop.eup %8911 }
0x4cb7   :  { %v6642_v0 = vmul.f32 %v8912_v63, %v6634_v3 }
0x4cb9   :  { %8179 = vmatmul.mubr.msk.f32.vlgmr.msra.gmra.mrb[82].mxu1 %vm50_vm2, %v6642_v0 }
0x4d8c   :  { %v6712_v1 = vpop.f32.mrb[82].mxu1 }
0x4d8d   :  { %v6713_v5 = vadd.f32 %v9820_v45, %v6712_v1  ;;  %v8180_v9 = vpop.f32.mrb[83].mxu1 }
0x4d8f   :  { %v6717_v10 = vmul.f32 %v6716_v2, %v6713_v5 }
0x4d91   :  { %v6725_v35 = vadd.f32 %v6724_v55, %v6717_v10 }
0x4d93   :  { %v6727_v61 = vmul.f32 %v6726_v12, %v6725_v35 }
0x4d95   :  { %v6728_v13 = vadd.f32 %v6727_v61, %v9853_v24 }
0x4d97   :  { %6737 = vst.msk [vmem:[%s9976_s3 + $0x38] sm:$0xff] %vm6729_vm1, %v6728_v13 }
0x4d98   :  { %6742 = vsyncpa [#allocation3], 1 }

</bundles_post_ra>
